<compile_context>
chip_gen: v6e
topology: v6e:2x2x1
jax: 0.10.0
libtpu: 0.0.40
codegen_flags: <defaults>
</compile_context>

<pallas_src>
import functools

import jax
import jax.numpy as jnp
from jax.experimental import pallas as pl
from jax.experimental.pallas import tpu as pltpu

# Exact (multi-pass) f32 MXU matmuls everywhere so the f32 path tracks the f32 PyTorch
# module; the bf16-operand fast path is selected explicitly via compute_dtype.
jax.config.update("jax_default_matmul_precision", "highest")


# ----------------------------- sizing helpers -----------------------------
def _round_up(x, m):
    return ((x + m - 1) // m) * m


def _vmem_capacity_bytes():
    """Physical VMEM per core; v7x-safe 64 MiB fallback if the query is unavailable."""
    try:
        cap = int(pltpu.get_tpu_info().vmem_capacity_bytes)
        if cap > 0:
            return cap
    except Exception:
        pass
    return 64 * 1024 * 1024


def _block_vmem_bytes(bb, T, D, H, O, w_bytes):
    """VMEM working set of one batch block (double-buffered I/O + scratches + weights)."""
    f32 = 4
    x_blk = 2 * bb * T * D * f32          # input block (double buffered)
    out_blk = 2 * bb * T * O * f32        # output block (double buffered)
    gx_s = bb * T * 8 * H * f32           # gate-input scratch
    h_s = 2 * bb * T * H * f32            # per-direction hidden scratches
    w = 2 * (D * 8 * H + 2 * H * 8 * H + 2 * H * O) * w_bytes
    b = 2 * (8 * H + O) * f32
    return x_blk + out_blk + gx_s + h_s + w + b


def _pick_batch_block(B, T, D, H, O, w_bytes, budget):
    """Largest batch block (multiple of 8 when B allows) whose working set fits `budget`."""
    if B < 8:
        return B
    cap = _round_up(B, 8)
    for cand in (512, 256, 128, 64, 32, 16, 8):
        c = min(cand, cap)
        if _block_vmem_bytes(c, T, D, H, O, w_bytes) <= budget:
            return c
    return 8


# --------------------------- fused kernel ---------------------------
def _fused_bilstm_kernel(x_ref, w_in_ref, b_in_ref, w_hh_ref, w_fc_ref, b_fc_ref,
                         out_ref, gx_s, hf_s, hb_s, *,
                         T, H, D, O, has_residual, merge_hh, compute_dtype):
    """One batch block end-to-end: input projection -> bi-LSTM recurrence -> FC(+residual).

    x_ref:   (bb, T, D)     input block
    w_in_ref:(D, 8H)        [W_ih_f^T | W_ih_b^T]           (compute_dtype)
    b_in_ref:(1, 8H)        [b_ih_f+b_hh_f | b_ih_b+b_hh_b] (f32)
    w_hh_ref:(2H, 8H) block-diag (merge_hh) or (H, 8H) side-by-side (compute_dtype)
    w_fc_ref:(2H, O)        fc weight, rows [:H] fwd / [H:] bwd (compute_dtype)
    b_fc_ref:(1, O)
    out_ref: (bb, T, O)
    gx_s:    VMEM (bb, T, 8H) f32 ;  hf_s / hb_s: VMEM (bb, T, H) f32
    """
    bb = x_ref.shape[0]
    f32 = jnp.float32

    # ---- prologue: input projection for the whole block (one big MXU matmul) ----
    x_block = x_ref[...]
    x2 = x_block.reshape(bb * T, D).astype(compute_dtype)      # free when T % 8 == 0
    gx = jnp.dot(x2, w_in_ref[...], preferred_element_type=f32) + b_in_ref[...]
    gx_s[...] = gx.reshape(bb, T, 8 * H)

    w_hh = w_hh_ref[...]

    def nonlin(gates):
        # gates: (bb, 4H) in PyTorch [i, f, g, o] order.
        if H >= 128:
            # selective: sigmoid only on i/f/o tiles, tanh only on g tile.
            i = jax.nn.sigmoid(gates[:, :H])
            f = jax.nn.sigmoid(gates[:, H:2 * H])
            g = jnp.tanh(gates[:, 2 * H:3 * H])
            o = jax.nn.sigmoid(gates[:, 3 * H:])
            return i, f, g, o
        # whole-vreg form for small H (sub-128-lane slices would just add masked ops).
        s = jax.nn.sigmoid(gates)
        th = jnp.tanh(gates)
        return s[:, :H], s[:, H:2 * H], th[:, 2 * H:3 * H], s[:, 3 * H:]

    # ---- time loop: h/c carried as f32 values, per-step state stays in VMEM ----
    def step(t, carry):
        h_f, c_f, h_b, c_b = carry
        tb = T - 1 - t

        gx_f = gx_s[:, pl.ds(t, 1), :][:, 0, : 4 * H]           # (bb, 4H) fwd
        gx_b = gx_s[:, pl.ds(tb, 1), :][:, 0, 4 * H:]           # (bb, 4H) bwd

        if merge_hh:
            h_cat = jnp.concatenate([h_f, h_b], axis=1).astype(compute_dtype)
            g_hh = jnp.dot(h_cat, w_hh, preferred_element_type=f32)   # (bb, 8H)
            gates_f = gx_f + g_hh[:, : 4 * H]
            gates_b = gx_b + g_hh[:, 4 * H:]
        else:
            gates_f = gx_f + jnp.dot(h_f.astype(compute_dtype), w_hh[:, : 4 * H],
                                     preferred_element_type=f32)
            gates_b = gx_b + jnp.dot(h_b.astype(compute_dtype), w_hh[:, 4 * H:],
                                     preferred_element_type=f32)

        i_f, f_f, g_f, o_f = nonlin(gates_f)
        i_b, f_b, g_b, o_b = nonlin(gates_b)

        c_f_new = f_f * c_f + i_f * g_f
        h_f_new = o_f * jnp.tanh(c_f_new)
        c_b_new = f_b * c_b + i_b * g_b
        h_b_new = o_b * jnp.tanh(c_b_new)

        hf_s[:, pl.ds(t, 1), :] = h_f_new[:, None, :]
        hb_s[:, pl.ds(tb, 1), :] = h_b_new[:, None, :]
        return h_f_new, c_f_new, h_b_new, c_b_new

    z = jnp.zeros((bb, H), f32)
    jax.lax.fori_loop(0, T, step, (z, z, z, z),
                      unroll=(True if T <= 32 else 4))

    # ---- epilogue: FC (+bias, +residual) as one dense block matmul + one dense store ----
    hf2 = hf_s[...].reshape(bb * T, H).astype(compute_dtype)
    hb2 = hb_s[...].reshape(bb * T, H).astype(compute_dtype)
    w_fc = w_fc_ref[...]
    acc = jnp.dot(hf2, w_fc[:H, :], preferred_element_type=f32)
    acc = acc + jnp.dot(hb2, w_fc[H:, :], preferred_element_type=f32)
    out = (acc + b_fc_ref[...]).reshape(bb, T, O)
    if has_residual:
        out = out + x_block.astype(f32)
    out_ref[...] = out.astype(out_ref.dtype)


# --------------------------- parameters ---------------------------
def init_params(key, input_size, hidden_size, output_size):
    """Deterministic init mimicking PyTorch default uniform(-k, k); PyTorch weight layout."""
    H, D, O = hidden_size, input_size, output_size
    k_lstm = 1.0 / jnp.sqrt(H)
    k_fc = 1.0 / jnp.sqrt(2 * H)
    keys = jax.random.split(key, 10)
    u = lambda kk, shape, k: jax.random.uniform(kk, shape, jnp.float32, -k, k)
    return {
        "w_ih_f": u(keys[0], (4 * H, D), k_lstm),
        "w_hh_f": u(keys[1], (4 * H, H), k_lstm),
        "b_ih_f": u(keys[2], (4 * H,), k_lstm),
        "b_hh_f": u(keys[3], (4 * H,), k_lstm),
        "w_ih_b": u(keys[4], (4 * H, D), k_lstm),
        "w_hh_b": u(keys[5], (4 * H, H), k_lstm),
        "b_ih_b": u(keys[6], (4 * H,), k_lstm),
        "b_hh_b": u(keys[7], (4 * H,), k_lstm),
        "fc_w": u(keys[8], (O, 2 * H), k_fc),
        "fc_b": u(keys[9], (O,), k_fc),
    }


def prepare_weights(params, hidden_size, output_size, compute_dtype=jnp.float32):
    """One-time weight prep (transpose / concat / block-diag / dtype cast)."""
    H = hidden_size
    del output_size  # shapes inferred from fc_w
    w_in = jnp.concatenate([params["w_ih_f"].T, params["w_ih_b"].T], axis=1)   # (D, 8H)
    b_in = jnp.concatenate(
        [params["b_ih_f"] + params["b_hh_f"],
         params["b_ih_b"] + params["b_hh_b"]])[None, :]                        # (1, 8H)
    whh_f = params["w_hh_f"].T   # (H, 4H)
    whh_b = params["w_hh_b"].T   # (H, 4H)
    # Merge the two per-step recurrent matmuls into one when the 2H contraction still
    # fits a single MXU pass on every chip generation (128 on v5e; could be 256 on v6e/v7x).
    merge_hh = (2 * H) <= 128
    if merge_hh:
        w_hh = jnp.zeros((2 * H, 8 * H), jnp.float32)
        w_hh = w_hh.at[:H, : 4 * H].set(whh_f).at[H:, 4 * H:].set(whh_b)       # block-diag
    else:
        w_hh = jnp.concatenate([whh_f, whh_b], axis=1)                         # (H, 8H)
    return {
        "w_in": w_in.astype(compute_dtype),
        "b_in": b_in.astype(jnp.float32),
        "w_hh": w_hh.astype(compute_dtype),
        "w_fc": params["fc_w"].T.astype(compute_dtype),                        # (2H, O)
        "b_fc": params["fc_b"][None, :].astype(jnp.float32),                   # (1, O)
        "merge_hh": merge_hh,
        "compute_dtype": compute_dtype,
    }


# --------------------------- forward ---------------------------
def bidirectional_lstm_forward(x, prepared, hidden_size, output_size):
    """x: (B, T, input_size) batch_first, matching the PyTorch module (eval mode)."""
    B, T, D = x.shape
    H, O = hidden_size, output_size
    has_residual = (D == O)
    cdt = prepared["compute_dtype"]
    w_bytes = jnp.dtype(cdt).itemsize

    capacity = _vmem_capacity_bytes()
    budget = capacity // 3
    bb = _pick_batch_block(B, T, D, H, O, w_bytes, budget)
    B_pad = _round_up(B, bb)
    xp = x if B_pad == B else jnp.pad(x, ((0, B_pad - B), (0, 0), (0, 0)))

    need = _block_vmem_bytes(bb, T, D, H, O, w_bytes)
    vmem_limit = int(min(capacity * 3 // 4, max(2 * need, 32 * 1024 * 1024)))

    kernel = functools.partial(
        _fused_bilstm_kernel,
        T=T, H=H, D=D, O=O,
        has_residual=has_residual,
        merge_hh=prepared["merge_hh"],
        compute_dtype=cdt,
    )

    out = pl.pallas_call(
        kernel,
        out_shape=jax.ShapeDtypeStruct((B_pad, T, O), jnp.float32),
        grid=(B_pad // bb,),
        in_specs=[
            pl.BlockSpec((bb, T, D), lambda i: (i, 0, 0)),
            pl.BlockSpec(prepared["w_in"].shape, lambda i: (0, 0)),
            pl.BlockSpec(prepared["b_in"].shape, lambda i: (0, 0)),
            pl.BlockSpec(prepared["w_hh"].shape, lambda i: (0, 0)),
            pl.BlockSpec(prepared["w_fc"].shape, lambda i: (0, 0)),
            pl.BlockSpec(prepared["b_fc"].shape, lambda i: (0, 0)),
        ],
        out_specs=pl.BlockSpec((bb, T, O), lambda i: (i, 0, 0)),
        scratch_shapes=[
            pltpu.VMEM((bb, T, 8 * H), jnp.float32),   # gate-input scratch
            pltpu.VMEM((bb, T, H), jnp.float32),       # forward hidden states
            pltpu.VMEM((bb, T, H), jnp.float32),       # backward hidden states
        ],
        compiler_params=pltpu.CompilerParams(
            dimension_semantics=("parallel",),
            vmem_limit_bytes=vmem_limit,
        ),
    )(xp, prepared["w_in"], prepared["b_in"], prepared["w_hh"],
      prepared["w_fc"], prepared["b_fc"])

    if B_pad != B:
        out = out[:B]
    return out.astype(x.dtype)


# ---------------- pure-JAX reference (correctness check) ----------------
def _lstm_ref_dir(x_tbd, wih_t, whh_t, bias, reverse):
    H = whh_t.shape[0]
    xs = x_tbd[::-1] if reverse else x_tbd

    def step(carry, x_t):
        h, c = carry
        gates = x_t @ wih_t + h @ whh_t + bias
        i = jax.nn.sigmoid(gates[:, :H])
        f = jax.nn.sigmoid(gates[:, H:2 * H])
        g = jnp.tanh(gates[:, 2 * H:3 * H])
        o = jax.nn.sigmoid(gates[:, 3 * H:4 * H])
        c = f * c + i * g
        h = o * jnp.tanh(c)
        return (h, c), h

    B = x_tbd.shape[1]
    init = (jnp.zeros((B, H), jnp.float32), jnp.zeros((B, H), jnp.float32))
    _, hs = jax.lax.scan(step, init, xs)
    return hs[::-1] if reverse else hs


def _forward_ref(x, params, hidden_size, output_size):
    B, T, D = x.shape
    O = output_size
    x_tbd = jnp.transpose(x, (1, 0, 2))
    h_f = _lstm_ref_dir(x_tbd, params["w_ih_f"].T, params["w_hh_f"].T,
                        (params["b_ih_f"] + params["b_hh_f"])[None, :], False)
    h_b = _lstm_ref_dir(x_tbd, params["w_ih_b"].T, params["w_hh_b"].T,
                        (params["b_ih_b"] + params["b_hh_b"])[None, :], True)
    rnn = jnp.transpose(jnp.concatenate([h_f, h_b], -1), (1, 0, 2))
    out = rnn @ params["fc_w"].T + params["fc_b"]
    if D == O:
        out = out + x
    return out


if __name__ == "__main__":
    B, T = 2, 8
    input_size, hidden_size, output_size = 16, 32, 16   # input==output -> residual active

    key = jax.random.PRNGKey(0)
    kx, kp = jax.random.split(key)
    x = jax.random.normal(kx, (B, T, input_size), dtype=jnp.float32)
    params = init_params(kp, input_size, hidden_size, output_size)
    ref = jax.block_until_ready(_forward_ref(x, params, hidden_size, output_size))

    # f32 MXU-operand path (parity with the f32 PyTorch module).
    prep_f32 = prepare_weights(params, hidden_size, output_size, compute_dtype=jnp.float32)
    out = jax.block_until_ready(
        bidirectional_lstm_forward(x, prep_f32, hidden_size, output_size))
    assert out.shape == (B, T, output_size)
    assert bool(jnp.allclose(out, ref, atol=5e-3, rtol=5e-3)), \
        "Pallas f32 output mismatch vs JAX reference"

    # bf16 MXU-operand fast path (f32 accumulation, f32 h/c carries) - looser tolerance.
    prep_bf16 = prepare_weights(params, hidden_size, output_size, compute_dtype=jnp.bfloat16)
    out_bf16 = jax.block_until_ready(
        bidirectional_lstm_forward(x, prep_bf16, hidden_size, output_size))
    assert bool(jnp.allclose(out_bf16, ref, atol=5e-2, rtol=5e-2)), \
        "Pallas bf16 output mismatch vs JAX reference"

    print("KERNEL_OK")
</pallas_src>

<mosaic_0001>
module attributes {stable_mosaic.version = 11 : i64} {
  func.func @_fused_bilstm_kernel(%arg0: i32, %arg1: memref<2x8x16xf32, #tpu.memory_space<vmem>>, %arg2: memref<16x256xf32, #tpu.memory_space<vmem>>, %arg3: memref<1x256xf32, #tpu.memory_space<vmem>>, %arg4: memref<64x256xf32, #tpu.memory_space<vmem>>, %arg5: memref<64x16xf32, #tpu.memory_space<vmem>>, %arg6: memref<1x16xf32, #tpu.memory_space<vmem>>, %arg7: memref<2x8x16xf32, #tpu.memory_space<vmem>>, %arg8: memref<2x8x256xf32, #tpu.memory_space<vmem>>, %arg9: memref<2x8x32xf32, #tpu.memory_space<vmem>>, %arg10: memref<2x8x32xf32, #tpu.memory_space<vmem>>) attributes {dimension_semantics = [#tpu.dimension_semantics<parallel>], iteration_bounds = array<i64: 1>, scalar_prefetch = 0 : i64, scratch_operands = 3 : i64, tpu.core_type = #tpu.core_type<tc>, window_params = [{transform_indices = @transform_0, window_bounds = array<i64: 2, 8, 16>}, {pipeline_mode = #tpu.pipeline_mode<synchronous>, transform_indices = @transform_1, window_bounds = array<i64: 16, 256>}, {pipeline_mode = #tpu.pipeline_mode<synchronous>, transform_indices = @transform_2, window_bounds = array<i64: 1, 256>}, {pipeline_mode = #tpu.pipeline_mode<synchronous>, transform_indices = @transform_3, window_bounds = array<i64: 64, 256>}, {pipeline_mode = #tpu.pipeline_mode<synchronous>, transform_indices = @transform_4, window_bounds = array<i64: 64, 16>}, {pipeline_mode = #tpu.pipeline_mode<synchronous>, transform_indices = @transform_5, window_bounds = array<i64: 1, 16>}, {transform_indices = @transform_6, window_bounds = array<i64: 2, 8, 16>}]} {
    %c0 = arith.constant 0 : index
    %c0_0 = arith.constant 0 : index
    %c0_1 = arith.constant 0 : index
    %0 = vector.load %arg1[%c0, %c0_0, %c0_1] : memref<2x8x16xf32, #tpu.memory_space<vmem>>, vector<2x8x16xf32>
    %1 = vector.shape_cast %0 : vector<2x8x16xf32> to vector<16x16xf32>
    %c0_2 = arith.constant 0 : index
    %c0_3 = arith.constant 0 : index
    %2 = vector.load %arg2[%c0_2, %c0_3] : memref<16x256xf32, #tpu.memory_space<vmem>>, vector<16x256xf32>
    %cst = arith.constant dense<0.000000e+00> : vector<16x256xf32>
    %3 = tpu.matmul %1, %2, %cst {dimension_numbers = #tpu.dot_dimension_numbers<[1], [0], [0], [1], [0, 0, 1, 1], [], []>, precision = #tpu.contract_precision<fp32>} : vector<16x16xf32>, vector<16x256xf32>, vector<16x256xf32> -> vector<16x256xf32>
    %c0_4 = arith.constant 0 : index
    %c0_5 = arith.constant 0 : index
    %4 = vector.load %arg3[%c0_4, %c0_5] : memref<1x256xf32, #tpu.memory_space<vmem>>, vector<1x256xf32>
    %5 = vector.broadcast %4 : vector<1x256xf32> to vector<16x256xf32>
    %6 = arith.addf %3, %5 : vector<16x256xf32>
    %7 = vector.shape_cast %6 : vector<16x256xf32> to vector<2x8x256xf32>
    %c0_6 = arith.constant 0 : index
    %c0_7 = arith.constant 0 : index
    %c0_8 = arith.constant 0 : index
    %8 = vector.load %arg8[%c0_6, %c0_7, %c0_8] : memref<2x8x256xf32, #tpu.memory_space<vmem>>, vector<2x8x256xf32>
    tpu.vector_store %arg8[%c0_6, %c0_7, %c0_8], %7 {strides = array<i32>} : memref<2x8x256xf32, #tpu.memory_space<vmem>>, vector<2x8x256xf32>,
    %c0_9 = arith.constant 0 : index
    %c0_10 = arith.constant 0 : index
    %9 = vector.load %arg4[%c0_9, %c0_10] : memref<64x256xf32, #tpu.memory_space<vmem>>, vector<64x256xf32>
    %cst_11 = arith.constant 0.000000e+00 : f32
    %10 = vector.broadcast %cst_11 : f32 to vector<2x32xf32>
    %c0_i32 = arith.constant 0 : i32
    %c7_i32 = arith.constant 7 : i32
    %11 = arith.subi %c7_i32, %c0_i32 : i32
    %c0_12 = arith.constant 0 : index
    %12 = arith.index_cast %c0_i32 : i32 to index
    %c0_13 = arith.constant 0 : index
    %13 = vector.load %arg8[%c0_12, %12, %c0_13] : memref<2x8x256xf32, #tpu.memory_space<vmem>>, vector<2x1x256xf32>
    %14 = vector.extract_strided_slice %13 {offsets = [0, 0, 0], sizes = [2, 1, 128], strides = [1, 1, 1]} : vector<2x1x256xf32> to vector<2x1x128xf32>
    %15 = vector.shape_cast %14 : vector<2x1x128xf32> to vector<2x128xf32>
    %c0_14 = arith.constant 0 : index
    %16 = arith.index_cast %11 : i32 to index
    %c0_15 = arith.constant 0 : index
    %17 = vector.load %arg8[%c0_14, %16, %c0_15] : memref<2x8x256xf32, #tpu.memory_space<vmem>>, vector<2x1x256xf32>
    %18 = vector.extract_strided_slice %17 {offsets = [0, 0, 128], sizes = [2, 1, 128], strides = [1, 1, 1]} : vector<2x1x256xf32> to vector<2x1x128xf32>
    %19 = vector.shape_cast %18 : vector<2x1x128xf32> to vector<2x128xf32>
    %20 = tpu.concatenate %10, %10 in 1 : vector<2x32xf32>, vector<2x32xf32> -> vector<2x64xf32>
    %cst_16 = arith.constant dense<0.000000e+00> : vector<2x256xf32>
    %21 = tpu.matmul %20, %9, %cst_16 {dimension_numbers = #tpu.dot_dimension_numbers<[1], [0], [0], [1], [0, 0, 1, 1], [], []>, precision = #tpu.contract_precision<fp32>} : vector<2x64xf32>, vector<64x256xf32>, vector<2x256xf32> -> vector<2x256xf32>
    %22 = vector.extract_strided_slice %21 {offsets = [0, 0], sizes = [2, 128], strides = [1, 1]} : vector<2x256xf32> to vector<2x128xf32>
    %23 = arith.addf %15, %22 : vector<2x128xf32>
    %24 = vector.extract_strided_slice %21 {offsets = [0, 128], sizes = [2, 128], strides = [1, 1]} : vector<2x256xf32> to vector<2x128xf32>
    %25 = arith.addf %19, %24 : vector<2x128xf32>
    %26 = arith.negf %23 : vector<2x128xf32>
    %27 = math.exp %26 : vector<2x128xf32>
    %cst_17 = arith.constant 1.000000e+00 : f32
    %28 = vector.broadcast %cst_17 : f32 to vector<2x128xf32>
    %29 = arith.addf %28, %27 : vector<2x128xf32>
    %30 = arith.divf %28, %29 : vector<2x128xf32>
    %31 = math.tanh %23 : vector<2x128xf32>
    %32 = vector.extract_strided_slice %30 {offsets = [0, 0], sizes = [2, 32], strides = [1, 1]} : vector<2x128xf32> to vector<2x32xf32>
    %33 = vector.extract_strided_slice %30 {offsets = [0, 32], sizes = [2, 32], strides = [1, 1]} : vector<2x128xf32> to vector<2x32xf32>
    %34 = vector.extract_strided_slice %31 {offsets = [0, 64], sizes = [2, 32], strides = [1, 1]} : vector<2x128xf32> to vector<2x32xf32>
    %35 = vector.extract_strided_slice %30 {offsets = [0, 96], sizes = [2, 32], strides = [1, 1]} : vector<2x128xf32> to vector<2x32xf32>
    %36 = arith.negf %25 : vector<2x128xf32>
    %37 = math.exp %36 : vector<2x128xf32>
    %cst_18 = arith.constant 1.000000e+00 : f32
    %38 = vector.broadcast %cst_18 : f32 to vector<2x128xf32>
    %39 = arith.addf %38, %37 : vector<2x128xf32>
    %40 = arith.divf %38, %39 : vector<2x128xf32>
    %41 = math.tanh %25 : vector<2x128xf32>
    %42 = vector.extract_strided_slice %40 {offsets = [0, 0], sizes = [2, 32], strides = [1, 1]} : vector<2x128xf32> to vector<2x32xf32>
    %43 = vector.extract_strided_slice %40 {offsets = [0, 32], sizes = [2, 32], strides = [1, 1]} : vector<2x128xf32> to vector<2x32xf32>
    %44 = vector.extract_strided_slice %41 {offsets = [0, 64], sizes = [2, 32], strides = [1, 1]} : vector<2x128xf32> to vector<2x32xf32>
    %45 = vector.extract_strided_slice %40 {offsets = [0, 96], sizes = [2, 32], strides = [1, 1]} : vector<2x128xf32> to vector<2x32xf32>
    %46 = arith.mulf %33, %10 : vector<2x32xf32>
    %47 = arith.mulf %32, %34 : vector<2x32xf32>
    %48 = arith.addf %46, %47 : vector<2x32xf32>
    %49 = math.tanh %48 : vector<2x32xf32>
    %50 = arith.mulf %35, %49 : vector<2x32xf32>
    %51 = arith.mulf %43, %10 : vector<2x32xf32>
    %52 = arith.mulf %42, %44 : vector<2x32xf32>
    %53 = arith.addf %51, %52 : vector<2x32xf32>
    %54 = math.tanh %53 : vector<2x32xf32>
    %55 = arith.mulf %45, %54 : vector<2x32xf32>
    %56 = vector.shape_cast %50 : vector<2x32xf32> to vector<2x1x32xf32>
    %c0_19 = arith.constant 0 : index
    %57 = arith.index_cast %c0_i32 : i32 to index
    %c0_20 = arith.constant 0 : index
    %58 = vector.load %arg9[%c0_19, %57, %c0_20] : memref<2x8x32xf32, #tpu.memory_space<vmem>>, vector<2x1x32xf32>
    tpu.vector_store %arg9[%c0_19, %57, %c0_20], %56 {strides = array<i32>} : memref<2x8x32xf32, #tpu.memory_space<vmem>>, vector<2x1x32xf32>,
    %59 = vector.shape_cast %55 : vector<2x32xf32> to vector<2x1x32xf32>
    %c0_21 = arith.constant 0 : index
    %60 = arith.index_cast %11 : i32 to index
    %c0_22 = arith.constant 0 : index
    %61 = vector.load %arg10[%c0_21, %60, %c0_22] : memref<2x8x32xf32, #tpu.memory_space<vmem>>, vector<2x1x32xf32>
    tpu.vector_store %arg10[%c0_21, %60, %c0_22], %59 {strides = array<i32>} : memref<2x8x32xf32, #tpu.memory_space<vmem>>, vector<2x1x32xf32>,
    %c1_i32 = arith.constant 1 : i32
    %c7_i32_23 = arith.constant 7 : i32
    %62 = arith.subi %c7_i32_23, %c1_i32 : i32
    %c0_24 = arith.constant 0 : index
    %63 = arith.index_cast %c1_i32 : i32 to index
    %c0_25 = arith.constant 0 : index
    %64 = vector.load %arg8[%c0_24, %63, %c0_25] : memref<2x8x256xf32, #tpu.memory_space<vmem>>, vector<2x1x256xf32>
    %65 = vector.extract_strided_slice %64 {offsets = [0, 0, 0], sizes = [2, 1, 128], strides = [1, 1, 1]} : vector<2x1x256xf32> to vector<2x1x128xf32>
    %66 = vector.shape_cast %65 : vector<2x1x128xf32> to vector<2x128xf32>
    %c0_26 = arith.constant 0 : index
    %67 = arith.index_cast %62 : i32 to index
    %c0_27 = arith.constant 0 : index
    %68 = vector.load %arg8[%c0_26, %67, %c0_27] : memref<2x8x256xf32, #tpu.memory_space<vmem>>, vector<2x1x256xf32>
    %69 = vector.extract_strided_slice %68 {offsets = [0, 0, 128], sizes = [2, 1, 128], strides = [1, 1, 1]} : vector<2x1x256xf32> to vector<2x1x128xf32>
    %70 = vector.shape_cast %69 : vector<2x1x128xf32> to vector<2x128xf32>
    %71 = tpu.concatenate %50, %55 in 1 : vector<2x32xf32>, vector<2x32xf32> -> vector<2x64xf32>
    %cst_28 = arith.constant dense<0.000000e+00> : vector<2x256xf32>
    %72 = tpu.matmul %71, %9, %cst_28 {dimension_numbers = #tpu.dot_dimension_numbers<[1], [0], [0], [1], [0, 0, 1, 1], [], []>, precision = #tpu.contract_precision<fp32>} : vector<2x64xf32>, vector<64x256xf32>, vector<2x256xf32> -> vector<2x256xf32>
    %73 = vector.extract_strided_slice %72 {offsets = [0, 0], sizes = [2, 128], strides = [1, 1]} : vector<2x256xf32> to vector<2x128xf32>
    %74 = arith.addf %66, %73 : vector<2x128xf32>
    %75 = vector.extract_strided_slice %72 {offsets = [0, 128], sizes = [2, 128], strides = [1, 1]} : vector<2x256xf32> to vector<2x128xf32>
    %76 = arith.addf %70, %75 : vector<2x128xf32>
    %77 = arith.negf %74 : vector<2x128xf32>
    %78 = math.exp %77 : vector<2x128xf32>
    %cst_29 = arith.constant 1.000000e+00 : f32
    %79 = vector.broadcast %cst_29 : f32 to vector<2x128xf32>
    %80 = arith.addf %79, %78 : vector<2x128xf32>
    %81 = arith.divf %79, %80 : vector<2x128xf32>
    %82 = math.tanh %74 : vector<2x128xf32>
    %83 = vector.extract_strided_slice %81 {offsets = [0, 0], sizes = [2, 32], strides = [1, 1]} : vector<2x128xf32> to vector<2x32xf32>
    %84 = vector.extract_strided_slice %81 {offsets = [0, 32], sizes = [2, 32], strides = [1, 1]} : vector<2x128xf32> to vector<2x32xf32>
    %85 = vector.extract_strided_slice %82 {offsets = [0, 64], sizes = [2, 32], strides = [1, 1]} : vector<2x128xf32> to vector<2x32xf32>
    %86 = vector.extract_strided_slice %81 {offsets = [0, 96], sizes = [2, 32], strides = [1, 1]} : vector<2x128xf32> to vector<2x32xf32>
    %87 = arith.negf %76 : vector<2x128xf32>
    %88 = math.exp %87 : vector<2x128xf32>
    %cst_30 = arith.constant 1.000000e+00 : f32
    %89 = vector.broadcast %cst_30 : f32 to vector<2x128xf32>
    %90 = arith.addf %89, %88 : vector<2x128xf32>
    %91 = arith.divf %89, %90 : vector<2x128xf32>
    %92 = math.tanh %76 : vector<2x128xf32>
    %93 = vector.extract_strided_slice %91 {offsets = [0, 0], sizes = [2, 32], strides = [1, 1]} : vector<2x128xf32> to vector<2x32xf32>
    %94 = vector.extract_strided_slice %91 {offsets = [0, 32], sizes = [2, 32], strides = [1, 1]} : vector<2x128xf32> to vector<2x32xf32>
    %95 = vector.extract_strided_slice %92 {offsets = [0, 64], sizes = [2, 32], strides = [1, 1]} : vector<2x128xf32> to vector<2x32xf32>
    %96 = vector.extract_strided_slice %91 {offsets = [0, 96], sizes = [2, 32], strides = [1, 1]} : vector<2x128xf32> to vector<2x32xf32>
    %97 = arith.mulf %84, %48 : vector<2x32xf32>
    %98 = arith.mulf %83, %85 : vector<2x32xf32>
    %99 = arith.addf %97, %98 : vector<2x32xf32>
    %100 = math.tanh %99 : vector<2x32xf32>
    %101 = arith.mulf %86, %100 : vector<2x32xf32>
    %102 = arith.mulf %94, %53 : vector<2x32xf32>
    %103 = arith.mulf %93, %95 : vector<2x32xf32>
    %104 = arith.addf %102, %103 : vector<2x32xf32>
    %105 = math.tanh %104 : vector<2x32xf32>
    %106 = arith.mulf %96, %105 : vector<2x32xf32>
    %107 = vector.shape_cast %101 : vector<2x32xf32> to vector<2x1x32xf32>
    %c0_31 = arith.constant 0 : index
    %108 = arith.index_cast %c1_i32 : i32 to index
    %c0_32 = arith.constant 0 : index
    %109 = vector.load %arg9[%c0_31, %108, %c0_32] : memref<2x8x32xf32, #tpu.memory_space<vmem>>, vector<2x1x32xf32>
    tpu.vector_store %arg9[%c0_31, %108, %c0_32], %107 {strides = array<i32>} : memref<2x8x32xf32, #tpu.memory_space<vmem>>, vector<2x1x32xf32>,
    %110 = vector.shape_cast %106 : vector<2x32xf32> to vector<2x1x32xf32>
    %c0_33 = arith.constant 0 : index
    %111 = arith.index_cast %62 : i32 to index
    %c0_34 = arith.constant 0 : index
    %112 = vector.load %arg10[%c0_33, %111, %c0_34] : memref<2x8x32xf32, #tpu.memory_space<vmem>>, vector<2x1x32xf32>
    tpu.vector_store %arg10[%c0_33, %111, %c0_34], %110 {strides = array<i32>} : memref<2x8x32xf32, #tpu.memory_space<vmem>>, vector<2x1x32xf32>,
    %c2_i32 = arith.constant 2 : i32
    %c7_i32_35 = arith.constant 7 : i32
    %113 = arith.subi %c7_i32_35, %c2_i32 : i32
    %c0_36 = arith.constant 0 : index
    %114 = arith.index_cast %c2_i32 : i32 to index
    %c0_37 = arith.constant 0 : index
    %115 = vector.load %arg8[%c0_36, %114, %c0_37] : memref<2x8x256xf32, #tpu.memory_space<vmem>>, vector<2x1x256xf32>
    %116 = vector.extract_strided_slice %115 {offsets = [0, 0, 0], sizes = [2, 1, 128], strides = [1, 1, 1]} : vector<2x1x256xf32> to vector<2x1x128xf32>
    %117 = vector.shape_cast %116 : vector<2x1x128xf32> to vector<2x128xf32>
    %c0_38 = arith.constant 0 : index
    %118 = arith.index_cast %113 : i32 to index
    %c0_39 = arith.constant 0 : index
    %119 = vector.load %arg8[%c0_38, %118, %c0_39] : memref<2x8x256xf32, #tpu.memory_space<vmem>>, vector<2x1x256xf32>
    %120 = vector.extract_strided_slice %119 {offsets = [0, 0, 128], sizes = [2, 1, 128], strides = [1, 1, 1]} : vector<2x1x256xf32> to vector<2x1x128xf32>
    %121 = vector.shape_cast %120 : vector<2x1x128xf32> to vector<2x128xf32>
    %122 = tpu.concatenate %101, %106 in 1 : vector<2x32xf32>, vector<2x32xf32> -> vector<2x64xf32>
    %cst_40 = arith.constant dense<0.000000e+00> : vector<2x256xf32>
    %123 = tpu.matmul %122, %9, %cst_40 {dimension_numbers = #tpu.dot_dimension_numbers<[1], [0], [0], [1], [0, 0, 1, 1], [], []>, precision = #tpu.contract_precision<fp32>} : vector<2x64xf32>, vector<64x256xf32>, vector<2x256xf32> -> vector<2x256xf32>
    %124 = vector.extract_strided_slice %123 {offsets = [0, 0], sizes = [2, 128], strides = [1, 1]} : vector<2x256xf32> to vector<2x128xf32>
    %125 = arith.addf %117, %124 : vector<2x128xf32>
    %126 = vector.extract_strided_slice %123 {offsets = [0, 128], sizes = [2, 128], strides = [1, 1]} : vector<2x256xf32> to vector<2x128xf32>
    %127 = arith.addf %121, %126 : vector<2x128xf32>
    %128 = arith.negf %125 : vector<2x128xf32>
    %129 = math.exp %128 : vector<2x128xf32>
    %cst_41 = arith.constant 1.000000e+00 : f32
    %130 = vector.broadcast %cst_41 : f32 to vector<2x128xf32>
    %131 = arith.addf %130, %129 : vector<2x128xf32>
    %132 = arith.divf %130, %131 : vector<2x128xf32>
    %133 = math.tanh %125 : vector<2x128xf32>
    %134 = vector.extract_strided_slice %132 {offsets = [0, 0], sizes = [2, 32], strides = [1, 1]} : vector<2x128xf32> to vector<2x32xf32>
    %135 = vector.extract_strided_slice %132 {offsets = [0, 32], sizes = [2, 32], strides = [1, 1]} : vector<2x128xf32> to vector<2x32xf32>
    %136 = vector.extract_strided_slice %133 {offsets = [0, 64], sizes = [2, 32], strides = [1, 1]} : vector<2x128xf32> to vector<2x32xf32>
    %137 = vector.extract_strided_slice %132 {offsets = [0, 96], sizes = [2, 32], strides = [1, 1]} : vector<2x128xf32> to vector<2x32xf32>
    %138 = arith.negf %127 : vector<2x128xf32>
    %139 = math.exp %138 : vector<2x128xf32>
    %cst_42 = arith.constant 1.000000e+00 : f32
    %140 = vector.broadcast %cst_42 : f32 to vector<2x128xf32>
    %141 = arith.addf %140, %139 : vector<2x128xf32>
    %142 = arith.divf %140, %141 : vector<2x128xf32>
    %143 = math.tanh %127 : vector<2x128xf32>
    %144 = vector.extract_strided_slice %142 {offsets = [0, 0], sizes = [2, 32], strides = [1, 1]} : vector<2x128xf32> to vector<2x32xf32>
    %145 = vector.extract_strided_slice %142 {offsets = [0, 32], sizes = [2, 32], strides = [1, 1]} : vector<2x128xf32> to vector<2x32xf32>
    %146 = vector.extract_strided_slice %143 {offsets = [0, 64], sizes = [2, 32], strides = [1, 1]} : vector<2x128xf32> to vector<2x32xf32>
    %147 = vector.extract_strided_slice %142 {offsets = [0, 96], sizes = [2, 32], strides = [1, 1]} : vector<2x128xf32> to vector<2x32xf32>
    %148 = arith.mulf %135, %99 : vector<2x32xf32>
    %149 = arith.mulf %134, %136 : vector<2x32xf32>
    %150 = arith.addf %148, %149 : vector<2x32xf32>
    %151 = math.tanh %150 : vector<2x32xf32>
    %152 = arith.mulf %137, %151 : vector<2x32xf32>
    %153 = arith.mulf %145, %104 : vector<2x32xf32>
    %154 = arith.mulf %144, %146 : vector<2x32xf32>
    %155 = arith.addf %153, %154 : vector<2x32xf32>
    %156 = math.tanh %155 : vector<2x32xf32>
    %157 = arith.mulf %147, %156 : vector<2x32xf32>
    %158 = vector.shape_cast %152 : vector<2x32xf32> to vector<2x1x32xf32>
    %c0_43 = arith.constant 0 : index
    %159 = arith.index_cast %c2_i32 : i32 to index
    %c0_44 = arith.constant 0 : index
    %160 = vector.load %arg9[%c0_43, %159, %c0_44] : memref<2x8x32xf32, #tpu.memory_space<vmem>>, vector<2x1x32xf32>
    tpu.vector_store %arg9[%c0_43, %159, %c0_44], %158 {strides = array<i32>} : memref<2x8x32xf32, #tpu.memory_space<vmem>>, vector<2x1x32xf32>,
    %161 = vector.shape_cast %157 : vector<2x32xf32> to vector<2x1x32xf32>
    %c0_45 = arith.constant 0 : index
    %162 = arith.index_cast %113 : i32 to index
    %c0_46 = arith.constant 0 : index
    %163 = vector.load %arg10[%c0_45, %162, %c0_46] : memref<2x8x32xf32, #tpu.memory_space<vmem>>, vector<2x1x32xf32>
    tpu.vector_store %arg10[%c0_45, %162, %c0_46], %161 {strides = array<i32>} : memref<2x8x32xf32, #tpu.memory_space<vmem>>, vector<2x1x32xf32>,
    %c3_i32 = arith.constant 3 : i32
    %c7_i32_47 = arith.constant 7 : i32
    %164 = arith.subi %c7_i32_47, %c3_i32 : i32
    %c0_48 = arith.constant 0 : index
    %165 = arith.index_cast %c3_i32 : i32 to index
    %c0_49 = arith.constant 0 : index
    %166 = vector.load %arg8[%c0_48, %165, %c0_49] : memref<2x8x256xf32, #tpu.memory_space<vmem>>, vector<2x1x256xf32>
    %167 = vector.extract_strided_slice %166 {offsets = [0, 0, 0], sizes = [2, 1, 128], strides = [1, 1, 1]} : vector<2x1x256xf32> to vector<2x1x128xf32>
    %168 = vector.shape_cast %167 : vector<2x1x128xf32> to vector<2x128xf32>
    %c0_50 = arith.constant 0 : index
    %169 = arith.index_cast %164 : i32 to index
    %c0_51 = arith.constant 0 : index
    %170 = vector.load %arg8[%c0_50, %169, %c0_51] : memref<2x8x256xf32, #tpu.memory_space<vmem>>, vector<2x1x256xf32>
    %171 = vector.extract_strided_slice %170 {offsets = [0, 0, 128], sizes = [2, 1, 128], strides = [1, 1, 1]} : vector<2x1x256xf32> to vector<2x1x128xf32>
    %172 = vector.shape_cast %171 : vector<2x1x128xf32> to vector<2x128xf32>
    %173 = tpu.concatenate %152, %157 in 1 : vector<2x32xf32>, vector<2x32xf32> -> vector<2x64xf32>
    %cst_52 = arith.constant dense<0.000000e+00> : vector<2x256xf32>
    %174 = tpu.matmul %173, %9, %cst_52 {dimension_numbers = #tpu.dot_dimension_numbers<[1], [0], [0], [1], [0, 0, 1, 1], [], []>, precision = #tpu.contract_precision<fp32>} : vector<2x64xf32>, vector<64x256xf32>, vector<2x256xf32> -> vector<2x256xf32>
    %175 = vector.extract_strided_slice %174 {offsets = [0, 0], sizes = [2, 128], strides = [1, 1]} : vector<2x256xf32> to vector<2x128xf32>
    %176 = arith.addf %168, %175 : vector<2x128xf32>
    %177 = vector.extract_strided_slice %174 {offsets = [0, 128], sizes = [2, 128], strides = [1, 1]} : vector<2x256xf32> to vector<2x128xf32>
    %178 = arith.addf %172, %177 : vector<2x128xf32>
    %179 = arith.negf %176 : vector<2x128xf32>
    %180 = math.exp %179 : vector<2x128xf32>
    %cst_53 = arith.constant 1.000000e+00 : f32
    %181 = vector.broadcast %cst_53 : f32 to vector<2x128xf32>
    %182 = arith.addf %181, %180 : vector<2x128xf32>
    %183 = arith.divf %181, %182 : vector<2x128xf32>
    %184 = math.tanh %176 : vector<2x128xf32>
    %185 = vector.extract_strided_slice %183 {offsets = [0, 0], sizes = [2, 32], strides = [1, 1]} : vector<2x128xf32> to vector<2x32xf32>
    %186 = vector.extract_strided_slice %183 {offsets = [0, 32], sizes = [2, 32], strides = [1, 1]} : vector<2x128xf32> to vector<2x32xf32>
    %187 = vector.extract_strided_slice %184 {offsets = [0, 64], sizes = [2, 32], strides = [1, 1]} : vector<2x128xf32> to vector<2x32xf32>
    %188 = vector.extract_strided_slice %183 {offsets = [0, 96], sizes = [2, 32], strides = [1, 1]} : vector<2x128xf32> to vector<2x32xf32>
    %189 = arith.negf %178 : vector<2x128xf32>
    %190 = math.exp %189 : vector<2x128xf32>
    %cst_54 = arith.constant 1.000000e+00 : f32
    %191 = vector.broadcast %cst_54 : f32 to vector<2x128xf32>
    %192 = arith.addf %191, %190 : vector<2x128xf32>
    %193 = arith.divf %191, %192 : vector<2x128xf32>
    %194 = math.tanh %178 : vector<2x128xf32>
    %195 = vector.extract_strided_slice %193 {offsets = [0, 0], sizes = [2, 32], strides = [1, 1]} : vector<2x128xf32> to vector<2x32xf32>
    %196 = vector.extract_strided_slice %193 {offsets = [0, 32], sizes = [2, 32], strides = [1, 1]} : vector<2x128xf32> to vector<2x32xf32>
    %197 = vector.extract_strided_slice %194 {offsets = [0, 64], sizes = [2, 32], strides = [1, 1]} : vector<2x128xf32> to vector<2x32xf32>
    %198 = vector.extract_strided_slice %193 {offsets = [0, 96], sizes = [2, 32], strides = [1, 1]} : vector<2x128xf32> to vector<2x32xf32>
    %199 = arith.mulf %186, %150 : vector<2x32xf32>
    %200 = arith.mulf %185, %187 : vector<2x32xf32>
    %201 = arith.addf %199, %200 : vector<2x32xf32>
    %202 = math.tanh %201 : vector<2x32xf32>
    %203 = arith.mulf %188, %202 : vector<2x32xf32>
    %204 = arith.mulf %196, %155 : vector<2x32xf32>
    %205 = arith.mulf %195, %197 : vector<2x32xf32>
    %206 = arith.addf %204, %205 : vector<2x32xf32>
    %207 = math.tanh %206 : vector<2x32xf32>
    %208 = arith.mulf %198, %207 : vector<2x32xf32>
    %209 = vector.shape_cast %203 : vector<2x32xf32> to vector<2x1x32xf32>
    %c0_55 = arith.constant 0 : index
    %210 = arith.index_cast %c3_i32 : i32 to index
    %c0_56 = arith.constant 0 : index
    %211 = vector.load %arg9[%c0_55, %210, %c0_56] : memref<2x8x32xf32, #tpu.memory_space<vmem>>, vector<2x1x32xf32>
    tpu.vector_store %arg9[%c0_55, %210, %c0_56], %209 {strides = array<i32>} : memref<2x8x32xf32, #tpu.memory_space<vmem>>, vector<2x1x32xf32>,
    %212 = vector.shape_cast %208 : vector<2x32xf32> to vector<2x1x32xf32>
    %c0_57 = arith.constant 0 : index
    %213 = arith.index_cast %164 : i32 to index
    %c0_58 = arith.constant 0 : index
    %214 = vector.load %arg10[%c0_57, %213, %c0_58] : memref<2x8x32xf32, #tpu.memory_space<vmem>>, vector<2x1x32xf32>
    tpu.vector_store %arg10[%c0_57, %213, %c0_58], %212 {strides = array<i32>} : memref<2x8x32xf32, #tpu.memory_space<vmem>>, vector<2x1x32xf32>,
    %c4_i32 = arith.constant 4 : i32
    %c7_i32_59 = arith.constant 7 : i32
    %215 = arith.subi %c7_i32_59, %c4_i32 : i32
    %c0_60 = arith.constant 0 : index
    %216 = arith.index_cast %c4_i32 : i32 to index
    %c0_61 = arith.constant 0 : index
    %217 = vector.load %arg8[%c0_60, %216, %c0_61] : memref<2x8x256xf32, #tpu.memory_space<vmem>>, vector<2x1x256xf32>
    %218 = vector.extract_strided_slice %217 {offsets = [0, 0, 0], sizes = [2, 1, 128], strides = [1, 1, 1]} : vector<2x1x256xf32> to vector<2x1x128xf32>
    %219 = vector.shape_cast %218 : vector<2x1x128xf32> to vector<2x128xf32>
    %c0_62 = arith.constant 0 : index
    %220 = arith.index_cast %215 : i32 to index
    %c0_63 = arith.constant 0 : index
    %221 = vector.load %arg8[%c0_62, %220, %c0_63] : memref<2x8x256xf32, #tpu.memory_space<vmem>>, vector<2x1x256xf32>
    %222 = vector.extract_strided_slice %221 {offsets = [0, 0, 128], sizes = [2, 1, 128], strides = [1, 1, 1]} : vector<2x1x256xf32> to vector<2x1x128xf32>
    %223 = vector.shape_cast %222 : vector<2x1x128xf32> to vector<2x128xf32>
    %224 = tpu.concatenate %203, %208 in 1 : vector<2x32xf32>, vector<2x32xf32> -> vector<2x64xf32>
    %cst_64 = arith.constant dense<0.000000e+00> : vector<2x256xf32>
    %225 = tpu.matmul %224, %9, %cst_64 {dimension_numbers = #tpu.dot_dimension_numbers<[1], [0], [0], [1], [0, 0, 1, 1], [], []>, precision = #tpu.contract_precision<fp32>} : vector<2x64xf32>, vector<64x256xf32>, vector<2x256xf32> -> vector<2x256xf32>
    %226 = vector.extract_strided_slice %225 {offsets = [0, 0], sizes = [2, 128], strides = [1, 1]} : vector<2x256xf32> to vector<2x128xf32>
    %227 = arith.addf %219, %226 : vector<2x128xf32>
    %228 = vector.extract_strided_slice %225 {offsets = [0, 128], sizes = [2, 128], strides = [1, 1]} : vector<2x256xf32> to vector<2x128xf32>
    %229 = arith.addf %223, %228 : vector<2x128xf32>
    %230 = arith.negf %227 : vector<2x128xf32>
    %231 = math.exp %230 : vector<2x128xf32>
    %cst_65 = arith.constant 1.000000e+00 : f32
    %232 = vector.broadcast %cst_65 : f32 to vector<2x128xf32>
    %233 = arith.addf %232, %231 : vector<2x128xf32>
    %234 = arith.divf %232, %233 : vector<2x128xf32>
    %235 = math.tanh %227 : vector<2x128xf32>
    %236 = vector.extract_strided_slice %234 {offsets = [0, 0], sizes = [2, 32], strides = [1, 1]} : vector<2x128xf32> to vector<2x32xf32>
    %237 = vector.extract_strided_slice %234 {offsets = [0, 32], sizes = [2, 32], strides = [1, 1]} : vector<2x128xf32> to vector<2x32xf32>
    %238 = vector.extract_strided_slice %235 {offsets = [0, 64], sizes = [2, 32], strides = [1, 1]} : vector<2x128xf32> to vector<2x32xf32>
    %239 = vector.extract_strided_slice %234 {offsets = [0, 96], sizes = [2, 32], strides = [1, 1]} : vector<2x128xf32> to vector<2x32xf32>
    %240 = arith.negf %229 : vector<2x128xf32>
    %241 = math.exp %240 : vector<2x128xf32>
    %cst_66 = arith.constant 1.000000e+00 : f32
    %242 = vector.broadcast %cst_66 : f32 to vector<2x128xf32>
    %243 = arith.addf %242, %241 : vector<2x128xf32>
    %244 = arith.divf %242, %243 : vector<2x128xf32>
    %245 = math.tanh %229 : vector<2x128xf32>
    %246 = vector.extract_strided_slice %244 {offsets = [0, 0], sizes = [2, 32], strides = [1, 1]} : vector<2x128xf32> to vector<2x32xf32>
    %247 = vector.extract_strided_slice %244 {offsets = [0, 32], sizes = [2, 32], strides = [1, 1]} : vector<2x128xf32> to vector<2x32xf32>
    %248 = vector.extract_strided_slice %245 {offsets = [0, 64], sizes = [2, 32], strides = [1, 1]} : vector<2x128xf32> to vector<2x32xf32>
    %249 = vector.extract_strided_slice %244 {offsets = [0, 96], sizes = [2, 32], strides = [1, 1]} : vector<2x128xf32> to vector<2x32xf32>
    %250 = arith.mulf %237, %201 : vector<2x32xf32>
    %251 = arith.mulf %236, %238 : vector<2x32xf32>
    %252 = arith.addf %250, %251 : vector<2x32xf32>
    %253 = math.tanh %252 : vector<2x32xf32>
    %254 = arith.mulf %239, %253 : vector<2x32xf32>
    %255 = arith.mulf %247, %206 : vector<2x32xf32>
    %256 = arith.mulf %246, %248 : vector<2x32xf32>
    %257 = arith.addf %255, %256 : vector<2x32xf32>
    %258 = math.tanh %257 : vector<2x32xf32>
    %259 = arith.mulf %249, %258 : vector<2x32xf32>
    %260 = vector.shape_cast %254 : vector<2x32xf32> to vector<2x1x32xf32>
    %c0_67 = arith.constant 0 : index
    %261 = arith.index_cast %c4_i32 : i32 to index
    %c0_68 = arith.constant 0 : index
    %262 = vector.load %arg9[%c0_67, %261, %c0_68] : memref<2x8x32xf32, #tpu.memory_space<vmem>>, vector<2x1x32xf32>
    tpu.vector_store %arg9[%c0_67, %261, %c0_68], %260 {strides = array<i32>} : memref<2x8x32xf32, #tpu.memory_space<vmem>>, vector<2x1x32xf32>,
    %263 = vector.shape_cast %259 : vector<2x32xf32> to vector<2x1x32xf32>
    %c0_69 = arith.constant 0 : index
    %264 = arith.index_cast %215 : i32 to index
    %c0_70 = arith.constant 0 : index
    %265 = vector.load %arg10[%c0_69, %264, %c0_70] : memref<2x8x32xf32, #tpu.memory_space<vmem>>, vector<2x1x32xf32>
    tpu.vector_store %arg10[%c0_69, %264, %c0_70], %263 {strides = array<i32>} : memref<2x8x32xf32, #tpu.memory_space<vmem>>, vector<2x1x32xf32>,
    %c5_i32 = arith.constant 5 : i32
    %c7_i32_71 = arith.constant 7 : i32
    %266 = arith.subi %c7_i32_71, %c5_i32 : i32
    %c0_72 = arith.constant 0 : index
    %267 = arith.index_cast %c5_i32 : i32 to index
    %c0_73 = arith.constant 0 : index
    %268 = vector.load %arg8[%c0_72, %267, %c0_73] : memref<2x8x256xf32, #tpu.memory_space<vmem>>, vector<2x1x256xf32>
    %269 = vector.extract_strided_slice %268 {offsets = [0, 0, 0], sizes = [2, 1, 128], strides = [1, 1, 1]} : vector<2x1x256xf32> to vector<2x1x128xf32>
    %270 = vector.shape_cast %269 : vector<2x1x128xf32> to vector<2x128xf32>
    %c0_74 = arith.constant 0 : index
    %271 = arith.index_cast %266 : i32 to index
    %c0_75 = arith.constant 0 : index
    %272 = vector.load %arg8[%c0_74, %271, %c0_75] : memref<2x8x256xf32, #tpu.memory_space<vmem>>, vector<2x1x256xf32>
    %273 = vector.extract_strided_slice %272 {offsets = [0, 0, 128], sizes = [2, 1, 128], strides = [1, 1, 1]} : vector<2x1x256xf32> to vector<2x1x128xf32>
    %274 = vector.shape_cast %273 : vector<2x1x128xf32> to vector<2x128xf32>
    %275 = tpu.concatenate %254, %259 in 1 : vector<2x32xf32>, vector<2x32xf32> -> vector<2x64xf32>
    %cst_76 = arith.constant dense<0.000000e+00> : vector<2x256xf32>
    %276 = tpu.matmul %275, %9, %cst_76 {dimension_numbers = #tpu.dot_dimension_numbers<[1], [0], [0], [1], [0, 0, 1, 1], [], []>, precision = #tpu.contract_precision<fp32>} : vector<2x64xf32>, vector<64x256xf32>, vector<2x256xf32> -> vector<2x256xf32>
    %277 = vector.extract_strided_slice %276 {offsets = [0, 0], sizes = [2, 128], strides = [1, 1]} : vector<2x256xf32> to vector<2x128xf32>
    %278 = arith.addf %270, %277 : vector<2x128xf32>
    %279 = vector.extract_strided_slice %276 {offsets = [0, 128], sizes = [2, 128], strides = [1, 1]} : vector<2x256xf32> to vector<2x128xf32>
    %280 = arith.addf %274, %279 : vector<2x128xf32>
    %281 = arith.negf %278 : vector<2x128xf32>
    %282 = math.exp %281 : vector<2x128xf32>
    %cst_77 = arith.constant 1.000000e+00 : f32
    %283 = vector.broadcast %cst_77 : f32 to vector<2x128xf32>
    %284 = arith.addf %283, %282 : vector<2x128xf32>
    %285 = arith.divf %283, %284 : vector<2x128xf32>
    %286 = math.tanh %278 : vector<2x128xf32>
    %287 = vector.extract_strided_slice %285 {offsets = [0, 0], sizes = [2, 32], strides = [1, 1]} : vector<2x128xf32> to vector<2x32xf32>
    %288 = vector.extract_strided_slice %285 {offsets = [0, 32], sizes = [2, 32], strides = [1, 1]} : vector<2x128xf32> to vector<2x32xf32>
    %289 = vector.extract_strided_slice %286 {offsets = [0, 64], sizes = [2, 32], strides = [1, 1]} : vector<2x128xf32> to vector<2x32xf32>
    %290 = vector.extract_strided_slice %285 {offsets = [0, 96], sizes = [2, 32], strides = [1, 1]} : vector<2x128xf32> to vector<2x32xf32>
    %291 = arith.negf %280 : vector<2x128xf32>
    %292 = math.exp %291 : vector<2x128xf32>
    %cst_78 = arith.constant 1.000000e+00 : f32
    %293 = vector.broadcast %cst_78 : f32 to vector<2x128xf32>
    %294 = arith.addf %293, %292 : vector<2x128xf32>
    %295 = arith.divf %293, %294 : vector<2x128xf32>
    %296 = math.tanh %280 : vector<2x128xf32>
    %297 = vector.extract_strided_slice %295 {offsets = [0, 0], sizes = [2, 32], strides = [1, 1]} : vector<2x128xf32> to vector<2x32xf32>
    %298 = vector.extract_strided_slice %295 {offsets = [0, 32], sizes = [2, 32], strides = [1, 1]} : vector<2x128xf32> to vector<2x32xf32>
    %299 = vector.extract_strided_slice %296 {offsets = [0, 64], sizes = [2, 32], strides = [1, 1]} : vector<2x128xf32> to vector<2x32xf32>
    %300 = vector.extract_strided_slice %295 {offsets = [0, 96], sizes = [2, 32], strides = [1, 1]} : vector<2x128xf32> to vector<2x32xf32>
    %301 = arith.mulf %288, %252 : vector<2x32xf32>
    %302 = arith.mulf %287, %289 : vector<2x32xf32>
    %303 = arith.addf %301, %302 : vector<2x32xf32>
    %304 = math.tanh %303 : vector<2x32xf32>
    %305 = arith.mulf %290, %304 : vector<2x32xf32>
    %306 = arith.mulf %298, %257 : vector<2x32xf32>
    %307 = arith.mulf %297, %299 : vector<2x32xf32>
    %308 = arith.addf %306, %307 : vector<2x32xf32>
    %309 = math.tanh %308 : vector<2x32xf32>
    %310 = arith.mulf %300, %309 : vector<2x32xf32>
    %311 = vector.shape_cast %305 : vector<2x32xf32> to vector<2x1x32xf32>
    %c0_79 = arith.constant 0 : index
    %312 = arith.index_cast %c5_i32 : i32 to index
    %c0_80 = arith.constant 0 : index
    %313 = vector.load %arg9[%c0_79, %312, %c0_80] : memref<2x8x32xf32, #tpu.memory_space<vmem>>, vector<2x1x32xf32>
    tpu.vector_store %arg9[%c0_79, %312, %c0_80], %311 {strides = array<i32>} : memref<2x8x32xf32, #tpu.memory_space<vmem>>, vector<2x1x32xf32>,
    %314 = vector.shape_cast %310 : vector<2x32xf32> to vector<2x1x32xf32>
    %c0_81 = arith.constant 0 : index
    %315 = arith.index_cast %266 : i32 to index
    %c0_82 = arith.constant 0 : index
    %316 = vector.load %arg10[%c0_81, %315, %c0_82] : memref<2x8x32xf32, #tpu.memory_space<vmem>>, vector<2x1x32xf32>
    tpu.vector_store %arg10[%c0_81, %315, %c0_82], %314 {strides = array<i32>} : memref<2x8x32xf32, #tpu.memory_space<vmem>>, vector<2x1x32xf32>,
    %c6_i32 = arith.constant 6 : i32
    %c7_i32_83 = arith.constant 7 : i32
    %317 = arith.subi %c7_i32_83, %c6_i32 : i32
    %c0_84 = arith.constant 0 : index
    %318 = arith.index_cast %c6_i32 : i32 to index
    %c0_85 = arith.constant 0 : index
    %319 = vector.load %arg8[%c0_84, %318, %c0_85] : memref<2x8x256xf32, #tpu.memory_space<vmem>>, vector<2x1x256xf32>
    %320 = vector.extract_strided_slice %319 {offsets = [0, 0, 0], sizes = [2, 1, 128], strides = [1, 1, 1]} : vector<2x1x256xf32> to vector<2x1x128xf32>
    %321 = vector.shape_cast %320 : vector<2x1x128xf32> to vector<2x128xf32>
    %c0_86 = arith.constant 0 : index
    %322 = arith.index_cast %317 : i32 to index
    %c0_87 = arith.constant 0 : index
    %323 = vector.load %arg8[%c0_86, %322, %c0_87] : memref<2x8x256xf32, #tpu.memory_space<vmem>>, vector<2x1x256xf32>
    %324 = vector.extract_strided_slice %323 {offsets = [0, 0, 128], sizes = [2, 1, 128], strides = [1, 1, 1]} : vector<2x1x256xf32> to vector<2x1x128xf32>
    %325 = vector.shape_cast %324 : vector<2x1x128xf32> to vector<2x128xf32>
    %326 = tpu.concatenate %305, %310 in 1 : vector<2x32xf32>, vector<2x32xf32> -> vector<2x64xf32>
    %cst_88 = arith.constant dense<0.000000e+00> : vector<2x256xf32>
    %327 = tpu.matmul %326, %9, %cst_88 {dimension_numbers = #tpu.dot_dimension_numbers<[1], [0], [0], [1], [0, 0, 1, 1], [], []>, precision = #tpu.contract_precision<fp32>} : vector<2x64xf32>, vector<64x256xf32>, vector<2x256xf32> -> vector<2x256xf32>
    %328 = vector.extract_strided_slice %327 {offsets = [0, 0], sizes = [2, 128], strides = [1, 1]} : vector<2x256xf32> to vector<2x128xf32>
    %329 = arith.addf %321, %328 : vector<2x128xf32>
    %330 = vector.extract_strided_slice %327 {offsets = [0, 128], sizes = [2, 128], strides = [1, 1]} : vector<2x256xf32> to vector<2x128xf32>
    %331 = arith.addf %325, %330 : vector<2x128xf32>
    %332 = arith.negf %329 : vector<2x128xf32>
    %333 = math.exp %332 : vector<2x128xf32>
    %cst_89 = arith.constant 1.000000e+00 : f32
    %334 = vector.broadcast %cst_89 : f32 to vector<2x128xf32>
    %335 = arith.addf %334, %333 : vector<2x128xf32>
    %336 = arith.divf %334, %335 : vector<2x128xf32>
    %337 = math.tanh %329 : vector<2x128xf32>
    %338 = vector.extract_strided_slice %336 {offsets = [0, 0], sizes = [2, 32], strides = [1, 1]} : vector<2x128xf32> to vector<2x32xf32>
    %339 = vector.extract_strided_slice %336 {offsets = [0, 32], sizes = [2, 32], strides = [1, 1]} : vector<2x128xf32> to vector<2x32xf32>
    %340 = vector.extract_strided_slice %337 {offsets = [0, 64], sizes = [2, 32], strides = [1, 1]} : vector<2x128xf32> to vector<2x32xf32>
    %341 = vector.extract_strided_slice %336 {offsets = [0, 96], sizes = [2, 32], strides = [1, 1]} : vector<2x128xf32> to vector<2x32xf32>
    %342 = arith.negf %331 : vector<2x128xf32>
    %343 = math.exp %342 : vector<2x128xf32>
    %cst_90 = arith.constant 1.000000e+00 : f32
    %344 = vector.broadcast %cst_90 : f32 to vector<2x128xf32>
    %345 = arith.addf %344, %343 : vector<2x128xf32>
    %346 = arith.divf %344, %345 : vector<2x128xf32>
    %347 = math.tanh %331 : vector<2x128xf32>
    %348 = vector.extract_strided_slice %346 {offsets = [0, 0], sizes = [2, 32], strides = [1, 1]} : vector<2x128xf32> to vector<2x32xf32>
    %349 = vector.extract_strided_slice %346 {offsets = [0, 32], sizes = [2, 32], strides = [1, 1]} : vector<2x128xf32> to vector<2x32xf32>
    %350 = vector.extract_strided_slice %347 {offsets = [0, 64], sizes = [2, 32], strides = [1, 1]} : vector<2x128xf32> to vector<2x32xf32>
    %351 = vector.extract_strided_slice %346 {offsets = [0, 96], sizes = [2, 32], strides = [1, 1]} : vector<2x128xf32> to vector<2x32xf32>
    %352 = arith.mulf %339, %303 : vector<2x32xf32>
    %353 = arith.mulf %338, %340 : vector<2x32xf32>
    %354 = arith.addf %352, %353 : vector<2x32xf32>
    %355 = math.tanh %354 : vector<2x32xf32>
    %356 = arith.mulf %341, %355 : vector<2x32xf32>
    %357 = arith.mulf %349, %308 : vector<2x32xf32>
    %358 = arith.mulf %348, %350 : vector<2x32xf32>
    %359 = arith.addf %357, %358 : vector<2x32xf32>
    %360 = math.tanh %359 : vector<2x32xf32>
    %361 = arith.mulf %351, %360 : vector<2x32xf32>
    %362 = vector.shape_cast %356 : vector<2x32xf32> to vector<2x1x32xf32>
    %c0_91 = arith.constant 0 : index
    %363 = arith.index_cast %c6_i32 : i32 to index
    %c0_92 = arith.constant 0 : index
    %364 = vector.load %arg9[%c0_91, %363, %c0_92] : memref<2x8x32xf32, #tpu.memory_space<vmem>>, vector<2x1x32xf32>
    tpu.vector_store %arg9[%c0_91, %363, %c0_92], %362 {strides = array<i32>} : memref<2x8x32xf32, #tpu.memory_space<vmem>>, vector<2x1x32xf32>,
    %365 = vector.shape_cast %361 : vector<2x32xf32> to vector<2x1x32xf32>
    %c0_93 = arith.constant 0 : index
    %366 = arith.index_cast %317 : i32 to index
    %c0_94 = arith.constant 0 : index
    %367 = vector.load %arg10[%c0_93, %366, %c0_94] : memref<2x8x32xf32, #tpu.memory_space<vmem>>, vector<2x1x32xf32>
    tpu.vector_store %arg10[%c0_93, %366, %c0_94], %365 {strides = array<i32>} : memref<2x8x32xf32, #tpu.memory_space<vmem>>, vector<2x1x32xf32>,
    %c7_i32_95 = arith.constant 7 : i32
    %c7_i32_96 = arith.constant 7 : i32
    %368 = arith.subi %c7_i32_96, %c7_i32_95 : i32
    %c0_97 = arith.constant 0 : index
    %369 = arith.index_cast %c7_i32_95 : i32 to index
    %c0_98 = arith.constant 0 : index
    %370 = vector.load %arg8[%c0_97, %369, %c0_98] : memref<2x8x256xf32, #tpu.memory_space<vmem>>, vector<2x1x256xf32>
    %371 = vector.extract_strided_slice %370 {offsets = [0, 0, 0], sizes = [2, 1, 128], strides = [1, 1, 1]} : vector<2x1x256xf32> to vector<2x1x128xf32>
    %372 = vector.shape_cast %371 : vector<2x1x128xf32> to vector<2x128xf32>
    %c0_99 = arith.constant 0 : index
    %373 = arith.index_cast %368 : i32 to index
    %c0_100 = arith.constant 0 : index
    %374 = vector.load %arg8[%c0_99, %373, %c0_100] : memref<2x8x256xf32, #tpu.memory_space<vmem>>, vector<2x1x256xf32>
    %375 = vector.extract_strided_slice %374 {offsets = [0, 0, 128], sizes = [2, 1, 128], strides = [1, 1, 1]} : vector<2x1x256xf32> to vector<2x1x128xf32>
    %376 = vector.shape_cast %375 : vector<2x1x128xf32> to vector<2x128xf32>
    %377 = tpu.concatenate %356, %361 in 1 : vector<2x32xf32>, vector<2x32xf32> -> vector<2x64xf32>
    %cst_101 = arith.constant dense<0.000000e+00> : vector<2x256xf32>
    %378 = tpu.matmul %377, %9, %cst_101 {dimension_numbers = #tpu.dot_dimension_numbers<[1], [0], [0], [1], [0, 0, 1, 1], [], []>, precision = #tpu.contract_precision<fp32>} : vector<2x64xf32>, vector<64x256xf32>, vector<2x256xf32> -> vector<2x256xf32>
    %379 = vector.extract_strided_slice %378 {offsets = [0, 0], sizes = [2, 128], strides = [1, 1]} : vector<2x256xf32> to vector<2x128xf32>
    %380 = arith.addf %372, %379 : vector<2x128xf32>
    %381 = vector.extract_strided_slice %378 {offsets = [0, 128], sizes = [2, 128], strides = [1, 1]} : vector<2x256xf32> to vector<2x128xf32>
    %382 = arith.addf %376, %381 : vector<2x128xf32>
    %383 = arith.negf %380 : vector<2x128xf32>
    %384 = math.exp %383 : vector<2x128xf32>
    %cst_102 = arith.constant 1.000000e+00 : f32
    %385 = vector.broadcast %cst_102 : f32 to vector<2x128xf32>
    %386 = arith.addf %385, %384 : vector<2x128xf32>
    %387 = arith.divf %385, %386 : vector<2x128xf32>
    %388 = math.tanh %380 : vector<2x128xf32>
    %389 = vector.extract_strided_slice %387 {offsets = [0, 0], sizes = [2, 32], strides = [1, 1]} : vector<2x128xf32> to vector<2x32xf32>
    %390 = vector.extract_strided_slice %387 {offsets = [0, 32], sizes = [2, 32], strides = [1, 1]} : vector<2x128xf32> to vector<2x32xf32>
    %391 = vector.extract_strided_slice %388 {offsets = [0, 64], sizes = [2, 32], strides = [1, 1]} : vector<2x128xf32> to vector<2x32xf32>
    %392 = vector.extract_strided_slice %387 {offsets = [0, 96], sizes = [2, 32], strides = [1, 1]} : vector<2x128xf32> to vector<2x32xf32>
    %393 = arith.negf %382 : vector<2x128xf32>
    %394 = math.exp %393 : vector<2x128xf32>
    %cst_103 = arith.constant 1.000000e+00 : f32
    %395 = vector.broadcast %cst_103 : f32 to vector<2x128xf32>
    %396 = arith.addf %395, %394 : vector<2x128xf32>
    %397 = arith.divf %395, %396 : vector<2x128xf32>
    %398 = math.tanh %382 : vector<2x128xf32>
    %399 = vector.extract_strided_slice %397 {offsets = [0, 0], sizes = [2, 32], strides = [1, 1]} : vector<2x128xf32> to vector<2x32xf32>
    %400 = vector.extract_strided_slice %397 {offsets = [0, 32], sizes = [2, 32], strides = [1, 1]} : vector<2x128xf32> to vector<2x32xf32>
    %401 = vector.extract_strided_slice %398 {offsets = [0, 64], sizes = [2, 32], strides = [1, 1]} : vector<2x128xf32> to vector<2x32xf32>
    %402 = vector.extract_strided_slice %397 {offsets = [0, 96], sizes = [2, 32], strides = [1, 1]} : vector<2x128xf32> to vector<2x32xf32>
    %403 = arith.mulf %390, %354 : vector<2x32xf32>
    %404 = arith.mulf %389, %391 : vector<2x32xf32>
    %405 = arith.addf %403, %404 : vector<2x32xf32>
    %406 = math.tanh %405 : vector<2x32xf32>
    %407 = arith.mulf %392, %406 : vector<2x32xf32>
    %408 = arith.mulf %400, %359 : vector<2x32xf32>
    %409 = arith.mulf %399, %401 : vector<2x32xf32>
    %410 = arith.addf %408, %409 : vector<2x32xf32>
    %411 = math.tanh %410 : vector<2x32xf32>
    %412 = arith.mulf %402, %411 : vector<2x32xf32>
    %413 = vector.shape_cast %407 : vector<2x32xf32> to vector<2x1x32xf32>
    %c0_104 = arith.constant 0 : index
    %414 = arith.index_cast %c7_i32_95 : i32 to index
    %c0_105 = arith.constant 0 : index
    %415 = vector.load %arg9[%c0_104, %414, %c0_105] : memref<2x8x32xf32, #tpu.memory_space<vmem>>, vector<2x1x32xf32>
    tpu.vector_store %arg9[%c0_104, %414, %c0_105], %413 {strides = array<i32>} : memref<2x8x32xf32, #tpu.memory_space<vmem>>, vector<2x1x32xf32>,
    %416 = vector.shape_cast %412 : vector<2x32xf32> to vector<2x1x32xf32>
    %c0_106 = arith.constant 0 : index
    %417 = arith.index_cast %368 : i32 to index
    %c0_107 = arith.constant 0 : index
    %418 = vector.load %arg10[%c0_106, %417, %c0_107] : memref<2x8x32xf32, #tpu.memory_space<vmem>>, vector<2x1x32xf32>
    tpu.vector_store %arg10[%c0_106, %417, %c0_107], %416 {strides = array<i32>} : memref<2x8x32xf32, #tpu.memory_space<vmem>>, vector<2x1x32xf32>,
    %c8_i32 = arith.constant 8 : i32
    %c0_108 = arith.constant 0 : index
    %c0_109 = arith.constant 0 : index
    %c0_110 = arith.constant 0 : index
    %419 = vector.load %arg9[%c0_108, %c0_109, %c0_110] : memref<2x8x32xf32, #tpu.memory_space<vmem>>, vector<2x8x32xf32>
    %420 = vector.shape_cast %419 : vector<2x8x32xf32> to vector<16x32xf32>
    %c0_111 = arith.constant 0 : index
    %c0_112 = arith.constant 0 : index
    %c0_113 = arith.constant 0 : index
    %421 = vector.load %arg10[%c0_111, %c0_112, %c0_113] : memref<2x8x32xf32, #tpu.memory_space<vmem>>, vector<2x8x32xf32>
    %422 = vector.shape_cast %421 : vector<2x8x32xf32> to vector<16x32xf32>
    %c0_114 = arith.constant 0 : index
    %c0_115 = arith.constant 0 : index
    %423 = vector.load %arg5[%c0_114, %c0_115] : memref<64x16xf32, #tpu.memory_space<vmem>>, vector<64x16xf32>
    %424 = vector.extract_strided_slice %423 {offsets = [0, 0], sizes = [32, 16], strides = [1, 1]} : vector<64x16xf32> to vector<32x16xf32>
    %cst_116 = arith.constant dense<0.000000e+00> : vector<16x16xf32>
    %425 = tpu.matmul %420, %424, %cst_116 {dimension_numbers = #tpu.dot_dimension_numbers<[1], [0], [0], [1], [0, 0, 1, 1], [], []>, precision = #tpu.contract_precision<fp32>} : vector<16x32xf32>, vector<32x16xf32>, vector<16x16xf32> -> vector<16x16xf32>
    %426 = vector.extract_strided_slice %423 {offsets = [32, 0], sizes = [32, 16], strides = [1, 1]} : vector<64x16xf32> to vector<32x16xf32>
    %cst_117 = arith.constant dense<0.000000e+00> : vector<16x16xf32>
    %427 = tpu.matmul %422, %426, %cst_117 {dimension_numbers = #tpu.dot_dimension_numbers<[1], [0], [0], [1], [0, 0, 1, 1], [], []>, precision = #tpu.contract_precision<fp32>} : vector<16x32xf32>, vector<32x16xf32>, vector<16x16xf32> -> vector<16x16xf32>
    %428 = arith.addf %425, %427 : vector<16x16xf32>
    %c0_118 = arith.constant 0 : index
    %c0_119 = arith.constant 0 : index
    %429 = vector.load %arg6[%c0_118, %c0_119] : memref<1x16xf32, #tpu.memory_space<vmem>>, vector<1x16xf32>
    %430 = vector.broadcast %429 : vector<1x16xf32> to vector<16x16xf32>
    %431 = arith.addf %428, %430 : vector<16x16xf32>
    %432 = vector.shape_cast %431 : vector<16x16xf32> to vector<2x8x16xf32>
    %433 = arith.addf %432, %0 : vector<2x8x16xf32>
    %c0_120 = arith.constant 0 : index
    %c0_121 = arith.constant 0 : index
    %c0_122 = arith.constant 0 : index
    %434 = vector.load %arg7[%c0_120, %c0_121, %c0_122] : memref<2x8x16xf32, #tpu.memory_space<vmem>>, vector<2x8x16xf32>
    tpu.vector_store %arg7[%c0_120, %c0_121, %c0_122], %433 {strides = array<i32>} : memref<2x8x16xf32, #tpu.memory_space<vmem>>, vector<2x8x16xf32>,
    return
  }
  func.func @transform_0(%arg0: i32) -> (i32, i32, i32) {
    %c0_i32 = arith.constant 0 : i32
    %c0_i32_0 = arith.constant 0 : i32
    %c0_i32_1 = arith.constant 0 : i32
    return %arg0, %c0_i32, %c0_i32_0 : i32, i32, i32
  }
  func.func @transform_1(%arg0: i32) -> (i32, i32) {
    %c0_i32 = arith.constant 0 : i32
    %c0_i32_0 = arith.constant 0 : i32
    %c0_i32_1 = arith.constant 0 : i32
    return %c0_i32, %c0_i32_0 : i32, i32
  }
  func.func @transform_2(%arg0: i32) -> (i32, i32) {
    %c0_i32 = arith.constant 0 : i32
    %c0_i32_0 = arith.constant 0 : i32
    %c0_i32_1 = arith.constant 0 : i32
    return %c0_i32, %c0_i32_0 : i32, i32
  }
  func.func @transform_3(%arg0: i32) -> (i32, i32) {
    %c0_i32 = arith.constant 0 : i32
    %c0_i32_0 = arith.constant 0 : i32
    %c0_i32_1 = arith.constant 0 : i32
    return %c0_i32, %c0_i32_0 : i32, i32
  }
  func.func @transform_4(%arg0: i32) -> (i32, i32) {
    %c0_i32 = arith.constant 0 : i32
    %c0_i32_0 = arith.constant 0 : i32
    %c0_i32_1 = arith.constant 0 : i32
    return %c0_i32, %c0_i32_0 : i32, i32
  }
  func.func @transform_5(%arg0: i32) -> (i32, i32) {
    %c0_i32 = arith.constant 0 : i32
    %c0_i32_0 = arith.constant 0 : i32
    %c0_i32_1 = arith.constant 0 : i32
    return %c0_i32, %c0_i32_0 : i32, i32
  }
  func.func @transform_6(%arg0: i32) -> (i32, i32, i32) {
    %c0_i32 = arith.constant 0 : i32
    %c0_i32_0 = arith.constant 0 : i32
    %c0_i32_1 = arith.constant 0 : i32
    return %arg0, %c0_i32, %c0_i32_0 : i32, i32, i32
  }
}

</mosaic_0001>

<bundles_post_ra>
// kernel: tpu_custom_call.1
= control target key start
LH: loop header
LB: loop body
LE: loop exit
PB: predicated region body
PF: predicated region fallthrough
CT: control target
= control target key end

     0   :  { %11 = vsyncpa [#allocation6], 0  ;;  %s11338_s0 = inlined_call_operand.vmem [shape: f32[2,8,16], index: 0, kind: input, shape index: {}]   ;;  %s11339_s1 = inlined_call_operand.vmem [shape: f32[16,256], index: 1, kind: input, shape index: {}]   ;;  %s11340_s2 = inlined_call_operand.vmem [shape: f32[1,256], index: 2, kind: input, shape index: {}]   ;;  %s11341_s3 = inlined_call_operand.hbm [shape: f32[64,256], index: 3, kind: input, shape index: {}]   ;;  %s11342_s4 = inlined_call_operand.vmem [shape: f32[64,16], index: 4, kind: input, shape index: {}]   ;;  %s11343_s5 = inlined_call_operand.vmem [shape: f32[1,16], index: 5, kind: input, shape index: {}]   ;;  %s11344_s6 = inlined_call_operand.hbm [shape: f32[2,8,16], index: 6, kind: output, shape index: {}]  }
   0x1   :  { %12 = vsyncpa [#allocation7], 0  ;;  %s9327_s21 = smov [#allocation5]  }
   0x2   :  { %s24_s22 = sshll.u32 %s9327_s21, 4  ;;  %s25_s22 = int_to_ptr.vmem [resolvable:$true] %s24_s22 }
   0x3   :  { %s9291_s23 = scalar_lea.vmem %s25_s22, 2048  ;;  %p9296_p1 = scmp.lt.s32.totalorder %s25_s22, %s25_s22 }
   0x4   :  { %p9292_p0 = scmp.ne.s32.totalorder %s25_s22, %s9291_s23  ;;  %p9297_p2 = scmp.lt.s32.totalorder %s9291_s23, %s9291_s23 }
   0x6   :  { %p9298_p3 = por %p9297_p2, %p9296_p1 }
   0x8   :  { %p9299_p4 = pnand %p9298_p3, %p9292_p0 }
   0xa   :  { %9302 = shalt.err (!%p9299_p4)
}
   0xb   :  { %s9328_s24 = smov 256   ;;  %s9329_s25 = smov 16  }
   0xc   :  { %30 = dma.hbm_to_vmem [thread:$0]  %s11341_s3, 2048, %s25_s22, [#allocation6], %s9328_s24, %s9328_s24, %s9329_s25  }
   0xd   :  { %9323 = dma.done.wait [#allocation6], 2048  }
   0xe   :  { %9324 = vsyncadd [#allocation6], 4294965248  ;;  %v11345_v0 = vmov 0.0   ;;  %vm56_vm0 = vcmask 130048   ;;  %v43_v1 = vld [vmem:[%s11339_s1 + $0x18] sm:$0xff]  ;;  %v42_v2 = vld [vmem:[%s11339_s1 + $0x10] sm:$0xff] }
   0xf   :  { %131 = vmatprep.mubr.f32.mxu0 %v11345_v0  ;;  %238 = vmatprep.mubr.f32.mxu1 %v11345_v0  ;;  %v41_v3 = vld [vmem:[%s11339_s1 + $0x8] sm:$0xff]  ;;  %v9386_v4 = vand.u32 4294901760, %v43_v1  ;;  %v9388_v5 = vand.u32 4294901760, %v42_v2  ;;  %v40_v7 = vld [vmem:[%s11339_s1] sm:$0xff]  ;;  %v622_v29 = vld [vmem:[#allocation5 + $0x78] sm:$0xff]  ;;  %s9333_s16 = smov 32  }
  0x10   :  { %v9390_v6 = vand.u32 4294901760, %v41_v3  ;;  %v38_v8 = vld [vmem:[%s11338_s0] sm:$0xff]  ;;  %v39_v9 = vld [vmem:[%s11338_s0 + $0x8] sm:$0xff]  ;;  %v9401_v10 = vand.u32 4294901760, %v40_v7  ;;  %v9454_v38 = vand.u32 4294901760, %v622_v29  ;;  %v621_v39 = vld [vmem:[#allocation5 + $0x70] sm:$0xff] }
  0x11   :  { %v58_v11 = vsel %vm56_vm0, %v38_v8, 0  ;;  %v61_v12 = vsel %vm56_vm0, %v39_v9, 0  ;;  %92 = vmatprep.subr.mxu0 %v9386_v4  ;;  %v9407_v13 = vsub.f32 %v43_v1, %v9386_v4  ;;  %v9412_v15 = vsub.f32 %v42_v2, %v9388_v5  ;;  %v620_v41 = vld [vmem:[#allocation5 + $0x68] sm:$0xff]  ;;  %v619_v44 = vld [vmem:[#allocation5 + $0x60] sm:$0xff]  ;;  %v618_v47 = vld [vmem:[#allocation5 + $0x58] sm:$0xff]  ;;  %s9334_s3 = smov [#allocation8]  }
  0x12   :  { %v9409_v14 = vand.u32 4294901760, %v58_v11  ;;  %v9415_v16 = vsub.f32 %v41_v3, %v9390_v6  ;;  %94 = vmatpush1.msra.mxu0 %v9388_v5  ;;  %v9419_v17 = vsub.f32 %v40_v7, %v9401_v10  ;;  %v9421_v18 = vand.u32 4294901760, %v61_v12  ;;  %v617_v49 = vld [vmem:[#allocation5 + $0x50] sm:$0xff]  ;;  %v616_v51 = vld [vmem:[#allocation5 + $0x48] sm:$0xff]  ;;  %v615_v54 = vld [vmem:[#allocation5 + $0x40] sm:$0xff]  ;;  %s8766_s10 = sshll.u32 %s9334_s3, 4  ;;  %s8767_s10 = int_to_ptr.vmem [resolvable:$true] %s8766_s10 }
  0x13   :  { %96 = vmatprep.subr.mxu0 %v9390_v6  ;;  %v184_v19 = vand.u32 4294901760, %v9407_v13  ;;  %v190_v21 = vand.u32 4294901760, %v9412_v15  ;;  %v9456_v43 = vand.u32 4294901760, %v621_v39  ;;  %v9460_v45 = vsub.f32 %v622_v29, %v9454_v38  ;;  %v614_v57 = vld [vmem:[#allocation5 + $0x38] sm:$0xff]  ;;  %v613_v60 = vld [vmem:[#allocation5 + $0x30] sm:$0xff]  ;;  %v612_v63 = vld [vmem:[#allocation5 + $0x28] sm:$0xff]  ;;  %p9308_p6 = scmp.lt.s32.totalorder %s8767_s10, %s8767_s10 }
  0x14   :  { %v9426_v20 = vsub.f32 %v58_v11, %v9409_v14  ;;  %v196_v22 = vand.u32 4294901760, %v9415_v16  ;;  %98 = vmatpush1.msra.mxu0 %v9401_v10  ;;  %v202_v23 = vand.u32 4294901760, %v9419_v17  ;;  %v9433_v24 = vsub.f32 %v61_v12, %v9421_v18  ;;  %v611_v7 = vld [vmem:[#allocation5 + $0x20] sm:$0xff]  ;;  %v610_v12 = vld [vmem:[#allocation5 + $0x18] sm:$0xff] }
  0x15   :  { %v185_v25 = vsub.f32 %v9407_v13, %v184_v19  ;;  %v191_v27 = vsub.f32 %v9412_v15, %v190_v21  ;;  %283 = vmatprep.subr.mxu0 %v9407_v13  ;;  %11439 = vst [vmem:[#allocation11_spill] sm:$0xff] %v9460_v45  ;;  %v9464_v46 = vand.u32 4294901760, %v620_v41  ;;  %v9468_v48 = vand.u32 4294901760, %v619_v44 }
  0x16   :  { %v134_v26 = vand.u32 4294901760, %v9426_v20  ;;  %v197_v28 = vsub.f32 %v9415_v16, %v196_v22  ;;  %v203_v30 = vsub.f32 %v9419_v17, %v202_v23  ;;  %v145_v31 = vand.u32 4294901760, %v9433_v24 }
  0x17   :  { %v186_v32 = vand.u32 4294901760, %v185_v25  ;;  %v192_v34 = vand.u32 4294901760, %v191_v27  ;;  %v9472_v50 = vsub.f32 %v621_v39, %v9456_v43  ;;  %v9477_v52 = vand.u32 4294901760, %v9460_v45  ;;  %v608_v27 = vld [vmem:[#allocation5 + $0x8] sm:$0xff] }
  0x18   :  { %v135_v33 = vsub.f32 %v9426_v20, %v134_v26  ;;  %v198_v35 = vand.u32 4294901760, %v197_v28  ;;  %v204_v36 = vand.u32 4294901760, %v203_v30  ;;  %v146_v37 = vsub.f32 %v9433_v24, %v145_v31  ;;  %v607_v30 = vld [vmem:[#allocation5] sm:$0xff] }
  0x19   :  { %187 = vmatprep.subr.mxu1 %v186_v32  ;;  %11440 = vst [vmem:[#allocation12_spill] sm:$0xff] %v9477_v52  ;;  %v9479_v53 = vand.u32 4294901760, %v618_v47  ;;  %v9483_v55 = vand.u32 4294901760, %v617_v49  ;;  %v9486_v56 = vsub.f32 %v620_v41, %v9464_v46  ;;  %v9489_v58 = vand.u32 4294901760, %v616_v51 }
  0x1a   :  { %v136_v40 = vand.u32 4294901760, %v135_v33  ;;  %193 = vmatpush1.msra.mxu1 %v192_v34  ;;  %v147_v42 = vand.u32 4294901760, %v146_v37  ;;  %v9492_v59 = vsub.f32 %v619_v44, %v9468_v48  ;;  %v9497_v61 = vand.u32 4294901760, %v9472_v50 }
  0x1b   :  { %199 = vmatprep.subr.mxu1 %v198_v35  ;;  %v9499_v62 = vand.u32 4294901760, %v615_v54  ;;  %v751_v1 = vsub.f32 %v9460_v45, %v9477_v52  ;;  %v9507_v2 = vsub.f32 %v618_v47, %v9479_v53  ;;  %v9509_v3 = vand.u32 4294901760, %v614_v57 }
  0x1c   :  { %137 = vmatmul.mubr.f32.vlgmr.msra.gmra.mxu0 %v136_v40  ;;  %205 = vmatpush1.msra.mxu1 %v204_v36  ;;  %11441 = vst [vmem:[#allocation13_spill] sm:$0xff] %v9497_v61  ;;  %v9515_v8 = vand.u32 4294901760, %v9486_v56  ;;  %v9518_v9 = vsub.f32 %v617_v49, %v9483_v55  ;;  %v9520_v11 = vand.u32 4294901760, %v613_v60  ;;  %v9526_v13 = vand.u32 4294901760, %v9492_v59 }
  0x1d   :  { %286 = vmatpush1.msra.mxu0 %v9412_v15  ;;  %142 = vmatprep.mubr.f32.mxu0 %v11345_v0  ;;  %v9529_v15 = vsub.f32 %v616_v51, %v9489_v58  ;;  %v9548_v25 = vand.u32 4294901760, %v9507_v2  ;;  %vm1524_vm1 = vcmask 261120   ;;  %vm636_vm2 = vcmask 523264  }
  0x1e   :  { %240 = vmatmul.mubr.f32.vlgmr.msra.gmra.mxu1 %v9409_v14  ;;  %371 = vmatprep.subr.mxu1 %v9386_v4  ;;  %11442 = vst [vmem:[#allocation14_spill] sm:$0xff] %v9515_v8  ;;  %11443 = vst [vmem:[#allocation15_spill] sm:$0xff] %v9526_v13  ;;  %v9564_v28 = vsub.f32 %v613_v60, %v9520_v11  ;;  %vm1453_vm3 = vcmask 253952  }
  0x1f   :  { %289 = vmatprep.subr.mxu0 %v9415_v16  ;;  %373 = vmatpush1.msra.mxu1 %v9388_v5  ;;  %v9540_v16 = vand.u32 4294901760, %v611_v7  ;;  %11445 = vst [vmem:[#allocation17_spill] sm:$0xff] %v9548_v25  ;;  %v775_v36 = vsub.f32 %v9507_v2, %v9548_v25 }
  0x20   :  { %148 = vmatmul.mubr.f32.gmra.mxu0 %v147_v42  ;;  %245 = vmatprep.mubr.f32.mxu1 %v11345_v0  ;;  %v9609_v42 = vand.u32 4294901760, %v9564_v28 }
  0x21   :  { %292 = vmatpush1.msra.mxu0 %v9419_v17  ;;  %325 = vmatprep.mubr.f32.mxu0 %v11345_v0  ;;  %v763_v17 = vsub.f32 %v9486_v56, %v9515_v8  ;;  %v9588_v35 = vsub.f32 %v611_v7, %v9540_v16 }
  0x22   :  { %247 = vmatmul.mubr.f32.gmra.mxu1 %v9421_v18  ;;  %375 = vmatprep.subr.mxu1 %v9390_v6  ;;  %11452 = vst [vmem:[#allocation24_spill] sm:$0xff] %v9609_v42 }
  0x23   :  { %460 = vmatprep.subr.mxu0 %v184_v19  ;;  %377 = vmatpush1.msra.mxu1 %v9401_v10  ;;  %v9531_v19 = vand.u32 4294901760, %v612_v63  ;;  %v9604_v40 = vand.u32 4294901760, %v763_v17 }
  0x24   :  { %328 = vmatmul.mubr.f32.vlgmr.msra.gmra.mxu0 %v9426_v20  ;;  %410 = vmatprep.mubr.f32.mxu1 %v11345_v0  ;;  %v609_v20 = vld [vmem:[#allocation5 + $0x10] sm:$0xff] }
  0x25   :  { %464 = vmatpush1.msra.mxu0 %v190_v21  ;;  %333 = vmatprep.mubr.f32.mxu0 %v11345_v0  ;;  %v757_v21 = vsub.f32 %v9472_v50, %v9497_v61  ;;  %v9566_v29 = vand.u32 4294901760, %v609_v20  ;;  %v9576_v32 = vsub.f32 %v612_v63, %v9531_v19  ;;  %11451 = vst [vmem:[#allocation23_spill] sm:$0xff] %v9604_v40  ;;  %v9635_v63 = vand.u32 4294901760, %v775_v36 }
  0x26   :  { %414 = vmatmul.mubr.f32.vlgmr.msra.gmra.mxu1 %v134_v26  ;;  %549 = vmatprep.subr.mxu1 %v9386_v4  ;;  %v9538_v4 = vsub.f32 %v615_v54, %v9499_v62  ;;  %v9553_v26 = vand.u32 4294901760, %v610_v12 }
  0x27   :  { %468 = vmatprep.subr.mxu0 %v196_v22  ;;  %551 = vmatpush1.msra.mxu1 %v9388_v5  ;;  %v9545_v22 = vand.u32 4294901760, %v751_v1  ;;  %v9551_v5 = vsub.f32 %v614_v57, %v9509_v3  ;;  %v9580_v33 = vand.u32 4294901760, %v757_v21  ;;  %v9612_v44 = vsub.f32 %v609_v20, %v9566_v29  ;;  %11456 = vst [vmem:[#allocation28_spill] sm:$0xff] %v9635_v63 }
  0x28   :  { %336 = vmatmul.mubr.f32.gmra.mxu0 %v9433_v24  ;;  %419 = vmatprep.mubr.f32.mxu1 %v11345_v0  ;;  %v769_v24 = vsub.f32 %v9492_v59, %v9526_v13  ;;  %v9583_v34 = vand.u32 4294901760, %v9538_v4  ;;  %v9600_v39 = vsub.f32 %v610_v12, %v9553_v26  ;;  %v9621_v51 = vand.u32 4294901760, %v9576_v32 }
  0x29   :  { %472 = vmatpush1.msra.mxu0 %v202_v23  ;;  %11444 = vst [vmem:[#allocation16_spill] sm:$0xff] %v9545_v22  ;;  %505 = vmatprep.mubr.f32.mxu0 %v11345_v0  ;;  %v9561_v23 = vand.u32 4294901760, %v9518_v9  ;;  %11448 = vst [vmem:[#allocation20_spill] sm:$0xff] %v9580_v33  ;;  %v9595_v37 = vand.u32 4294901760, %v9551_v5  ;;  %v9628_v57 = vand.u32 4294901760, %v9588_v35  ;;  %v805_v20 = vsub.f32 %v9564_v28, %v9609_v42 }
  0x2a   :  { %423 = vmatmul.mubr.f32.gmra.mxu1 %v145_v31  ;;  %553 = vmatprep.subr.mxu1 %v9390_v6  ;;  %v9573_v31 = vand.u32 4294901760, %v9529_v15  ;;  %11449 = vst [vmem:[#allocation21_spill] sm:$0xff] %v9583_v34  ;;  %v9585_v6 = vand.u32 4294901760, %v608_v27  ;;  %v9616_v47 = vand.u32 4294901760, %v769_v24  ;;  %11454 = vst [vmem:[#allocation26_spill] sm:$0xff] %v9621_v51  ;;  %v793_v54 = vsub.f32 %v9538_v4, %v9583_v34 }
  0x2b   :  { %11446 = vst [vmem:[#allocation18_spill] sm:$0xff] %v9561_v23  ;;  %657 = vmatprep.subr.mxu0 %v9454_v38  ;;  %555 = vmatpush1.msra.mxu1 %v9401_v10  ;;  %11450 = vst [vmem:[#allocation22_spill] sm:$0xff] %v9595_v37  ;;  %v9597_v10 = vand.u32 4294901760, %v607_v30  ;;  %v781_v41 = vsub.f32 %v9518_v9, %v9561_v23  ;;  %v9640_v1 = vand.u32 4294901760, %v9600_v39  ;;  %v9652_v21 = vand.u32 4294901760, %v9612_v44 }
  0x2c   :  { %11447 = vst [vmem:[#allocation19_spill] sm:$0xff] %v9573_v31  ;;  %507 = vmatmul.mubr.f32.vlgmr.msra.gmra.mxu0 %v9409_v14  ;;  %588 = vmatprep.mubr.f32.mxu1 %v11345_v0  ;;  %11453 = vst [vmem:[#allocation25_spill] sm:$0xff] %v9616_v47  ;;  %v787_v49 = vsub.f32 %v9529_v15, %v9573_v31  ;;  %v9631_v60 = vsub.f32 %v608_v27, %v9585_v6 }
  0x2d   :  { %659 = vmatpush1.msra.mxu0 %v9456_v43  ;;  %753 = vmatprep.subr.mxu1 %v9545_v22  ;;  %11455 = vst [vmem:[#allocation27_spill] sm:$0xff] %v9628_v57  ;;  %11457 = vst [vmem:[#allocation29_spill] sm:$0xff] %v9640_v1  ;;  %v9643_v7 = vsub.f32 %v607_v30, %v9597_v10  ;;  %v9647_v12 = vand.u32 4294901760, %v781_v41  ;;  %v811_v17 = vsub.f32 %v9576_v32, %v9621_v51 }
  0x2e   :  { %661 = vmatprep.subr.mxu0 %v9464_v46  ;;  %512 = vmatprep.mubr.f32.mxu0 %v11345_v0  ;;  %11459 = vst [vmem:[#allocation31_spill] sm:$0xff] %v9652_v21  ;;  %v9656_v27 = vand.u32 4294901760, %v787_v49  ;;  %v9662_v30 = vand.u32 4294901760, %v793_v54  ;;  %v817_v24 = vsub.f32 %v9588_v35, %v9628_v57  ;;  %v9667_v36 = vand.u32 4294901760, %v9631_v60 }
  0x2f   :  { %663 = vmatpush1.msra.mxu0 %v9468_v48  ;;  %590 = vmatmul.mubr.f32.vlgmr.msra.gmra.mxu1 %v9409_v14  ;;  %v799_v14 = vsub.f32 %v9551_v5, %v9595_v37  ;;  %11458 = vst [vmem:[#allocation30_spill] sm:$0xff] %v9647_v12  ;;  %v823_v49 = vsub.f32 %v9600_v39, %v9640_v1  ;;  %v9680_v54 = vand.u32 4294901760, %v805_v20 }
  0x30   :  { %665 = vmatprep.subr.mxu0 %v9479_v53  ;;  %759 = vmatpush1.msra.mxu1 %v9580_v33  ;;  %11460 = vst [vmem:[#allocation32_spill] sm:$0xff] %v9656_v27  ;;  %11461 = vst [vmem:[#allocation33_spill] sm:$0xff] %v9662_v30 }
  0x31   :  { %514 = vmatmul.mubr.f32.gmra.mxu0 %v9421_v18  ;;  %765 = vmatprep.subr.mxu1 %v9604_v40  ;;  %11462 = vst [vmem:[#allocation34_spill] sm:$0xff] %v9667_v36  ;;  %v9671_v41 = vand.u32 4294901760, %v799_v14  ;;  %11465 = vst [vmem:[#allocation37_spill] sm:$0xff] %v9680_v54  ;;  %v9690_v14 = vand.u32 4294901760, %v817_v24  ;;  %v9696_v20 = vand.u32 4294901760, %v823_v49 }
  0x32   :  { %667 = vmatpush1.msra.mxu0 %v9483_v55  ;;  %771 = vmatpush1.msra.mxu1 %v9616_v47  ;;  %v829_v47 = vsub.f32 %v9612_v44, %v9652_v21 }
  0x33   :  { %669 = vmatprep.subr.mxu0 %v9489_v58  ;;  %595 = vmatprep.mubr.f32.mxu1 %v11345_v0  ;;  %11463 = vst [vmem:[#allocation35_spill] sm:$0xff] %v9671_v41  ;;  %v9676_v0 = vand.u32 4294901760, %v9643_v7  ;;  %11467 = vst [vmem:[#allocation39_spill] sm:$0xff] %v9690_v14 }
  0x34   :  { %671 = vmatpush1.msra.mxu0 %v9499_v62  ;;  %777 = vmatprep.subr.mxu1 %v9635_v63  ;;  %11468 = vst [vmem:[#allocation40_spill] sm:$0xff] %v9696_v20 }
  0x35   :  { %597 = vmatmul.mubr.f32.gmra.mxu1 %v9421_v18  ;;  %11464 = vst [vmem:[#allocation36_spill] sm:$0xff] %v9676_v0  ;;  %673 = vmatprep.subr.mxu0 %v9509_v3  ;;  %v9686_v18 = vand.u32 4294901760, %v811_v17  ;;  %v9702_v17 = vand.u32 4294901760, %v829_v47  ;;  %v11473_v47 = vld [vmem:[#allocation25_spill] sm:$0xff] }
  0x36   :  { %783 = vmatpush1.msra.mxu1 %v9647_v12  ;;  %675 = vmatpush1.msra.mxu0 %v9520_v11  ;;  %v835_v12 = vsub.f32 %v9631_v60, %v9667_v36 }
  0x37   :  { %789 = vmatprep.subr.mxu1 %v9656_v27  ;;  %11466 = vst [vmem:[#allocation38_spill] sm:$0xff] %v9686_v18  ;;  %677 = vmatprep.subr.mxu0 %v9531_v19  ;;  %v841_v27 = vsub.f32 %v9643_v7, %v9676_v0  ;;  %11469 = vst [vmem:[#allocation41_spill] sm:$0xff] %v9702_v17 }
  0x38   :  { %795 = vmatpush1.msra.mxu1 %v9662_v30  ;;  %679 = vmatpush1.msra.mxu0 %v9540_v16  ;;  %v9708_v24 = vand.u32 4294901760, %v835_v12  ;;  %v11474_v12 = vld [vmem:[#allocation30_spill] sm:$0xff] }
  0x39   :  { %801 = vmatprep.subr.mxu1 %v9671_v41  ;;  %681 = vmatprep.subr.mxu0 %v9553_v26  ;;  %v9712_v49 = vand.u32 4294901760, %v841_v27  ;;  %v11472_v41 = vmov 0.0   ;;  %v11475_v27 = vld [vmem:[#allocation32_spill] sm:$0xff] }
  0x3a   :  { %807 = vmatpush1.msra.mxu1 %v9680_v54  ;;  %683 = vmatpush1.msra.mxu0 %v9566_v29  ;;  %11470 = vst [vmem:[#allocation42_spill] sm:$0xff] %v9708_v24 }
  0x3b   :  { %813 = vmatprep.subr.mxu1 %v9686_v18  ;;  %685 = vmatprep.subr.mxu0 %v9585_v6  ;;  %11471 = vst [vmem:[#allocation43_spill] sm:$0xff] %v9712_v49 }
  0x3c   :  { %819 = vmatpush1.msra.mxu1 %v9690_v14  ;;  %687 = vmatpush1.msra.mxu0 %v9597_v10 }
  0x3d   :  { %825 = vmatprep.subr.mxu1 %v9696_v20  ;;  %720 = vmatprep.mubr.f32.mxu0 %v11472_v41 }
  0x3e   :  { %831 = vmatpush1.msra.mxu1 %v9702_v17  ;;  %902 = vmatprep.subr.mxu0 %v9460_v45 }
  0x3f   :  { %726 = vmatmul.mubr.f32.vlgmr.msra.gmra.mxu0 %v11472_v41  ;;  %837 = vmatprep.subr.mxu1 %v9708_v24 }
  0x40   :  { %905 = vmatpush1.msra.mxu0 %v9472_v50  ;;  %843 = vmatpush1.msra.mxu1 %v9712_v49 }
  0x41   :  { %876 = vmatprep.mubr.f32.mxu1 %v11472_v41  ;;  %908 = vmatprep.subr.mxu0 %v9486_v56 }
  0x42   :  { %878 = vmatmul.mubr.f32.vlgmr.msra.gmra.mxu1 %v11472_v41  ;;  %911 = vmatpush1.msra.mxu0 %v9492_v59 }
  0x43   :  { %1006 = vmatprep.subr.mxu1 %v9454_v38  ;;  %914 = vmatprep.subr.mxu0 %v9507_v2 }
  0x44   :  { %1008 = vmatpush1.msra.mxu1 %v9456_v43  ;;  %917 = vmatpush1.msra.mxu0 %v9518_v9 }
  0x45   :  { %1010 = vmatprep.subr.mxu1 %v9464_v46  ;;  %920 = vmatprep.subr.mxu0 %v9529_v15 }
  0x46   :  { %1012 = vmatpush1.msra.mxu1 %v9468_v48  ;;  %923 = vmatpush1.msra.mxu0 %v9538_v4 }
  0x47   :  { %1014 = vmatprep.subr.mxu1 %v9479_v53  ;;  %926 = vmatprep.subr.mxu0 %v9551_v5 }
  0x48   :  { %1016 = vmatpush1.msra.mxu1 %v9483_v55  ;;  %929 = vmatpush1.msra.mxu0 %v9564_v28 }
  0x49   :  { %1018 = vmatprep.subr.mxu1 %v9489_v58  ;;  %932 = vmatprep.subr.mxu0 %v9576_v32 }
  0x4a   :  { %1020 = vmatpush1.msra.mxu1 %v9499_v62  ;;  %935 = vmatpush1.msra.mxu0 %v9588_v35 }
  0x4b   :  { %1022 = vmatprep.subr.mxu1 %v9509_v3  ;;  %938 = vmatprep.subr.mxu0 %v9600_v39 }
  0x4c   :  { %1024 = vmatpush1.msra.mxu1 %v9520_v11  ;;  %941 = vmatpush1.msra.mxu0 %v9612_v44 }
  0x4d   :  { %1026 = vmatprep.subr.mxu1 %v9531_v19  ;;  %944 = vmatprep.subr.mxu0 %v9631_v60 }
  0x4e   :  { %1028 = vmatpush1.msra.mxu1 %v9540_v16  ;;  %947 = vmatpush1.msra.mxu0 %v9643_v7 }
  0x4f   :  { %980 = vmatprep.mubr.f32.mxu0 %v11472_v41  ;;  %1030 = vmatprep.subr.mxu1 %v9553_v26 }
  0x50   :  { %983 = vmatmul.mubr.f32.vlgmr.msra.gmra.mxu0 %v11472_v41  ;;  %1032 = vmatpush1.msra.mxu1 %v9566_v29 }
  0x51   :  { %1098 = vmatprep.subr.mxu0 %v9477_v52  ;;  %1034 = vmatprep.subr.mxu1 %v9585_v6 }
  0x52   :  { %1102 = vmatpush1.msra.mxu0 %v9497_v61  ;;  %1036 = vmatpush1.msra.mxu1 %v9597_v10 }
  0x53   :  { %1069 = vmatprep.mubr.f32.mxu1 %v11472_v41  ;;  %1106 = vmatprep.subr.mxu0 %v9515_v8 }
  0x54   :  { %1073 = vmatmul.mubr.f32.vlgmr.msra.gmra.mxu1 %v11472_v41  ;;  %1110 = vmatpush1.msra.mxu0 %v9526_v13 }
  0x55   :  { %1216 = vmatprep.subr.mxu1 %v9454_v38  ;;  %1114 = vmatprep.subr.mxu0 %v9548_v25 }
  0x56   :  { %1218 = vmatpush1.msra.mxu1 %v9456_v43  ;;  %1118 = vmatpush1.msra.mxu0 %v9561_v23 }
  0x57   :  { %1220 = vmatprep.subr.mxu1 %v9464_v46  ;;  %1122 = vmatprep.subr.mxu0 %v9573_v31 }
  0x58   :  { %1222 = vmatpush1.msra.mxu1 %v9468_v48  ;;  %1126 = vmatpush1.msra.mxu0 %v9583_v34 }
  0x59   :  { %1224 = vmatprep.subr.mxu1 %v9479_v53  ;;  %1130 = vmatprep.subr.mxu0 %v9595_v37 }
  0x5a   :  { %1226 = vmatpush1.msra.mxu1 %v9483_v55  ;;  %1134 = vmatpush1.msra.mxu0 %v9609_v42 }
  0x5b   :  { %1228 = vmatprep.subr.mxu1 %v9489_v58  ;;  %1138 = vmatprep.subr.mxu0 %v9621_v51 }
  0x5c   :  { %1230 = vmatpush1.msra.mxu1 %v9499_v62  ;;  %1142 = vmatpush1.msra.mxu0 %v9628_v57 }
  0x5d   :  { %1232 = vmatprep.subr.mxu1 %v9509_v3  ;;  %1146 = vmatprep.subr.mxu0 %v9640_v1 }
  0x5e   :  { %1234 = vmatpush1.msra.mxu1 %v9520_v11  ;;  %1150 = vmatpush1.msra.mxu0 %v9652_v21 }
  0x5f   :  { %1236 = vmatprep.subr.mxu1 %v9531_v19  ;;  %1154 = vmatprep.subr.mxu0 %v9667_v36 }
  0x60   :  { %1238 = vmatpush1.msra.mxu1 %v9540_v16  ;;  %1158 = vmatpush1.msra.mxu0 %v9676_v0  ;;  %v11476_v0 = vld [vmem:[#allocation35_spill] sm:$0xff] }
  0x61   :  { %1191 = vmatprep.mubr.f32.mxu0 %v11472_v41  ;;  %1240 = vmatprep.subr.mxu1 %v9553_v26 }
  0x62   :  { %1193 = vmatmul.mubr.f32.vlgmr.msra.gmra.mxu0 %v11472_v41  ;;  %1242 = vmatpush1.msra.mxu1 %v9566_v29 }
  0x63   :  { %1279 = vmatprep.mubr.f32.mxu1 %v11472_v41  ;;  %1244 = vmatprep.subr.mxu1 %v9585_v6 }
  0x64   :  { %1546 = vmatprep.subr.mxu0 %v9454_v38  ;;  %1246 = vmatpush1.msra.mxu1 %v9597_v10 }
  0x65   :  { %1548 = vmatpush1.msra.mxu0 %v9456_v43  ;;  %1281 = vmatmul.mubr.f32.vlgmr.msra.gmra.mxu1 %v11472_v41 }
  0x66   :  { %1642 = vmatprep.subr.mxu1 %v9545_v22  ;;  %1550 = vmatprep.subr.mxu0 %v9464_v46 }
  0x67   :  { %1648 = vmatpush1.msra.mxu1 %v9580_v33  ;;  %1552 = vmatpush1.msra.mxu0 %v9468_v48 }
  0x68   :  { %1654 = vmatprep.subr.mxu1 %v9604_v40  ;;  %1554 = vmatprep.subr.mxu0 %v9479_v53 }
  0x69   :  { %1660 = vmatpush1.msra.mxu1 %v11473_v47  ;;  %1556 = vmatpush1.msra.mxu0 %v9483_v55 }
  0x6a   :  { %1666 = vmatprep.subr.mxu1 %v9635_v63  ;;  %1558 = vmatprep.subr.mxu0 %v9489_v58 }
  0x6b   :  { %1672 = vmatpush1.msra.mxu1 %v11474_v12  ;;  %1560 = vmatpush1.msra.mxu0 %v9499_v62 }
  0x6c   :  { %1678 = vmatprep.subr.mxu1 %v11475_v27  ;;  %1562 = vmatprep.subr.mxu0 %v9509_v3 }
  0x6d   :  { %1684 = vmatpush1.msra.mxu1 %v9662_v30  ;;  %1765 = vmatprep.mubr.f32.mxu1 %v11472_v41 }
  0x6e   :  { %1690 = vmatprep.subr.mxu1 %v11476_v0  ;;  %1564 = vmatpush1.msra.mxu0 %v9520_v11 }
  0x6f   :  { %1696 = vmatpush1.msra.mxu1 %v9680_v54  ;;  %1566 = vmatprep.subr.mxu0 %v9531_v19 }
  0x70   :  { %1702 = vmatprep.subr.mxu1 %v9686_v18  ;;  %1568 = vmatpush1.msra.mxu0 %v9540_v16 }
  0x71   :  { %1708 = vmatpush1.msra.mxu1 %v9690_v14  ;;  %1570 = vmatprep.subr.mxu0 %v9553_v26 }
  0x72   :  { %1714 = vmatprep.subr.mxu1 %v9696_v20  ;;  %1572 = vmatpush1.msra.mxu0 %v9566_v29  ;;  %v46_v20 = vlaneseq }
  0x73   :  { %1720 = vmatpush1.msra.mxu1 %v9702_v17  ;;  %1574 = vmatprep.subr.mxu0 %v9585_v6 }
  0x74   :  { %1726 = vmatprep.subr.mxu1 %v9708_v24  ;;  %1576 = vmatpush1.msra.mxu0 %v9597_v10  ;;  %v9829_v14 = vshrl.u32 %v46_v20, 7  ;;  %v44_v24 = vld [vmem:[%s11340_s2] sm:$0x3]  ;;  %s9332_s2 = smov 64  }
  0x75   :  { %1732 = vmatpush1.msra.mxu1 %v9712_v49  ;;  %1609 = vmatprep.mubr.f32.mxu0 %v11472_v41 }
  0x76   :  { %1895 = vmatprep.subr.mxu1 %v9454_v38  ;;  %1791 = vmatprep.subr.mxu0 %v9460_v45  ;;  %v9832_v17 = vsub.s32 0, %v9829_v14  ;;  %v52_v49 = vsub.s32 1, %v9829_v14 }
  0x78   :  { %11477 = vst [vmem:[#allocation44_spill] sm:$0xff] %v9832_v17  ;;  %v49_v54 = vrot.slane %v44_v24, %v9832_v17  ;;  %v53_v27 = vrot.slane %v44_v24, %v52_v49 }
  0xdc   :  { %v138_v18 = vpop.f32.mrf.mxu0 }
  0xdd   :  { %v139_v63 = vadd.f32 %v138_v18, %v49_v54 }
  0xde   :  { %v140_v0 = vpop.f32.mrf.mxu0  ;;  %v241_v30 = vpop.f32.mrf.mxu1 }
  0xdf   :  { %v141_v47 = vadd.f32 %v140_v0, %v53_v27  ;;  %v242_v1 = vadd.f32 %v241_v30, %v139_v63 }
  0xe0   :  { %v149_v12 = vpop.f32.mrf.mxu0  ;;  %v243_v45 = vpop.f32.mrf.mxu1 }
  0xe1   :  { %v150_v33 = vadd.f32 %v149_v12, %v49_v54  ;;  %v244_v51 = vadd.f32 %v243_v45, %v141_v47 }
  0xe2   :  { %v151_v20 = vpop.f32.mrf.mxu0  ;;  %v248_v36 = vpop.f32.mrf.mxu1 }
  0xe3   :  { %v152_v37 = vadd.f32 %v151_v20, %v53_v27  ;;  %v249_v23 = vadd.f32 %v248_v36, %v150_v33 }
  0xe4   :  { %v329_v21 = vpop.f32.mrf.mxu0  ;;  %v250_v40 = vpop.f32.mrf.mxu1 }
  0xe5   :  { %v330_v42 = vadd.f32 %v329_v21, %v242_v1  ;;  %v251_v18 = vadd.f32 %v250_v40, %v152_v37 }
  0xe6   :  { %v331_v57 = vpop.f32.mrf.mxu0  ;;  %v415_v22 = vpop.f32.mrf.mxu1 }
  0xe7   :  { %v332_v31 = vadd.f32 %v331_v57, %v244_v51  ;;  %v416_v25 = vadd.f32 %v415_v22, %v330_v42 }
  0xe8   :  { %v337_v34 = vpop.f32.mrf.mxu0  ;;  %v417_v17 = vpop.f32.mrf.mxu1 }
  0xe9   :  { %v338_v13 = vadd.f32 %v337_v34, %v249_v23  ;;  %v418_v61 = vadd.f32 %v417_v17, %v332_v31  ;;  %v9331_v17 = vmov 1966171168  }
  0xea   :  { %v339_v24 = vpop.f32.mrf.mxu0  ;;  %v424_v49 = vpop.f32.mrf.mxu1  ;;  %v1289_v20 = vunpack.c.l.s4 %v9331_v17 }
  0xeb   :  { %v340_v63 = vadd.f32 %v339_v24, %v251_v18  ;;  %v425_v12 = vadd.f32 %v424_v49, %v338_v13 }
  0xec   :  { %v508_v8 = vpop.f32.mrf.mxu0  ;;  %v426_v0 = vpop.f32.mrf.mxu1 }
  0xed   :  { %v509_v52 = vadd.f32 %v508_v8, %v416_v25  ;;  %v427_v47 = vadd.f32 %v426_v0, %v340_v63  ;;  %v1290_v63 = vunpack.c.0.s8 %v1289_v20 }
  0xee   :  { %v510_v30 = vpop.f32.mrf.mxu0 }
  0xef   :  { %v511_v54 = vadd.f32 %v510_v30, %v418_v61  ;;  %v591_v45 = vpop.f32.mrf.mxu1 }
  0xf0   :  { %v592_v1 = vadd.f32 %v591_v45, %v509_v52 }
  0xf1   :  { %v515_v21 = vpop.f32.mrf.mxu0  ;;  %v593_v51 = vpop.f32.mrf.mxu1 }
  0xf2   :  { %v516_v27 = vadd.f32 %v515_v21, %v425_v12  ;;  %603 = vst [vmem:[#allocation2] sm:$0xff] %v592_v1  ;;  %v594_v33 = vadd.f32 %v593_v51, %v511_v54  ;;  %v9840_v21 = vsub.s32 %v1290_v63, %v9829_v14 }
  0xf3   :  { %v517_v57 = vpop.f32.mrf.mxu0 }
  0xf4   :  { %v518_v22 = vadd.f32 %v517_v57, %v427_v47  ;;  %604 = vst [vmem:[#allocation2 + $0x8] sm:$0xff] %v594_v33 }
  0xf5   :  { %v598_v23 = vpop.f32.mrf.mxu1 }
  0xf6   :  { %v599_v34 = vadd.f32 %v598_v23, %v516_v27 }
  0xf7   :  { %v600_v37 = vpop.f32.mrf.mxu1 }
  0xf8   :  { %605 = vst [vmem:[#allocation2 + $0x10] sm:$0xff] %v599_v34  ;;  %v601_v8 = vadd.f32 %v600_v37, %v518_v22 }
  0xfa   :  { %606 = vst [vmem:[#allocation2 + $0x18] sm:$0xff] %v601_v8 }
  0xfb   :  { %v623_v8 = vld [vmem:[#allocation2] ss:$8 sm:$0x3] }
  0xff   :  { %v727_v25 = vpop.f32.mrf.mxu0 }
 0x101   :  { %v729_v61 = vpop.f32.mrf.mxu0 }
 0x102   :  { %v879_v13 = vpop.f32.mrf.mxu1 }
 0x103   :  { %v880_v40 = vadd.f32 %v879_v13, %v727_v25  ;;  %v627_v13 = vld [vmem:[#allocation2 + $0x7] ss:$8 sm:$0x3] }
 0x104   :  { %v881_v52 = vpop.f32.mrf.mxu1 }
 0x105   :  { %v882_v24 = vadd.f32 %v881_v52, %v729_v61 }
 0x110   :  { %v984_v31 = vpop.f32.mrf.mxu0 }
 0x111   :  { %v985_v49 = vadd.f32 %v984_v31, %v880_v40  ;;  %v625_v31 = vld [vmem:[#allocation2 + $0x10] ss:$8 sm:$0x3] }
 0x112   :  { %v986_v42 = vpop.f32.mrf.mxu0 }
 0x113   :  { %v987_v18 = vadd.f32 %v986_v42, %v882_v24  ;;  %v632_v42 = vrot.slane %v627_v13, 1 }
 0x114   :  { %v1074_v36 = vpop.f32.mrf.mxu1 }
 0x115   :  { %v1075_v30 = vadd.f32 %v1074_v36, %v985_v49  ;;  %v629_v36 = vld [vmem:[#allocation2 + $0x17] ss:$8 sm:$0x3] }
 0x116   :  { %v1076_v0 = vpop.f32.mrf.mxu1  ;;  %v633_v24 = vrot.slane %v629_v36, 1 }
 0x117   :  { %v1077_v12 = vadd.f32 %v1076_v0, %v987_v18 }
 0x122   :  { %v1194_v54 = vpop.f32.mrf.mxu0 }
 0x123   :  { %v1195_v45 = vadd.f32 %v1194_v54, %v1075_v30 }
 0x124   :  { %v1196_v1 = vpop.f32.mrf.mxu0 }
 0x125   :  { %v1197_v47 = vadd.f32 %v1196_v1, %v1077_v12  ;;  %v1282_v27 = vpop.f32.mrf.mxu1 }
 0x126   :  { %v1283_v51 = vadd.f32 %v1282_v27, %v1195_v45 }
 0x127   :  { %v1284_v33 = vpop.f32.mrf.mxu1 }
 0x128   :  { %v1294_v57 = vrot.slane %v1283_v51, %v9840_v21  ;;  %v1285_v22 = vadd.f32 %v1284_v33, %v1197_v47 }
 0x12a   :  { %v1295_v23 = vcombine.high %v1294_v57, %v1294_v57  ;;  %v1302_v34 = vrot.slane %v1294_v57, %v9840_v21  ;;  %v1321_v37 = vrot.slane %v1285_v22, %v9840_v21 }
 0x12c   :  { %v1309_v25 = vrot.slane %v1295_v23, %v9840_v21  ;;  %v1312_v61 = vadd.f32 %v1302_v34, %v623_v8  ;;  %v1322_v14 = vcombine.high %v1321_v37, %v1321_v37  ;;  %v1329_v52 = vrot.slane %v1321_v37, %v9840_v21 }
 0x12e   :  { %v1313_v40 = vadd.f32 %v1309_v25, %v625_v31  ;;  %9025 = vtanh.f32 %v1312_v61  ;;  %v1336_v17 = vrot.slane %v1322_v14, %v9840_v21  ;;  %v1339_v20 = vadd.f32 %v1329_v52, %v632_v42 }
 0x12f   :  { %v8778_v54 = vmul.f32 -1.442695, %v1312_v61 }
 0x130   :  { %9027 = vtanh.f32 %v1313_v40  ;;  %v1340_v49 = vadd.f32 %v1336_v17, %v633_v24  ;;  %v8779_v12 = vmul.f32 -1.442695, %v1313_v40  ;;  %v8780_v45 = vmul.f32 -1.442695, %v1339_v20 }
 0x131   :  { %9029 = vtanh.f32 %v1339_v20 }
 0x132   :  { %9031 = vtanh.f32 %v1340_v49  ;;  %v8781_v1 = vmul.f32 -1.442695, %v1340_v49 }
 0x133   :  { %9033 = vpow2.f32 %v8778_v54 }
 0x134   :  { %9035 = vpow2.f32 %v8779_v12 }
 0x135   :  { %9037 = vpow2.f32 %v8780_v45 }
 0x136   :  { %9039 = vpow2.f32 %v8781_v1 }
 0x13b   :  { %v9026_v18 = vpop.eup %9025 }
 0x13c   :  { %1373 = vrot.lane.b32.xlu0 %v9026_v18, %s9332_s2 }
 0x13d   :  { %v9028_v0 = vpop.eup %9027 }
 0x13e   :  { %v9030_v63 = vpop.eup %9029 }
 0x13f   :  { %1407 = vrot.lane.b32.xlu1 %v9030_v63, %s9332_s2  ;;  %v9032_v30 = vpop.eup %9031 }
 0x140   :  { %1375 = vrot.lane.b32.xlu0 %v9028_v0, %s9332_s2  ;;  %v9034_v47 = vpop.eup %9033 }
 0x141   :  { %v1347_v27 = vadd.f32 1.0, %v9034_v47  ;;  %v9036_v51 = vpop.eup %9035 }
 0x142   :  { %v9038_v33 = vpop.eup %9037  ;;  %v1348_v57 = vadd.f32 1.0, %v9036_v51 }
 0x143   :  { %1409 = vrot.lane.b32.xlu1 %v9032_v30, %s9332_s2  ;;  %9041 = vrcp.f32 %v1347_v27  ;;  %v1361_v22 = vadd.f32 1.0, %v9038_v33  ;;  %v9040_v23 = vpop.eup %9039 }
 0x144   :  { %9043 = vrcp.f32 %v1348_v57  ;;  %v1362_v34 = vadd.f32 1.0, %v9040_v23 }
 0x145   :  { %9045 = vrcp.f32 %v1361_v22 }
 0x146   :  { %9047 = vrcp.f32 %v1362_v34 }
 0x150   :  { %v9042_v37 = vpop.eup %9041 }
 0x151   :  { %v9044_v61 = vpop.eup %9043  ;;  %v1369_v20 = vmul.f32 0.0, %v9042_v37 }
 0x152   :  { %v9046_v14 = vpop.eup %9045  ;;  %v1370_v18 = vmul.f32 0.0, %v9044_v61 }
 0x153   :  { %v9048_v42 = vpop.eup %9047  ;;  %v1403_v30 = vmul.f32 0.0, %v9046_v14 }
 0x154   :  { %v1404_v45 = vmul.f32 0.0, %v9048_v42 }
 0x1ae   :  { %v1374_v8 = vpop.permute.xlu0 %1373 }
 0x1af   :  { %v1379_v25 = vmul.f32 %v9042_v37, %v1374_v8 }
 0x1b1   :  { %1383 = vrot.lane.b32.xlu0 %v1379_v25, %s9333_s16  ;;  %v1408_v52 = vpop.permute.xlu1 %1407 }
 0x1b2   :  { %v1376_v13 = vpop.permute.xlu0 %1375  ;;  %v1413_v40 = vmul.f32 %v9046_v14, %v1408_v52 }
 0x1b3   :  { %v1380_v31 = vmul.f32 %v9044_v61, %v1376_v13 }
 0x1b5   :  { %1385 = vrot.lane.b32.xlu1 %v1380_v31, %s9333_s16  ;;  %1417 = vrot.lane.b32.xlu0 %v1413_v40, %s9333_s16  ;;  %v1410_v36 = vpop.permute.xlu1 %1409 }
 0x1b6   :  { %v1414_v17 = vmul.f32 %v9048_v42, %v1410_v36 }
 0x1b9   :  { %1419 = vrot.lane.b32.xlu1 %v1414_v17, %s9333_s16 }
 0x223   :  { %v1384_v24 = vpop.permute.xlu0 %1383 }
 0x224   :  { %v9856_v49 = vadd.f32 %v1384_v24, %v1369_v20 }
 0x226   :  { %9049 = vtanh.f32 %v9856_v49 }
 0x227   :  { %v1386_v0 = vpop.permute.xlu1 %1385  ;;  %v1418_v54 = vpop.permute.xlu0 %1417 }
 0x228   :  { %v9859_v63 = vadd.f32 %v1386_v0, %v1370_v18  ;;  %v9862_v12 = vadd.f32 %v1418_v54, %v1403_v30 }
 0x22a   :  { %9051 = vtanh.f32 %v9859_v63 }
 0x22b   :  { %9053 = vtanh.f32 %v9862_v12  ;;  %v1420_v1 = vpop.permute.xlu1 %1419 }
 0x22c   :  { %v9865_v47 = vadd.f32 %v1420_v1, %v1404_v45 }
 0x22e   :  { %9055 = vtanh.f32 %v9865_v47 }
 0x233   :  { %v9050_v27 = vpop.eup %9049 }
 0x234   :  { %1395 = vrot.lane.b32.xlu0 %v9050_v27, %s9332_s2  ;;  %v11482_v27 = vld [vmem:[#allocation12_spill] sm:$0xff] }
 0x237   :  { %v9052_v51 = vpop.eup %9051 }
 0x238   :  { %1397 = vrot.lane.b32.xlu1 %v9052_v51, %s9332_s2  ;;  %v9054_v33 = vpop.eup %9053  ;;  %v11483_v51 = vld [vmem:[#allocation13_spill] sm:$0xff] }
 0x239   :  { %1429 = vrot.lane.b32.xlu0 %v9054_v33, %s9332_s2  ;;  %v11484_v33 = vld [vmem:[#allocation14_spill] sm:$0xff] }
 0x23b   :  { %v9056_v57 = vpop.eup %9055 }
 0x23c   :  { %1431 = vrot.lane.b32.xlu1 %v9056_v57, %s9332_s2  ;;  %v11485_v57 = vld [vmem:[#allocation15_spill] sm:$0xff] }
 0x2a6   :  { %v1396_v22 = vpop.permute.xlu0 %1395 }
 0x2a7   :  { %v9872_v34 = vmul.f32 %v9042_v37, %v1396_v22  ;;  %v11486_v22 = vld [vmem:[#allocation17_spill] sm:$0xff] }
 0x2a9   :  { %11478 = vst [vmem:[#allocation45_spill] sm:$0xff] %v9872_v34 }
 0x2aa   :  { %v1398_v23 = vpop.permute.xlu1 %1397 }
 0x2ab   :  { %v9874_v8 = vmul.f32 %v9044_v61, %v1398_v23  ;;  %v1430_v31 = vpop.permute.xlu0 %1429  ;;  %v11487_v23 = vld [vmem:[#allocation18_spill] sm:$0xff] }
 0x2ac   :  { %v9880_v36 = vmul.f32 %v9046_v14, %v1430_v31  ;;  %v11490_v31 = vld [vmem:[#allocation22_spill] sm:$0xff] }
 0x2ad   :  { %11479 = vst [vmem:[#allocation46_spill] sm:$0xff] %v9874_v8  ;;  %v1488_v25 = vcombine.low %v9872_v34, %v9874_v8  ;;  %v11504_v8 = vld [vmem:[#allocation32_spill] sm:$0xff]  ;;  %v11505_v34 = vld [vmem:[#allocation33_spill] sm:$0xff] }
 0x2ae   :  { %v1432_v52 = vpop.permute.xlu1 %1431  ;;  %11480 = vst [vmem:[#allocation47_spill] sm:$0xff] %v9880_v36 }
 0x2af   :  { %v1495_v13 = vrot.slane %v1488_v25, %v9840_v21  ;;  %v9882_v17 = vmul.f32 %v9048_v42, %v1432_v52  ;;  %v11488_v25 = vld [vmem:[#allocation19_spill] sm:$0xff]  ;;  %v11491_v52 = vld [vmem:[#allocation24_spill] sm:$0xff] }
 0x2b1   :  { %v1502_v40 = vrot.slane %v1495_v13, %v9840_v21  ;;  %11481 = vst [vmem:[#allocation48_spill] sm:$0xff] %v9882_v17  ;;  %v1506_v37 = vcombine.low %v9880_v36, %v9882_v17  ;;  %v11489_v13 = vld [vmem:[#allocation21_spill] sm:$0xff]  ;;  %v11506_v17 = vld [vmem:[#allocation35_spill] sm:$0xff] }
 0x2b2   :  { %v11507_v36 = vld [vmem:[#allocation37_spill] sm:$0xff] }
 0x2b3   :  { %1503 = vrot.lane.b32.xlu0 %v1502_v40, %s9333_s16  ;;  %v1513_v61 = vrot.slane %v1506_v37, %v9840_v21  ;;  %v11492_v40 = vld [vmem:[#allocation26_spill] sm:$0xff]  ;;  %v11493_v37 = vld [vmem:[#allocation16_spill] sm:$0xff] }
 0x2b5   :  { %v1520_v20 = vrot.slane %v1513_v61, %v9840_v21  ;;  %v11494_v61 = vld [vmem:[#allocation27_spill] sm:$0xff] }
 0x2b7   :  { %1521 = vrot.lane.b32.xlu1 %v1520_v20, %s9332_s2  ;;  %v11495_v20 = vld [vmem:[#allocation20_spill] sm:$0xff] }
 0x325   :  { %v1504_v24 = vpop.permute.xlu0 %1503 }
 0x329   :  { %v1522_v18 = vpop.permute.xlu1 %1521 }
 0x32a   :  { %v1525_v14 = vsel %vm1524_vm1, %v1504_v24, %v1522_v18  ;;  %v11496_v24 = vld [vmem:[#allocation29_spill] sm:$0xff]  ;;  %v11497_v18 = vld [vmem:[#allocation23_spill] sm:$0xff] }
 0x32b   :  { %v1527_v42 = vsel %vm636_vm2, %v1525_v14, 0  ;;  %v11498_v14 = vld [vmem:[#allocation31_spill] sm:$0xff] }
 0x32c   :  { %v9892_v0 = vand.u32 4294901760, %v1527_v42 }
 0x32e   :  { %v1611_v30 = vsub.f32 %v1527_v42, %v9892_v0  ;;  %1767 = vmatmul.mubr.f32.vlgmr.msra.gmra.mxu1 %v9892_v0  ;;  %v11499_v42 = vld [vmem:[#allocation25_spill] sm:$0xff] }
 0x32f   :  { %1897 = vmatpush1.msra.mxu1 %v9456_v43  ;;  %1958 = vmatprep.mubr.f32.mxu1 %v11472_v41 }
 0x330   :  { %v1612_v54 = vand.u32 4294901760, %v1611_v30  ;;  %1899 = vmatprep.subr.mxu1 %v9464_v46 }
 0x331   :  { %1901 = vmatpush1.msra.mxu1 %v9468_v48 }
 0x332   :  { %1903 = vmatprep.subr.mxu1 %v9479_v53  ;;  %v1613_v45 = vsub.f32 %v1611_v30, %v1612_v54 }
 0x333   :  { %1905 = vmatpush1.msra.mxu1 %v9483_v55 }
 0x334   :  { %1907 = vmatprep.subr.mxu1 %v9489_v58  ;;  %v1614_v1 = vand.u32 4294901760, %v1613_v45  ;;  %v11502_v45 = vld [vmem:[#allocation36_spill] sm:$0xff] }
 0x335   :  { %1909 = vmatpush1.msra.mxu1 %v9499_v62 }
 0x336   :  { %1911 = vmatprep.subr.mxu1 %v9509_v3  ;;  %1615 = vmatmul.mubr.f32.vlgmr.msra.gmra.mxu0 %v1614_v1  ;;  %v11503_v1 = vld [vmem:[#allocation30_spill] sm:$0xff] }
 0x337   :  { %1794 = vmatpush1.msra.mxu0 %v9472_v50  ;;  %1913 = vmatpush1.msra.mxu1 %v9520_v11 }
 0x338   :  { %1797 = vmatprep.subr.mxu0 %v9486_v56  ;;  %1915 = vmatprep.subr.mxu1 %v9531_v19 }
 0x339   :  { %1800 = vmatpush1.msra.mxu0 %v9492_v59  ;;  %1917 = vmatpush1.msra.mxu1 %v9540_v16 }
 0x33a   :  { %1803 = vmatprep.subr.mxu0 %v9507_v2  ;;  %1919 = vmatprep.subr.mxu1 %v9553_v26 }
 0x33b   :  { %1806 = vmatpush1.msra.mxu0 %v9518_v9  ;;  %1921 = vmatpush1.msra.mxu1 %v9566_v29 }
 0x33c   :  { %1809 = vmatprep.subr.mxu0 %v9529_v15  ;;  %1923 = vmatprep.subr.mxu1 %v9585_v6 }
 0x33d   :  { %1812 = vmatpush1.msra.mxu0 %v9538_v4  ;;  %1925 = vmatpush1.msra.mxu1 %v9597_v10 }
 0x33e   :  { %1815 = vmatprep.subr.mxu0 %v9551_v5  ;;  %1962 = vmatmul.mubr.f32.vlgmr.msra.gmra.mxu1 %v1612_v54  ;;  %v11501_v54 = vld [vmem:[#allocation28_spill] sm:$0xff] }
 0x33f   :  { %2105 = vmatprep.subr.mxu1 %v9454_v38  ;;  %1818 = vmatpush1.msra.mxu0 %v9564_v28 }
 0x340   :  { %2107 = vmatpush1.msra.mxu1 %v9456_v43  ;;  %1821 = vmatprep.subr.mxu0 %v9576_v32 }
 0x341   :  { %2109 = vmatprep.subr.mxu1 %v9464_v46  ;;  %1824 = vmatpush1.msra.mxu0 %v9588_v35 }
 0x342   :  { %2111 = vmatpush1.msra.mxu1 %v9468_v48  ;;  %1827 = vmatprep.subr.mxu0 %v9600_v39 }
 0x343   :  { %2113 = vmatprep.subr.mxu1 %v9479_v53  ;;  %1830 = vmatpush1.msra.mxu0 %v9612_v44 }
 0x344   :  { %2115 = vmatpush1.msra.mxu1 %v9483_v55  ;;  %1833 = vmatprep.subr.mxu0 %v9631_v60 }
 0x345   :  { %2117 = vmatprep.subr.mxu1 %v9489_v58  ;;  %1836 = vmatpush1.msra.mxu0 %v9643_v7 }
 0x346   :  { %1869 = vmatprep.mubr.f32.mxu0 %v11472_v41  ;;  %2119 = vmatpush1.msra.mxu1 %v9499_v62 }
 0x347   :  { %1872 = vmatmul.mubr.f32.vlgmr.msra.gmra.mxu0 %v1611_v30  ;;  %1987 = vmatprep.subr.mxu0 %v11482_v27  ;;  %v11500_v30 = vld [vmem:[#allocation34_spill] sm:$0xff] }
 0x348   :  { %2121 = vmatprep.subr.mxu1 %v9509_v3  ;;  %1991 = vmatpush1.msra.mxu0 %v11483_v51 }
 0x349   :  { %2123 = vmatpush1.msra.mxu1 %v9520_v11  ;;  %1995 = vmatprep.subr.mxu0 %v11484_v33 }
 0x34a   :  { %2125 = vmatprep.subr.mxu1 %v9531_v19  ;;  %1999 = vmatpush1.msra.mxu0 %v11485_v57 }
 0x34b   :  { %2127 = vmatpush1.msra.mxu1 %v9540_v16  ;;  %2003 = vmatprep.subr.mxu0 %v11486_v22 }
 0x34c   :  { %2129 = vmatprep.subr.mxu1 %v9553_v26  ;;  %2007 = vmatpush1.msra.mxu0 %v11487_v23 }
 0x34d   :  { %2131 = vmatpush1.msra.mxu1 %v9566_v29  ;;  %2011 = vmatprep.subr.mxu0 %v11488_v25 }
 0x34e   :  { %2133 = vmatprep.subr.mxu1 %v9585_v6  ;;  %2015 = vmatpush1.msra.mxu0 %v11489_v13 }
 0x34f   :  { %2135 = vmatpush1.msra.mxu1 %v9597_v10  ;;  %2168 = vmatprep.mubr.f32.mxu1 %v11472_v41 }
 0x350   :  { %2019 = vmatprep.subr.mxu0 %v11490_v31  ;;  %2170 = vmatmul.mubr.f32.vlgmr.msra.gmra.mxu1 %v9892_v0 }
 0x351   :  { %2023 = vmatpush1.msra.mxu0 %v11491_v52  ;;  %2080 = vmatprep.mubr.f32.mxu0 %v11472_v41 }
 0x352   :  { %2027 = vmatprep.subr.mxu0 %v11492_v40  ;;  %2529 = vmatprep.subr.mxu1 %v11493_v37 }
 0x353   :  { %2031 = vmatpush1.msra.mxu0 %v11494_v61  ;;  %2535 = vmatpush1.msra.mxu1 %v11495_v20 }
 0x354   :  { %2035 = vmatprep.subr.mxu0 %v11496_v24  ;;  %2541 = vmatprep.subr.mxu1 %v11497_v18 }
 0x355   :  { %2039 = vmatpush1.msra.mxu0 %v11498_v14  ;;  %2547 = vmatpush1.msra.mxu1 %v11499_v42 }
 0x356   :  { %2043 = vmatprep.subr.mxu0 %v11500_v30  ;;  %2553 = vmatprep.subr.mxu1 %v11501_v54  ;;  %v11508_v54 = vld [vmem:[#allocation38_spill] sm:$0xff] }
 0x357   :  { %2047 = vmatpush1.msra.mxu0 %v11502_v45  ;;  %2559 = vmatpush1.msra.mxu1 %v11503_v1  ;;  %v11509_v1 = vld [vmem:[#allocation39_spill] sm:$0xff] }
 0x358   :  { %2082 = vmatmul.mubr.f32.vlgmr.msra.gmra.mxu0 %v9892_v0  ;;  %2565 = vmatprep.subr.mxu1 %v11504_v8  ;;  %v11510_v0 = vld [vmem:[#allocation40_spill] sm:$0xff] }
 0x359   :  { %2571 = vmatpush1.msra.mxu1 %v11505_v34  ;;  %2433 = vmatprep.subr.mxu0 %v9454_v38  ;;  %v11511_v34 = vld [vmem:[#allocation41_spill] sm:$0xff] }
 0x35a   :  { %2577 = vmatprep.subr.mxu1 %v11506_v17  ;;  %2435 = vmatpush1.msra.mxu0 %v9456_v43  ;;  %v11512_v17 = vld [vmem:[#allocation42_spill] sm:$0xff] }
 0x35b   :  { %2583 = vmatpush1.msra.mxu1 %v11507_v36  ;;  %2437 = vmatprep.subr.mxu0 %v9464_v46  ;;  %v11513_v36 = vld [vmem:[#allocation43_spill] sm:$0xff] }
 0x35c   :  { %2589 = vmatprep.subr.mxu1 %v11508_v54  ;;  %2439 = vmatpush1.msra.mxu0 %v9468_v48 }
 0x35d   :  { %2595 = vmatpush1.msra.mxu1 %v11509_v1  ;;  %2441 = vmatprep.subr.mxu0 %v9479_v53 }
 0x35e   :  { %2601 = vmatprep.subr.mxu1 %v11510_v0  ;;  %2443 = vmatpush1.msra.mxu0 %v9483_v55 }
 0x35f   :  { %2607 = vmatpush1.msra.mxu1 %v11511_v34  ;;  %2445 = vmatprep.subr.mxu0 %v9489_v58 }
 0x360   :  { %2613 = vmatprep.subr.mxu1 %v11512_v17  ;;  %2447 = vmatpush1.msra.mxu0 %v9499_v62 }
 0x361   :  { %2619 = vmatpush1.msra.mxu1 %v11513_v36  ;;  %2449 = vmatprep.subr.mxu0 %v9509_v3  ;;  %v11514_v36 = vld [vmem:[#allocation11_spill] sm:$0xff] }
 0x362   :  { %2652 = vmatprep.mubr.f32.mxu1 %v11472_v41  ;;  %2782 = vmatprep.subr.mxu1 %v9454_v38 }
 0x363   :  { %2451 = vmatpush1.msra.mxu0 %v9520_v11  ;;  %2496 = vmatprep.mubr.f32.mxu0 %v11472_v41 }
 0x364   :  { %2453 = vmatprep.subr.mxu0 %v9531_v19 }
 0x365   :  { %2455 = vmatpush1.msra.mxu0 %v9540_v16 }
 0x366   :  { %2457 = vmatprep.subr.mxu0 %v9553_v26 }
 0x367   :  { %2459 = vmatpush1.msra.mxu0 %v9566_v29 }
 0x368   :  { %2461 = vmatprep.subr.mxu0 %v9585_v6 }
 0x369   :  { %2463 = vmatpush1.msra.mxu0 %v9597_v10 }
 0x36a   :  { %2678 = vmatprep.subr.mxu0 %v11514_v36 }
 0x3ee   :  { %v1768_v34 = vpop.f32.mrf.mxu1 }
 0x3f0   :  { %v1770_v54 = vpop.f32.mrf.mxu1 }
 0x3f6   :  { %v1616_v17 = vpop.f32.mrf.mxu0 }
 0x3f7   :  { %v1769_v8 = vadd.f32 %v1768_v34, %v1616_v17 }
 0x3f8   :  { %v1618_v0 = vpop.f32.mrf.mxu0 }
 0x3f9   :  { %v1771_v42 = vadd.f32 %v1770_v54, %v1618_v0 }
 0x3fe   :  { %v1963_v45 = vpop.f32.mrf.mxu1 }
 0x400   :  { %v1965_v24 = vpop.f32.mrf.mxu1 }
 0x407   :  { %v1873_v1 = vpop.f32.mrf.mxu0 }
 0x408   :  { %v1874_v14 = vadd.f32 %v1873_v1, %v1769_v8  ;;  %v1475_v8 = vld [vmem:[#allocation2 + $0x1] ss:$8 sm:$0x3] }
 0x409   :  { %v1875_v30 = vpop.f32.mrf.mxu0 }
 0x40a   :  { %v1876_v18 = vadd.f32 %v1875_v30, %v1771_v42  ;;  %v1964_v20 = vadd.f32 %v1963_v45, %v1874_v14  ;;  %v1479_v30 = vld [vmem:[#allocation2 + $0x6] ss:$8 sm:$0x3] }
 0x40c   :  { %v1966_v52 = vadd.f32 %v1965_v24, %v1876_v18 }
 0x410   :  { %v2171_v61 = vpop.f32.mrf.mxu1 }
 0x412   :  { %v2173_v25 = vpop.f32.mrf.mxu1 }
 0x418   :  { %v2083_v37 = vpop.f32.mrf.mxu0 }
 0x419   :  { %v2084_v40 = vadd.f32 %v2083_v37, %v1964_v20  ;;  %v1477_v37 = vld [vmem:[#allocation2 + $0x11] ss:$8 sm:$0x3]  ;;  %v1481_v20 = vld [vmem:[#allocation2 + $0x16] ss:$8 sm:$0x3] }
 0x41a   :  { %v2085_v31 = vpop.f32.mrf.mxu0 }
 0x41b   :  { %v2172_v13 = vadd.f32 %v2171_v61, %v2084_v40  ;;  %v2086_v36 = vadd.f32 %v2085_v31, %v1966_v52 }
 0x41d   :  { %v2183_v23 = vrot.slane %v2172_v13, %v9840_v21  ;;  %v2174_v22 = vadd.f32 %v2173_v25, %v2086_v36  ;;  %v1484_v36 = vrot.slane %v1479_v30, 1  ;;  %v1485_v25 = vrot.slane %v1481_v20, 1 }
 0x41f   :  { %v2184_v57 = vcombine.high %v2183_v23, %v2183_v23  ;;  %v2191_v34 = vrot.slane %v2183_v23, %v9840_v21  ;;  %v2210_v17 = vrot.slane %v2174_v22, %v9840_v21 }
 0x421   :  { %v2198_v42 = vrot.slane %v2184_v57, %v9840_v21  ;;  %v2201_v14 = vadd.f32 %v2191_v34, %v1475_v8  ;;  %v2211_v54 = vcombine.high %v2210_v17, %v2210_v17  ;;  %v2218_v40 = vrot.slane %v2210_v17, %v9840_v21 }
 0x423   :  { %v2202_v31 = vadd.f32 %v2198_v42, %v1477_v37  ;;  %9057 = vtanh.f32 %v2201_v14  ;;  %v2225_v13 = vrot.slane %v2211_v54, %v9840_v21  ;;  %v2228_v23 = vadd.f32 %v2218_v40, %v1484_v36 }
 0x424   :  { %v8782_v18 = vmul.f32 -1.442695, %v2201_v14 }
 0x425   :  { %9059 = vtanh.f32 %v2202_v31  ;;  %v2229_v52 = vadd.f32 %v2225_v13, %v1485_v25  ;;  %v8783_v45 = vmul.f32 -1.442695, %v2202_v31  ;;  %v8784_v1 = vmul.f32 -1.442695, %v2228_v23 }
 0x426   :  { %9061 = vtanh.f32 %v2228_v23 }
 0x427   :  { %9063 = vtanh.f32 %v2229_v52  ;;  %v8785_v0 = vmul.f32 -1.442695, %v2229_v52 }
 0x428   :  { %9065 = vpow2.f32 %v8782_v18 }
 0x429   :  { %9067 = vpow2.f32 %v8783_v45 }
 0x42a   :  { %9069 = vpow2.f32 %v8784_v1 }
 0x42b   :  { %9071 = vpow2.f32 %v8785_v0 }
 0x430   :  { %v9058_v22 = vpop.eup %9057 }
 0x431   :  { %2262 = vrot.lane.b32.xlu0 %v9058_v22, %s9332_s2 }
 0x432   :  { %v9060_v57 = vpop.eup %9059 }
 0x433   :  { %2264 = vrot.lane.b32.xlu1 %v9060_v57, %s9332_s2  ;;  %v9062_v61 = vpop.eup %9061 }
 0x434   :  { %v9064_v24 = vpop.eup %9063 }
 0x435   :  { %2296 = vrot.lane.b32.xlu0 %v9062_v61, %s9332_s2  ;;  %v9066_v34 = vpop.eup %9065 }
 0x436   :  { %v9068_v17 = vpop.eup %9067  ;;  %v2236_v8 = vadd.f32 1.0, %v9066_v34 }
 0x437   :  { %2298 = vrot.lane.b32.xlu1 %v9064_v24, %s9332_s2  ;;  %v2237_v42 = vadd.f32 1.0, %v9068_v17  ;;  %v9070_v30 = vpop.eup %9069 }
 0x438   :  { %9073 = vrcp.f32 %v2236_v8  ;;  %v9072_v54 = vpop.eup %9071  ;;  %v2250_v37 = vadd.f32 1.0, %v9070_v30 }
 0x439   :  { %9075 = vrcp.f32 %v2237_v42  ;;  %v2251_v20 = vadd.f32 1.0, %v9072_v54 }
 0x43a   :  { %9077 = vrcp.f32 %v2250_v37 }
 0x43b   :  { %9079 = vrcp.f32 %v2251_v20 }
 0x445   :  { %v9074_v14 = vpop.eup %9073 }
 0x446   :  { %v9076_v13 = vpop.eup %9075  ;;  %v2258_v18 = vmul.f32 %v9074_v14, %v9856_v49 }
 0x447   :  { %v9078_v23 = vpop.eup %9077  ;;  %v2259_v0 = vmul.f32 %v9076_v13, %v9859_v63 }
 0x448   :  { %v9080_v22 = vpop.eup %9079  ;;  %v2292_v8 = vmul.f32 %v9078_v23, %v9862_v12 }
 0x449   :  { %v2293_v30 = vmul.f32 %v9080_v22, %v9865_v47 }
 0x4a3   :  { %v2263_v40 = vpop.permute.xlu0 %2262 }
 0x4a4   :  { %v2268_v31 = vmul.f32 %v9074_v14, %v2263_v40 }
 0x4a5   :  { %v2265_v36 = vpop.permute.xlu1 %2264 }
 0x4a6   :  { %2272 = vrot.lane.b32.xlu0 %v2268_v31, %s9333_s16  ;;  %v2269_v25 = vmul.f32 %v9076_v13, %v2265_v36 }
 0x4a7   :  { %v2297_v52 = vpop.permute.xlu0 %2296 }
 0x4a8   :  { %2274 = vrot.lane.b32.xlu1 %v2269_v25, %s9333_s16  ;;  %v2302_v57 = vmul.f32 %v9078_v23, %v2297_v52 }
 0x4a9   :  { %v2299_v61 = vpop.permute.xlu1 %2298 }
 0x4aa   :  { %v2303_v24 = vmul.f32 %v9080_v22, %v2299_v61  ;;  %2306 = vrot.lane.b32.xlu0 %v2302_v57, %s9333_s16 }
 0x4ac   :  { %2308 = vrot.lane.b32.xlu1 %v2303_v24, %s9333_s16 }
 0x518   :  { %v2273_v45 = vpop.permute.xlu0 %2272 }
 0x519   :  { %v10015_v1 = vadd.f32 %v2273_v45, %v2258_v18 }
 0x51a   :  { %v2275_v34 = vpop.permute.xlu1 %2274 }
 0x51b   :  { %9081 = vtanh.f32 %v10015_v1  ;;  %v10019_v17 = vadd.f32 %v2275_v34, %v2259_v0 }
 0x51c   :  { %v2307_v42 = vpop.permute.xlu0 %2306 }
 0x51d   :  { %9083 = vtanh.f32 %v10019_v17  ;;  %v10024_v54 = vadd.f32 %v2307_v42, %v2292_v8 }
 0x51e   :  { %v2309_v49 = vpop.permute.xlu1 %2308 }
 0x51f   :  { %v10026_v37 = vadd.f32 %v2309_v49, %v2293_v30  ;;  %9085 = vtanh.f32 %v10024_v54 }
 0x521   :  { %9087 = vtanh.f32 %v10026_v37 }
 0x528   :  { %v9082_v63 = vpop.eup %9081 }
 0x529   :  { %2284 = vrot.lane.b32.xlu0 %v9082_v63, %s9332_s2 }
 0x52a   :  { %v9084_v20 = vpop.eup %9083 }
 0x52b   :  { %2286 = vrot.lane.b32.xlu1 %v9084_v20, %s9332_s2 }
 0x52c   :  { %v9086_v40 = vpop.eup %9085 }
 0x52d   :  { %2318 = vrot.lane.b32.xlu0 %v9086_v40, %s9332_s2 }
 0x52e   :  { %v9088_v12 = vpop.eup %9087 }
 0x52f   :  { %2320 = vrot.lane.b32.xlu1 %v9088_v12, %s9332_s2  ;;  %v11519_v12 = vld [vmem:[#allocation15_spill] sm:$0xff] }
 0x59b   :  { %v2285_v47 = vpop.permute.xlu0 %2284 }
 0x59c   :  { %v10034_v36 = vmul.f32 %v9074_v14, %v2285_v47  ;;  %v11520_v47 = vld [vmem:[#allocation17_spill] sm:$0xff] }
 0x59d   :  { %v2287_v31 = vpop.permute.xlu1 %2286 }
 0x59e   :  { %11515 = vst [vmem:[#allocation12_spill] sm:$0xff] %v10034_v36  ;;  %v10036_v25 = vmul.f32 %v9076_v13, %v2287_v31  ;;  %v11521_v31 = vld [vmem:[#allocation18_spill] sm:$0xff] }
 0x59f   :  { %v2319_v57 = vpop.permute.xlu0 %2318 }
 0x5a0   :  { %11516 = vst [vmem:[#allocation13_spill] sm:$0xff] %v10036_v25  ;;  %v2376_v52 = vcombine.low %v10034_v36, %v10036_v25  ;;  %v10041_v18 = vmul.f32 %v9078_v23, %v2319_v57  ;;  %v11523_v57 = vld [vmem:[#allocation21_spill] sm:$0xff]  ;;  %v11538_v25 = vld [vmem:[#allocation32_spill] sm:$0xff] }
 0x5a1   :  { %v2321_v24 = vpop.permute.xlu1 %2320  ;;  %v11539_v36 = vld [vmem:[#allocation33_spill] sm:$0xff] }
 0x5a2   :  { %v2383_v61 = vrot.slane %v2376_v52, %v9840_v21  ;;  %11517 = vst [vmem:[#allocation14_spill] sm:$0xff] %v10041_v18  ;;  %v10043_v45 = vmul.f32 %v9080_v22, %v2321_v24  ;;  %v11522_v52 = vld [vmem:[#allocation19_spill] sm:$0xff]  ;;  %v11525_v24 = vld [vmem:[#allocation24_spill] sm:$0xff] }
 0x5a4   :  { %11518 = vst [vmem:[#allocation49_spill] sm:$0xff] %v10043_v45  ;;  %v2390_v0 = vrot.slane %v2383_v61, %v9840_v21  ;;  %v2394_v34 = vcombine.low %v10041_v18, %v10043_v45  ;;  %v11524_v61 = vld [vmem:[#allocation22_spill] sm:$0xff]  ;;  %v11540_v45 = vld [vmem:[#allocation35_spill] sm:$0xff]  ;;  %v11541_v18 = vld [vmem:[#allocation37_spill] sm:$0xff] }
 0x5a6   :  { %2391 = vrot.lane.b32.xlu0 %v2390_v0, %s9333_s16  ;;  %v2401_v14 = vrot.slane %v2394_v34, %v9840_v21  ;;  %v11526_v0 = vld [vmem:[#allocation26_spill] sm:$0xff]  ;;  %v11527_v34 = vld [vmem:[#allocation16_spill] sm:$0xff] }
 0x5a8   :  { %v2408_v13 = vrot.slane %v2401_v14, %v9840_v21  ;;  %v11528_v14 = vld [vmem:[#allocation27_spill] sm:$0xff] }
 0x5aa   :  { %2409 = vrot.lane.b32.xlu1 %v2408_v13, %s9332_s2  ;;  %v11529_v13 = vld [vmem:[#allocation20_spill] sm:$0xff] }
 0x618   :  { %v2392_v8 = vpop.permute.xlu0 %2391 }
 0x61c   :  { %v2410_v42 = vpop.permute.xlu1 %2409 }
 0x61d   :  { %v2412_v23 = vsel %vm1524_vm1, %v2392_v8, %v2410_v42  ;;  %v11530_v8 = vld [vmem:[#allocation29_spill] sm:$0xff]  ;;  %v11531_v42 = vld [vmem:[#allocation23_spill] sm:$0xff] }
 0x61e   :  { %v2414_v22 = vsel %vm636_vm2, %v2412_v23, 0  ;;  %v11532_v23 = vld [vmem:[#allocation31_spill] sm:$0xff] }
 0x61f   :  { %v10054_v30 = vand.u32 4294901760, %v2414_v22 }
 0x621   :  { %v2498_v49 = vsub.f32 %v2414_v22, %v10054_v30  ;;  %2654 = vmatmul.mubr.f32.vlgmr.msra.gmra.mxu1 %v10054_v30  ;;  %v11533_v22 = vld [vmem:[#allocation25_spill] sm:$0xff] }
 0x622   :  { %2784 = vmatpush1.msra.mxu1 %v9456_v43  ;;  %2845 = vmatprep.mubr.f32.mxu1 %v11472_v41 }
 0x623   :  { %v2499_v63 = vand.u32 4294901760, %v2498_v49  ;;  %2786 = vmatprep.subr.mxu1 %v9464_v46 }
 0x624   :  { %2788 = vmatpush1.msra.mxu1 %v9468_v48 }
 0x625   :  { %2790 = vmatprep.subr.mxu1 %v9479_v53  ;;  %v2500_v20 = vsub.f32 %v2498_v49, %v2499_v63 }
 0x626   :  { %2792 = vmatpush1.msra.mxu1 %v9483_v55 }
 0x627   :  { %2794 = vmatprep.subr.mxu1 %v9489_v58  ;;  %v2501_v40 = vand.u32 4294901760, %v2500_v20  ;;  %v11536_v20 = vld [vmem:[#allocation36_spill] sm:$0xff] }
 0x628   :  { %2796 = vmatpush1.msra.mxu1 %v9499_v62 }
 0x629   :  { %2798 = vmatprep.subr.mxu1 %v9509_v3  ;;  %2502 = vmatmul.mubr.f32.vlgmr.msra.gmra.mxu0 %v2501_v40  ;;  %v11537_v40 = vld [vmem:[#allocation30_spill] sm:$0xff] }
 0x62a   :  { %2681 = vmatpush1.msra.mxu0 %v9472_v50  ;;  %2800 = vmatpush1.msra.mxu1 %v9520_v11 }
 0x62b   :  { %2684 = vmatprep.subr.mxu0 %v9486_v56  ;;  %2802 = vmatprep.subr.mxu1 %v9531_v19 }
 0x62c   :  { %2687 = vmatpush1.msra.mxu0 %v9492_v59  ;;  %2804 = vmatpush1.msra.mxu1 %v9540_v16 }
 0x62d   :  { %2690 = vmatprep.subr.mxu0 %v9507_v2  ;;  %2806 = vmatprep.subr.mxu1 %v9553_v26 }
 0x62e   :  { %2693 = vmatpush1.msra.mxu0 %v9518_v9  ;;  %2808 = vmatpush1.msra.mxu1 %v9566_v29 }
 0x62f   :  { %2696 = vmatprep.subr.mxu0 %v9529_v15  ;;  %2810 = vmatprep.subr.mxu1 %v9585_v6 }
 0x630   :  { %2699 = vmatpush1.msra.mxu0 %v9538_v4  ;;  %2812 = vmatpush1.msra.mxu1 %v9597_v10 }
 0x631   :  { %2702 = vmatprep.subr.mxu0 %v9551_v5  ;;  %2849 = vmatmul.mubr.f32.vlgmr.msra.gmra.mxu1 %v2499_v63  ;;  %v11535_v63 = vld [vmem:[#allocation28_spill] sm:$0xff] }
 0x632   :  { %2992 = vmatprep.subr.mxu1 %v9454_v38  ;;  %2705 = vmatpush1.msra.mxu0 %v9564_v28 }
 0x633   :  { %2994 = vmatpush1.msra.mxu1 %v9456_v43  ;;  %2708 = vmatprep.subr.mxu0 %v9576_v32 }
 0x634   :  { %2996 = vmatprep.subr.mxu1 %v9464_v46  ;;  %2711 = vmatpush1.msra.mxu0 %v9588_v35 }
 0x635   :  { %2998 = vmatpush1.msra.mxu1 %v9468_v48  ;;  %2714 = vmatprep.subr.mxu0 %v9600_v39 }
 0x636   :  { %3000 = vmatprep.subr.mxu1 %v9479_v53  ;;  %2717 = vmatpush1.msra.mxu0 %v9612_v44 }
 0x637   :  { %3002 = vmatpush1.msra.mxu1 %v9483_v55  ;;  %2720 = vmatprep.subr.mxu0 %v9631_v60 }
 0x638   :  { %3004 = vmatprep.subr.mxu1 %v9489_v58  ;;  %2723 = vmatpush1.msra.mxu0 %v9643_v7 }
 0x639   :  { %2756 = vmatprep.mubr.f32.mxu0 %v11472_v41  ;;  %3006 = vmatpush1.msra.mxu1 %v9499_v62 }
 0x63a   :  { %2759 = vmatmul.mubr.f32.vlgmr.msra.gmra.mxu0 %v2498_v49  ;;  %2874 = vmatprep.subr.mxu0 %v11482_v27  ;;  %v11534_v49 = vld [vmem:[#allocation34_spill] sm:$0xff] }
 0x63b   :  { %3008 = vmatprep.subr.mxu1 %v9509_v3  ;;  %2878 = vmatpush1.msra.mxu0 %v11483_v51 }
 0x63c   :  { %3010 = vmatpush1.msra.mxu1 %v9520_v11  ;;  %2882 = vmatprep.subr.mxu0 %v11484_v33 }
 0x63d   :  { %3012 = vmatprep.subr.mxu1 %v9531_v19  ;;  %2886 = vmatpush1.msra.mxu0 %v11519_v12 }
 0x63e   :  { %3014 = vmatpush1.msra.mxu1 %v9540_v16  ;;  %2890 = vmatprep.subr.mxu0 %v11520_v47 }
 0x63f   :  { %3016 = vmatprep.subr.mxu1 %v9553_v26  ;;  %2894 = vmatpush1.msra.mxu0 %v11521_v31 }
 0x640   :  { %3018 = vmatpush1.msra.mxu1 %v9566_v29  ;;  %2898 = vmatprep.subr.mxu0 %v11522_v52 }
 0x641   :  { %3020 = vmatprep.subr.mxu1 %v9585_v6  ;;  %2902 = vmatpush1.msra.mxu0 %v11523_v57 }
 0x642   :  { %3022 = vmatpush1.msra.mxu1 %v9597_v10  ;;  %3055 = vmatprep.mubr.f32.mxu1 %v11472_v41 }
 0x643   :  { %2906 = vmatprep.subr.mxu0 %v11524_v61  ;;  %3057 = vmatmul.mubr.f32.vlgmr.msra.gmra.mxu1 %v10054_v30 }
 0x644   :  { %2910 = vmatpush1.msra.mxu0 %v11525_v24  ;;  %2967 = vmatprep.mubr.f32.mxu0 %v11472_v41 }
 0x645   :  { %2914 = vmatprep.subr.mxu0 %v11526_v0  ;;  %3416 = vmatprep.subr.mxu1 %v11527_v34 }
 0x646   :  { %2918 = vmatpush1.msra.mxu0 %v11528_v14  ;;  %3422 = vmatpush1.msra.mxu1 %v11529_v13 }
 0x647   :  { %2922 = vmatprep.subr.mxu0 %v11530_v8  ;;  %3428 = vmatprep.subr.mxu1 %v11531_v42 }
 0x648   :  { %2926 = vmatpush1.msra.mxu0 %v11532_v23  ;;  %3434 = vmatpush1.msra.mxu1 %v11533_v22 }
 0x649   :  { %2930 = vmatprep.subr.mxu0 %v11534_v49  ;;  %3440 = vmatprep.subr.mxu1 %v11535_v63  ;;  %v11542_v63 = vld [vmem:[#allocation38_spill] sm:$0xff] }
 0x64a   :  { %2934 = vmatpush1.msra.mxu0 %v11536_v20  ;;  %3446 = vmatpush1.msra.mxu1 %v11537_v40  ;;  %v11543_v40 = vld [vmem:[#allocation39_spill] sm:$0xff] }
 0x64b   :  { %2969 = vmatmul.mubr.f32.vlgmr.msra.gmra.mxu0 %v10054_v30  ;;  %3452 = vmatprep.subr.mxu1 %v11538_v25  ;;  %v11544_v30 = vld [vmem:[#allocation40_spill] sm:$0xff] }
 0x64c   :  { %3458 = vmatpush1.msra.mxu1 %v11539_v36  ;;  %3320 = vmatprep.subr.mxu0 %v9454_v38  ;;  %v11545_v36 = vld [vmem:[#allocation41_spill] sm:$0xff] }
 0x64d   :  { %3464 = vmatprep.subr.mxu1 %v11540_v45  ;;  %3322 = vmatpush1.msra.mxu0 %v9456_v43  ;;  %v11546_v45 = vld [vmem:[#allocation42_spill] sm:$0xff] }
 0x64e   :  { %3470 = vmatpush1.msra.mxu1 %v11541_v18  ;;  %3324 = vmatprep.subr.mxu0 %v9464_v46  ;;  %v11547_v18 = vld [vmem:[#allocation43_spill] sm:$0xff] }
 0x64f   :  { %3476 = vmatprep.subr.mxu1 %v11542_v63  ;;  %3326 = vmatpush1.msra.mxu0 %v9468_v48 }
 0x650   :  { %3482 = vmatpush1.msra.mxu1 %v11543_v40  ;;  %3328 = vmatprep.subr.mxu0 %v9479_v53 }
 0x651   :  { %3488 = vmatprep.subr.mxu1 %v11544_v30  ;;  %3330 = vmatpush1.msra.mxu0 %v9483_v55 }
 0x652   :  { %3494 = vmatpush1.msra.mxu1 %v11545_v36  ;;  %3332 = vmatprep.subr.mxu0 %v9489_v58 }
 0x653   :  { %3500 = vmatprep.subr.mxu1 %v11546_v45  ;;  %3334 = vmatpush1.msra.mxu0 %v9499_v62 }
 0x654   :  { %3506 = vmatpush1.msra.mxu1 %v11547_v18  ;;  %3336 = vmatprep.subr.mxu0 %v9509_v3  ;;  %v11548_v18 = vld [vmem:[#allocation11_spill] sm:$0xff] }
 0x655   :  { %3539 = vmatprep.mubr.f32.mxu1 %v11472_v41  ;;  %3669 = vmatprep.subr.mxu1 %v9454_v38 }
 0x656   :  { %3338 = vmatpush1.msra.mxu0 %v9520_v11  ;;  %3383 = vmatprep.mubr.f32.mxu0 %v11472_v41 }
 0x657   :  { %3340 = vmatprep.subr.mxu0 %v9531_v19 }
 0x658   :  { %3342 = vmatpush1.msra.mxu0 %v9540_v16 }
 0x659   :  { %3344 = vmatprep.subr.mxu0 %v9553_v26 }
 0x65a   :  { %3346 = vmatpush1.msra.mxu0 %v9566_v29 }
 0x65b   :  { %3348 = vmatprep.subr.mxu0 %v9585_v6 }
 0x65c   :  { %3350 = vmatpush1.msra.mxu0 %v9597_v10 }
 0x65d   :  { %3565 = vmatprep.subr.mxu0 %v11548_v18 }
 0x6e1   :  { %v2655_v36 = vpop.f32.mrf.mxu1 }
 0x6e3   :  { %v2657_v63 = vpop.f32.mrf.mxu1 }
 0x6e9   :  { %v2503_v45 = vpop.f32.mrf.mxu0 }
 0x6ea   :  { %v2656_v25 = vadd.f32 %v2655_v36, %v2503_v45 }
 0x6eb   :  { %v2505_v30 = vpop.f32.mrf.mxu0 }
 0x6ec   :  { %v2658_v22 = vadd.f32 %v2657_v63, %v2505_v30 }
 0x6f1   :  { %v2850_v20 = vpop.f32.mrf.mxu1 }
 0x6f3   :  { %v2852_v8 = vpop.f32.mrf.mxu1 }
 0x6fa   :  { %v2760_v40 = vpop.f32.mrf.mxu0 }
 0x6fb   :  { %v2761_v23 = vadd.f32 %v2760_v40, %v2656_v25  ;;  %v2363_v25 = vld [vmem:[#allocation2 + $0x2] ss:$8 sm:$0x3] }
 0x6fc   :  { %v2762_v49 = vpop.f32.mrf.mxu0 }
 0x6fd   :  { %v2763_v42 = vadd.f32 %v2762_v49, %v2658_v22  ;;  %v2851_v13 = vadd.f32 %v2850_v20, %v2761_v23  ;;  %v2367_v49 = vld [vmem:[#allocation2 + $0x5] ss:$8 sm:$0x3] }
 0x6ff   :  { %v2853_v24 = vadd.f32 %v2852_v8, %v2763_v42 }
 0x703   :  { %v3058_v14 = vpop.f32.mrf.mxu1 }
 0x705   :  { %v3060_v52 = vpop.f32.mrf.mxu1 }
 0x70b   :  { %v2970_v34 = vpop.f32.mrf.mxu0 }
 0x70c   :  { %v2971_v0 = vadd.f32 %v2970_v34, %v2851_v13  ;;  %v2365_v34 = vld [vmem:[#allocation2 + $0x12] ss:$8 sm:$0x3]  ;;  %v2369_v13 = vld [vmem:[#allocation2 + $0x15] ss:$8 sm:$0x3] }
 0x70d   :  { %v2972_v61 = vpop.f32.mrf.mxu0 }
 0x70e   :  { %v3059_v57 = vadd.f32 %v3058_v14, %v2971_v0  ;;  %v2973_v18 = vadd.f32 %v2972_v61, %v2853_v24 }
 0x710   :  { %v3070_v31 = vrot.slane %v3059_v57, %v9840_v21  ;;  %v3061_v47 = vadd.f32 %v3060_v52, %v2973_v18  ;;  %v2372_v18 = vrot.slane %v2367_v49, 1  ;;  %v2373_v52 = vrot.slane %v2369_v13, 1 }
 0x712   :  { %v3071_v12 = vcombine.high %v3070_v31, %v3070_v31  ;;  %v3078_v36 = vrot.slane %v3070_v31, %v9840_v21  ;;  %v3097_v45 = vrot.slane %v3061_v47, %v9840_v21 }
 0x714   :  { %v3085_v22 = vrot.slane %v3071_v12, %v9840_v21  ;;  %v3088_v23 = vadd.f32 %v3078_v36, %v2363_v25  ;;  %v3098_v63 = vcombine.high %v3097_v45, %v3097_v45  ;;  %v3105_v0 = vrot.slane %v3097_v45, %v9840_v21 }
 0x716   :  { %v3089_v61 = vadd.f32 %v3085_v22, %v2365_v34  ;;  %9089 = vtanh.f32 %v3088_v23  ;;  %v3112_v57 = vrot.slane %v3098_v63, %v9840_v21  ;;  %v3115_v31 = vadd.f32 %v3105_v0, %v2372_v18 }
 0x717   :  { %v8786_v42 = vmul.f32 -1.442695, %v3088_v23 }
 0x718   :  { %9091 = vtanh.f32 %v3089_v61  ;;  %v3116_v24 = vadd.f32 %v3112_v57, %v2373_v52  ;;  %v8787_v20 = vmul.f32 -1.442695, %v3089_v61  ;;  %v8788_v40 = vmul.f32 -1.442695, %v3115_v31 }
 0x719   :  { %9093 = vtanh.f32 %v3115_v31 }
 0x71a   :  { %9095 = vtanh.f32 %v3116_v24  ;;  %v8789_v30 = vmul.f32 -1.442695, %v3116_v24 }
 0x71b   :  { %9097 = vpow2.f32 %v8786_v42 }
 0x71c   :  { %9099 = vpow2.f32 %v8787_v20 }
 0x71d   :  { %9101 = vpow2.f32 %v8788_v40 }
 0x71e   :  { %9103 = vpow2.f32 %v8789_v30 }
 0x723   :  { %v9090_v47 = vpop.eup %9089 }
 0x724   :  { %3149 = vrot.lane.b32.xlu0 %v9090_v47, %s9332_s2 }
 0x725   :  { %v9092_v12 = vpop.eup %9091 }
 0x726   :  { %3151 = vrot.lane.b32.xlu1 %v9092_v12, %s9332_s2  ;;  %v9094_v14 = vpop.eup %9093 }
 0x727   :  { %v9096_v8 = vpop.eup %9095 }
 0x728   :  { %3183 = vrot.lane.b32.xlu0 %v9094_v14, %s9332_s2  ;;  %v9098_v36 = vpop.eup %9097 }
 0x729   :  { %v9100_v45 = vpop.eup %9099  ;;  %v3123_v25 = vadd.f32 1.0, %v9098_v36 }
 0x72a   :  { %3185 = vrot.lane.b32.xlu1 %v9096_v8, %s9332_s2  ;;  %v3124_v22 = vadd.f32 1.0, %v9100_v45  ;;  %v9102_v49 = vpop.eup %9101 }
 0x72b   :  { %9105 = vrcp.f32 %v3123_v25  ;;  %v9104_v63 = vpop.eup %9103  ;;  %v3137_v34 = vadd.f32 1.0, %v9102_v49 }
 0x72c   :  { %9107 = vrcp.f32 %v3124_v22  ;;  %v3138_v13 = vadd.f32 1.0, %v9104_v63 }
 0x72d   :  { %9109 = vrcp.f32 %v3137_v34 }
 0x72e   :  { %9111 = vrcp.f32 %v3138_v13 }
 0x738   :  { %v9106_v23 = vpop.eup %9105 }
 0x739   :  { %v9108_v57 = vpop.eup %9107  ;;  %v3145_v42 = vmul.f32 %v9106_v23, %v10015_v1 }
 0x73a   :  { %v9110_v31 = vpop.eup %9109  ;;  %v3146_v30 = vmul.f32 %v9108_v57, %v10019_v17 }
 0x73b   :  { %v9112_v47 = vpop.eup %9111  ;;  %v3179_v25 = vmul.f32 %v9110_v31, %v10024_v54 }
 0x73c   :  { %v3180_v49 = vmul.f32 %v9112_v47, %v10026_v37 }
 0x796   :  { %v3150_v0 = vpop.permute.xlu0 %3149 }
 0x797   :  { %v3155_v61 = vmul.f32 %v9106_v23, %v3150_v0 }
 0x798   :  { %v3152_v18 = vpop.permute.xlu1 %3151 }
 0x799   :  { %3159 = vrot.lane.b32.xlu0 %v3155_v61, %s9333_s16  ;;  %v3156_v52 = vmul.f32 %v9108_v57, %v3152_v18 }
 0x79a   :  { %v3184_v24 = vpop.permute.xlu0 %3183 }
 0x79b   :  { %3161 = vrot.lane.b32.xlu1 %v3156_v52, %s9333_s16  ;;  %v3189_v12 = vmul.f32 %v9110_v31, %v3184_v24 }
 0x79c   :  { %v3186_v14 = vpop.permute.xlu1 %3185 }
 0x79d   :  { %v3190_v8 = vmul.f32 %v9112_v47, %v3186_v14  ;;  %3193 = vrot.lane.b32.xlu0 %v3189_v12, %s9333_s16 }
 0x79f   :  { %3195 = vrot.lane.b32.xlu1 %v3190_v8, %s9333_s16 }
 0x80b   :  { %v3160_v20 = vpop.permute.xlu0 %3159 }
 0x80c   :  { %v10177_v40 = vadd.f32 %v3160_v20, %v3145_v42 }
 0x80d   :  { %v3162_v36 = vpop.permute.xlu1 %3161 }
 0x80e   :  { %9113 = vtanh.f32 %v10177_v40  ;;  %v10181_v45 = vadd.f32 %v3162_v36, %v3146_v30 }
 0x80f   :  { %v3194_v22 = vpop.permute.xlu0 %3193 }
 0x810   :  { %9115 = vtanh.f32 %v10181_v45  ;;  %v10186_v63 = vadd.f32 %v3194_v22, %v3179_v25 }
 0x811   :  { %v3196_v1 = vpop.permute.xlu1 %3195 }
 0x812   :  { %v10188_v34 = vadd.f32 %v3196_v1, %v3180_v49  ;;  %9117 = vtanh.f32 %v10186_v63 }
 0x814   :  { %9119 = vtanh.f32 %v10188_v34 }
 0x81b   :  { %v9114_v17 = vpop.eup %9113 }
 0x81c   :  { %3171 = vrot.lane.b32.xlu0 %v9114_v17, %s9332_s2 }
 0x81d   :  { %v9116_v13 = vpop.eup %9115 }
 0x81e   :  { %3173 = vrot.lane.b32.xlu1 %v9116_v13, %s9332_s2 }
 0x81f   :  { %v9118_v0 = vpop.eup %9117 }
 0x820   :  { %3205 = vrot.lane.b32.xlu0 %v9118_v0, %s9332_s2 }
 0x821   :  { %v9120_v54 = vpop.eup %9119 }
 0x822   :  { %3207 = vrot.lane.b32.xlu1 %v9120_v54, %s9332_s2  ;;  %v11553_v54 = vld [vmem:[#allocation15_spill] sm:$0xff] }
 0x88e   :  { %v3172_v37 = vpop.permute.xlu0 %3171 }
 0x88f   :  { %v10196_v18 = vmul.f32 %v9106_v23, %v3172_v37  ;;  %v11554_v37 = vld [vmem:[#allocation17_spill] sm:$0xff] }
 0x890   :  { %v3174_v61 = vpop.permute.xlu1 %3173 }
 0x891   :  { %11549 = vst [vmem:[#allocation50_spill] sm:$0xff] %v10196_v18  ;;  %v10198_v52 = vmul.f32 %v9108_v57, %v3174_v61  ;;  %v11555_v61 = vld [vmem:[#allocation18_spill] sm:$0xff] }
 0x892   :  { %v3206_v12 = vpop.permute.xlu0 %3205 }
 0x893   :  { %11550 = vst [vmem:[#allocation51_spill] sm:$0xff] %v10198_v52  ;;  %v3263_v24 = vcombine.low %v10196_v18, %v10198_v52  ;;  %v10203_v42 = vmul.f32 %v9110_v31, %v3206_v12  ;;  %v11557_v12 = vld [vmem:[#allocation21_spill] sm:$0xff]  ;;  %v11572_v52 = vld [vmem:[#allocation32_spill] sm:$0xff] }
 0x894   :  { %v3208_v8 = vpop.permute.xlu1 %3207  ;;  %v11573_v18 = vld [vmem:[#allocation33_spill] sm:$0xff] }
 0x895   :  { %v3270_v14 = vrot.slane %v3263_v24, %v9840_v21  ;;  %11551 = vst [vmem:[#allocation52_spill] sm:$0xff] %v10203_v42  ;;  %v10205_v20 = vmul.f32 %v9112_v47, %v3208_v8  ;;  %v11556_v24 = vld [vmem:[#allocation19_spill] sm:$0xff]  ;;  %v11559_v8 = vld [vmem:[#allocation24_spill] sm:$0xff] }
 0x897   :  { %11552 = vst [vmem:[#allocation53_spill] sm:$0xff] %v10205_v20  ;;  %v3277_v30 = vrot.slane %v3270_v14, %v9840_v21  ;;  %v3281_v36 = vcombine.low %v10203_v42, %v10205_v20  ;;  %v11558_v14 = vld [vmem:[#allocation22_spill] sm:$0xff]  ;;  %v11574_v20 = vld [vmem:[#allocation35_spill] sm:$0xff]  ;;  %v11575_v42 = vld [vmem:[#allocation37_spill] sm:$0xff] }
 0x899   :  { %3278 = vrot.lane.b32.xlu0 %v3277_v30, %s9333_s16  ;;  %v3288_v23 = vrot.slane %v3281_v36, %v9840_v21  ;;  %v11560_v30 = vld [vmem:[#allocation26_spill] sm:$0xff]  ;;  %v11561_v36 = vld [vmem:[#allocation16_spill] sm:$0xff] }
 0x89b   :  { %v3295_v57 = vrot.slane %v3288_v23, %v9840_v21  ;;  %v11562_v23 = vld [vmem:[#allocation27_spill] sm:$0xff] }
 0x89d   :  { %3296 = vrot.lane.b32.xlu1 %v3295_v57, %s9332_s2  ;;  %v11563_v57 = vld [vmem:[#allocation20_spill] sm:$0xff] }
 0x90b   :  { %v3279_v25 = vpop.permute.xlu0 %3278 }
 0x90f   :  { %v3297_v22 = vpop.permute.xlu1 %3296 }
 0x910   :  { %v3299_v31 = vsel %vm1524_vm1, %v3279_v25, %v3297_v22  ;;  %v11564_v25 = vld [vmem:[#allocation29_spill] sm:$0xff]  ;;  %v11565_v22 = vld [vmem:[#allocation23_spill] sm:$0xff] }
 0x911   :  { %v3301_v47 = vsel %vm636_vm2, %v3299_v31, 0  ;;  %v11566_v31 = vld [vmem:[#allocation31_spill] sm:$0xff] }
 0x912   :  { %v10216_v49 = vand.u32 4294901760, %v3301_v47 }
 0x914   :  { %v3385_v1 = vsub.f32 %v3301_v47, %v10216_v49  ;;  %3541 = vmatmul.mubr.f32.vlgmr.msra.gmra.mxu1 %v10216_v49  ;;  %v11567_v47 = vld [vmem:[#allocation25_spill] sm:$0xff] }
 0x915   :  { %3671 = vmatpush1.msra.mxu1 %v9456_v43  ;;  %3732 = vmatprep.mubr.f32.mxu1 %v11472_v41 }
 0x916   :  { %v3386_v17 = vand.u32 4294901760, %v3385_v1  ;;  %3673 = vmatprep.subr.mxu1 %v9464_v46 }
 0x917   :  { %3675 = vmatpush1.msra.mxu1 %v9468_v48 }
 0x918   :  { %3677 = vmatprep.subr.mxu1 %v9479_v53  ;;  %v3387_v13 = vsub.f32 %v3385_v1, %v3386_v17 }
 0x919   :  { %3679 = vmatpush1.msra.mxu1 %v9483_v55 }
 0x91a   :  { %3681 = vmatprep.subr.mxu1 %v9489_v58  ;;  %v3388_v0 = vand.u32 4294901760, %v3387_v13  ;;  %v11570_v13 = vld [vmem:[#allocation36_spill] sm:$0xff] }
 0x91b   :  { %3683 = vmatpush1.msra.mxu1 %v9499_v62 }
 0x91c   :  { %3685 = vmatprep.subr.mxu1 %v9509_v3  ;;  %3389 = vmatmul.mubr.f32.vlgmr.msra.gmra.mxu0 %v3388_v0  ;;  %v11571_v0 = vld [vmem:[#allocation30_spill] sm:$0xff] }
 0x91d   :  { %3568 = vmatpush1.msra.mxu0 %v9472_v50  ;;  %3687 = vmatpush1.msra.mxu1 %v9520_v11 }
 0x91e   :  { %3571 = vmatprep.subr.mxu0 %v9486_v56  ;;  %3689 = vmatprep.subr.mxu1 %v9531_v19 }
 0x91f   :  { %3574 = vmatpush1.msra.mxu0 %v9492_v59  ;;  %3691 = vmatpush1.msra.mxu1 %v9540_v16 }
 0x920   :  { %3577 = vmatprep.subr.mxu0 %v9507_v2  ;;  %3693 = vmatprep.subr.mxu1 %v9553_v26 }
 0x921   :  { %3580 = vmatpush1.msra.mxu0 %v9518_v9  ;;  %3695 = vmatpush1.msra.mxu1 %v9566_v29 }
 0x922   :  { %3583 = vmatprep.subr.mxu0 %v9529_v15  ;;  %3697 = vmatprep.subr.mxu1 %v9585_v6 }
 0x923   :  { %3586 = vmatpush1.msra.mxu0 %v9538_v4  ;;  %3699 = vmatpush1.msra.mxu1 %v9597_v10 }
 0x924   :  { %3589 = vmatprep.subr.mxu0 %v9551_v5  ;;  %3736 = vmatmul.mubr.f32.vlgmr.msra.gmra.mxu1 %v3386_v17  ;;  %v11569_v17 = vld [vmem:[#allocation28_spill] sm:$0xff] }
 0x925   :  { %3879 = vmatprep.subr.mxu1 %v9454_v38  ;;  %3592 = vmatpush1.msra.mxu0 %v9564_v28 }
 0x926   :  { %3881 = vmatpush1.msra.mxu1 %v9456_v43  ;;  %3595 = vmatprep.subr.mxu0 %v9576_v32 }
 0x927   :  { %3883 = vmatprep.subr.mxu1 %v9464_v46  ;;  %3598 = vmatpush1.msra.mxu0 %v9588_v35 }
 0x928   :  { %3885 = vmatpush1.msra.mxu1 %v9468_v48  ;;  %3601 = vmatprep.subr.mxu0 %v9600_v39 }
 0x929   :  { %3887 = vmatprep.subr.mxu1 %v9479_v53  ;;  %3604 = vmatpush1.msra.mxu0 %v9612_v44 }
 0x92a   :  { %3889 = vmatpush1.msra.mxu1 %v9483_v55  ;;  %3607 = vmatprep.subr.mxu0 %v9631_v60 }
 0x92b   :  { %3891 = vmatprep.subr.mxu1 %v9489_v58  ;;  %3610 = vmatpush1.msra.mxu0 %v9643_v7 }
 0x92c   :  { %3643 = vmatprep.mubr.f32.mxu0 %v11472_v41  ;;  %3893 = vmatpush1.msra.mxu1 %v9499_v62 }
 0x92d   :  { %3646 = vmatmul.mubr.f32.vlgmr.msra.gmra.mxu0 %v3385_v1  ;;  %3761 = vmatprep.subr.mxu0 %v11482_v27  ;;  %v11568_v1 = vld [vmem:[#allocation34_spill] sm:$0xff] }
 0x92e   :  { %3895 = vmatprep.subr.mxu1 %v9509_v3  ;;  %3765 = vmatpush1.msra.mxu0 %v11483_v51 }
 0x92f   :  { %3897 = vmatpush1.msra.mxu1 %v9520_v11  ;;  %3769 = vmatprep.subr.mxu0 %v11484_v33 }
 0x930   :  { %3899 = vmatprep.subr.mxu1 %v9531_v19  ;;  %3773 = vmatpush1.msra.mxu0 %v11553_v54 }
 0x931   :  { %3901 = vmatpush1.msra.mxu1 %v9540_v16  ;;  %3777 = vmatprep.subr.mxu0 %v11554_v37 }
 0x932   :  { %3903 = vmatprep.subr.mxu1 %v9553_v26  ;;  %3781 = vmatpush1.msra.mxu0 %v11555_v61 }
 0x933   :  { %3905 = vmatpush1.msra.mxu1 %v9566_v29  ;;  %3785 = vmatprep.subr.mxu0 %v11556_v24 }
 0x934   :  { %3907 = vmatprep.subr.mxu1 %v9585_v6  ;;  %3789 = vmatpush1.msra.mxu0 %v11557_v12 }
 0x935   :  { %3909 = vmatpush1.msra.mxu1 %v9597_v10  ;;  %3942 = vmatprep.mubr.f32.mxu1 %v11472_v41 }
 0x936   :  { %3793 = vmatprep.subr.mxu0 %v11558_v14  ;;  %3944 = vmatmul.mubr.f32.vlgmr.msra.gmra.mxu1 %v10216_v49 }
 0x937   :  { %3797 = vmatpush1.msra.mxu0 %v11559_v8  ;;  %3854 = vmatprep.mubr.f32.mxu0 %v11472_v41 }
 0x938   :  { %3801 = vmatprep.subr.mxu0 %v11560_v30  ;;  %4299 = vmatprep.subr.mxu1 %v11561_v36 }
 0x939   :  { %3805 = vmatpush1.msra.mxu0 %v11562_v23  ;;  %4305 = vmatpush1.msra.mxu1 %v11563_v57 }
 0x93a   :  { %3809 = vmatprep.subr.mxu0 %v11564_v25  ;;  %4311 = vmatprep.subr.mxu1 %v11565_v22 }
 0x93b   :  { %3813 = vmatpush1.msra.mxu0 %v11566_v31  ;;  %4317 = vmatpush1.msra.mxu1 %v11567_v47 }
 0x93c   :  { %3817 = vmatprep.subr.mxu0 %v11568_v1  ;;  %4323 = vmatprep.subr.mxu1 %v11569_v17  ;;  %v11576_v17 = vld [vmem:[#allocation38_spill] sm:$0xff] }
 0x93d   :  { %3821 = vmatpush1.msra.mxu0 %v11570_v13  ;;  %4329 = vmatpush1.msra.mxu1 %v11571_v0  ;;  %v11577_v0 = vld [vmem:[#allocation39_spill] sm:$0xff] }
 0x93e   :  { %3856 = vmatmul.mubr.f32.vlgmr.msra.gmra.mxu0 %v10216_v49  ;;  %4335 = vmatprep.subr.mxu1 %v11572_v52  ;;  %v11578_v49 = vld [vmem:[#allocation40_spill] sm:$0xff] }
 0x93f   :  { %4341 = vmatpush1.msra.mxu1 %v11573_v18  ;;  %4203 = vmatprep.subr.mxu0 %v9454_v38  ;;  %v11579_v18 = vld [vmem:[#allocation41_spill] sm:$0xff] }
 0x940   :  { %4347 = vmatprep.subr.mxu1 %v11574_v20  ;;  %4205 = vmatpush1.msra.mxu0 %v9456_v43  ;;  %v11580_v20 = vld [vmem:[#allocation42_spill] sm:$0xff] }
 0x941   :  { %4353 = vmatpush1.msra.mxu1 %v11575_v42  ;;  %4207 = vmatprep.subr.mxu0 %v9464_v46  ;;  %v11581_v42 = vld [vmem:[#allocation43_spill] sm:$0xff] }
 0x942   :  { %4359 = vmatprep.subr.mxu1 %v11576_v17  ;;  %4209 = vmatpush1.msra.mxu0 %v9468_v48 }
 0x943   :  { %4365 = vmatpush1.msra.mxu1 %v11577_v0  ;;  %4211 = vmatprep.subr.mxu0 %v9479_v53 }
 0x944   :  { %4371 = vmatprep.subr.mxu1 %v11578_v49  ;;  %4213 = vmatpush1.msra.mxu0 %v9483_v55 }
 0x945   :  { %4377 = vmatpush1.msra.mxu1 %v11579_v18  ;;  %4215 = vmatprep.subr.mxu0 %v9489_v58 }
 0x946   :  { %4383 = vmatprep.subr.mxu1 %v11580_v20  ;;  %4217 = vmatpush1.msra.mxu0 %v9499_v62 }
 0x947   :  { %4389 = vmatpush1.msra.mxu1 %v11581_v42  ;;  %4219 = vmatprep.subr.mxu0 %v9509_v3  ;;  %v11582_v42 = vld [vmem:[#allocation11_spill] sm:$0xff] }
 0x948   :  { %4422 = vmatprep.mubr.f32.mxu1 %v11472_v41  ;;  %4552 = vmatprep.subr.mxu1 %v9454_v38 }
 0x949   :  { %4221 = vmatpush1.msra.mxu0 %v9520_v11  ;;  %4266 = vmatprep.mubr.f32.mxu0 %v11472_v41 }
 0x94a   :  { %4223 = vmatprep.subr.mxu0 %v9531_v19 }
 0x94b   :  { %4225 = vmatpush1.msra.mxu0 %v9540_v16 }
 0x94c   :  { %4227 = vmatprep.subr.mxu0 %v9553_v26 }
 0x94d   :  { %4229 = vmatpush1.msra.mxu0 %v9566_v29 }
 0x94e   :  { %4231 = vmatprep.subr.mxu0 %v9585_v6 }
 0x94f   :  { %4233 = vmatpush1.msra.mxu0 %v9597_v10 }
 0x950   :  { %4448 = vmatprep.subr.mxu0 %v11582_v42 }
 0x9d4   :  { %v3542_v18 = vpop.f32.mrf.mxu1 }
 0x9d6   :  { %v3544_v17 = vpop.f32.mrf.mxu1 }
 0x9dc   :  { %v3390_v20 = vpop.f32.mrf.mxu0 }
 0x9dd   :  { %v3543_v52 = vadd.f32 %v3542_v18, %v3390_v20 }
 0x9de   :  { %v3392_v49 = vpop.f32.mrf.mxu0 }
 0x9df   :  { %v3545_v47 = vadd.f32 %v3544_v17, %v3392_v49 }
 0x9e4   :  { %v3737_v13 = vpop.f32.mrf.mxu1 }
 0x9e6   :  { %v3739_v25 = vpop.f32.mrf.mxu1 }
 0x9ed   :  { %v3647_v0 = vpop.f32.mrf.mxu0 }
 0x9ee   :  { %v3648_v31 = vadd.f32 %v3647_v0, %v3543_v52  ;;  %v3250_v52 = vld [vmem:[#allocation2 + $0x3] ss:$8 sm:$0x3] }
 0x9ef   :  { %v3649_v1 = vpop.f32.mrf.mxu0 }
 0x9f0   :  { %v3650_v22 = vadd.f32 %v3649_v1, %v3545_v47  ;;  %v3738_v57 = vadd.f32 %v3737_v13, %v3648_v31  ;;  %v3254_v1 = vld [vmem:[#allocation2 + $0x4] ss:$8 sm:$0x3] }
 0x9f2   :  { %v3740_v8 = vadd.f32 %v3739_v25, %v3650_v22 }
 0x9f6   :  { %v3945_v23 = vpop.f32.mrf.mxu1 }
 0x9f8   :  { %v3947_v24 = vpop.f32.mrf.mxu1 }
 0x9fe   :  { %v3857_v36 = vpop.f32.mrf.mxu0 }
 0x9ff   :  { %v3858_v30 = vadd.f32 %v3857_v36, %v3738_v57  ;;  %v3252_v36 = vld [vmem:[#allocation2 + $0x13] ss:$8 sm:$0x3]  ;;  %v3256_v57 = vld [vmem:[#allocation2 + $0x14] ss:$8 sm:$0x3] }
 0xa00   :  { %v3859_v14 = vpop.f32.mrf.mxu0 }
 0xa01   :  { %v3946_v12 = vadd.f32 %v3945_v23, %v3858_v30  ;;  %v3860_v42 = vadd.f32 %v3859_v14, %v3740_v8 }
 0xa03   :  { %v3957_v61 = vrot.slane %v3946_v12, %v9840_v21  ;;  %v3948_v37 = vadd.f32 %v3947_v24, %v3860_v42  ;;  %v3259_v42 = vrot.slane %v3254_v1, 1  ;;  %v3260_v24 = vrot.slane %v3256_v57, 1 }
 0xa05   :  { %v3958_v54 = vcombine.high %v3957_v61, %v3957_v61  ;;  %v3965_v18 = vrot.slane %v3957_v61, %v9840_v21  ;;  %v3984_v20 = vrot.slane %v3948_v37, %v9840_v21 }
 0xa07   :  { %v3972_v47 = vrot.slane %v3958_v54, %v9840_v21  ;;  %v3975_v31 = vadd.f32 %v3965_v18, %v3250_v52  ;;  %v3985_v17 = vcombine.high %v3984_v20, %v3984_v20  ;;  %v3992_v30 = vrot.slane %v3984_v20, %v9840_v21 }
 0xa09   :  { %v3976_v14 = vadd.f32 %v3972_v47, %v3252_v36  ;;  %9121 = vtanh.f32 %v3975_v31  ;;  %v3999_v12 = vrot.slane %v3985_v17, %v9840_v21  ;;  %v4002_v61 = vadd.f32 %v3992_v30, %v3259_v42 }
 0xa0a   :  { %v8790_v22 = vmul.f32 -1.442695, %v3975_v31 }
 0xa0b   :  { %9123 = vtanh.f32 %v3976_v14  ;;  %v4003_v8 = vadd.f32 %v3999_v12, %v3260_v24  ;;  %v8791_v13 = vmul.f32 -1.442695, %v3976_v14  ;;  %v8792_v0 = vmul.f32 -1.442695, %v4002_v61 }
 0xa0c   :  { %9125 = vtanh.f32 %v4002_v61 }
 0xa0d   :  { %9127 = vtanh.f32 %v4003_v8  ;;  %v8793_v49 = vmul.f32 -1.442695, %v4003_v8 }
 0xa0e   :  { %9129 = vpow2.f32 %v8790_v22 }
 0xa0f   :  { %9131 = vpow2.f32 %v8791_v13 }
 0xa10   :  { %9133 = vpow2.f32 %v8792_v0 }
 0xa11   :  { %9135 = vpow2.f32 %v8793_v49 }
 0xa16   :  { %v9122_v37 = vpop.eup %9121 }
 0xa17   :  { %4036 = vrot.lane.b32.xlu0 %v9122_v37, %s9332_s2 }
 0xa18   :  { %v9124_v54 = vpop.eup %9123 }
 0xa19   :  { %4038 = vrot.lane.b32.xlu1 %v9124_v54, %s9332_s2  ;;  %v9126_v23 = vpop.eup %9125 }
 0xa1a   :  { %v9128_v25 = vpop.eup %9127 }
 0xa1b   :  { %4070 = vrot.lane.b32.xlu0 %v9126_v23, %s9332_s2  ;;  %v9130_v18 = vpop.eup %9129 }
 0xa1c   :  { %v9132_v20 = vpop.eup %9131  ;;  %v4010_v52 = vadd.f32 1.0, %v9130_v18 }
 0xa1d   :  { %4072 = vrot.lane.b32.xlu1 %v9128_v25, %s9332_s2  ;;  %v4011_v47 = vadd.f32 1.0, %v9132_v20  ;;  %v9134_v1 = vpop.eup %9133 }
 0xa1e   :  { %9137 = vrcp.f32 %v4010_v52  ;;  %v9136_v17 = vpop.eup %9135  ;;  %v4024_v36 = vadd.f32 1.0, %v9134_v1 }
 0xa1f   :  { %9139 = vrcp.f32 %v4011_v47  ;;  %v4025_v57 = vadd.f32 1.0, %v9136_v17 }
 0xa20   :  { %9141 = vrcp.f32 %v4024_v36 }
 0xa21   :  { %9143 = vrcp.f32 %v4025_v57 }
 0xa2b   :  { %v9138_v31 = vpop.eup %9137 }
 0xa2c   :  { %v9140_v12 = vpop.eup %9139  ;;  %v4032_v22 = vmul.f32 %v9138_v31, %v10177_v40 }
 0xa2d   :  { %v9142_v61 = vpop.eup %9141  ;;  %v4033_v49 = vmul.f32 %v9140_v12, %v10181_v45 }
 0xa2e   :  { %v9144_v37 = vpop.eup %9143  ;;  %v4066_v52 = vmul.f32 %v9142_v61, %v10186_v63 }
 0xa2f   :  { %v4067_v1 = vmul.f32 %v9144_v37, %v10188_v34 }
 0xa89   :  { %v4037_v30 = vpop.permute.xlu0 %4036 }
 0xa8a   :  { %v4042_v14 = vmul.f32 %v9138_v31, %v4037_v30 }
 0xa8b   :  { %v4039_v42 = vpop.permute.xlu1 %4038 }
 0xa8c   :  { %4046 = vrot.lane.b32.xlu0 %v4042_v14, %s9333_s16  ;;  %v4043_v24 = vmul.f32 %v9140_v12, %v4039_v42 }
 0xa8d   :  { %v4071_v8 = vpop.permute.xlu0 %4070 }
 0xa8e   :  { %4048 = vrot.lane.b32.xlu1 %v4043_v24, %s9333_s16  ;;  %v4076_v54 = vmul.f32 %v9142_v61, %v4071_v8 }
 0xa8f   :  { %v4073_v23 = vpop.permute.xlu1 %4072 }
 0xa90   :  { %v4077_v25 = vmul.f32 %v9144_v37, %v4073_v23  ;;  %4080 = vrot.lane.b32.xlu0 %v4076_v54, %s9333_s16 }
 0xa92   :  { %4082 = vrot.lane.b32.xlu1 %v4077_v25, %s9333_s16 }
 0xafe   :  { %v4047_v13 = vpop.permute.xlu0 %4046 }
 0xaff   :  { %v10339_v0 = vadd.f32 %v4047_v13, %v4032_v22 }
 0xb00   :  { %v4049_v18 = vpop.permute.xlu1 %4048 }
 0xb01   :  { %9145 = vtanh.f32 %v10339_v0  ;;  %v10343_v20 = vadd.f32 %v4049_v18, %v4033_v49 }
 0xb02   :  { %v4081_v47 = vpop.permute.xlu0 %4080 }
 0xb03   :  { %9147 = vtanh.f32 %v10343_v20  ;;  %v10348_v17 = vadd.f32 %v4081_v47, %v4066_v52 }
 0xb04   :  { %v4083_v40 = vpop.permute.xlu1 %4082 }
 0xb05   :  { %v10350_v36 = vadd.f32 %v4083_v40, %v4067_v1  ;;  %9149 = vtanh.f32 %v10348_v17 }
 0xb07   :  { %9151 = vtanh.f32 %v10350_v36 }
 0xb0e   :  { %v9146_v45 = vpop.eup %9145 }
 0xb0f   :  { %4058 = vrot.lane.b32.xlu0 %v9146_v45, %s9332_s2 }
 0xb10   :  { %v9148_v57 = vpop.eup %9147 }
 0xb11   :  { %4060 = vrot.lane.b32.xlu1 %v9148_v57, %s9332_s2 }
 0xb12   :  { %v9150_v30 = vpop.eup %9149 }
 0xb13   :  { %4092 = vrot.lane.b32.xlu0 %v9150_v30, %s9332_s2 }
 0xb14   :  { %v9152_v63 = vpop.eup %9151 }
 0xb15   :  { %4094 = vrot.lane.b32.xlu1 %v9152_v63, %s9332_s2  ;;  %v11587_v63 = vld [vmem:[#allocation15_spill] sm:$0xff] }
 0xb81   :  { %v4059_v34 = vpop.permute.xlu0 %4058 }
 0xb82   :  { %v10358_v42 = vmul.f32 %v9138_v31, %v4059_v34  ;;  %v11588_v34 = vld [vmem:[#allocation17_spill] sm:$0xff] }
 0xb83   :  { %v4061_v14 = vpop.permute.xlu1 %4060 }
 0xb84   :  { %11583 = vst [vmem:[#allocation54_spill] sm:$0xff] %v10358_v42  ;;  %v10360_v24 = vmul.f32 %v9140_v12, %v4061_v14  ;;  %v11589_v14 = vld [vmem:[#allocation18_spill] sm:$0xff] }
 0xb85   :  { %v4093_v54 = vpop.permute.xlu0 %4092 }
 0xb86   :  { %11584 = vst [vmem:[#allocation55_spill] sm:$0xff] %v10360_v24  ;;  %v4146_v8 = vcombine.low %v10358_v42, %v10360_v24  ;;  %v10365_v22 = vmul.f32 %v9142_v61, %v4093_v54  ;;  %v11591_v54 = vld [vmem:[#allocation21_spill] sm:$0xff]  ;;  %v11606_v24 = vld [vmem:[#allocation32_spill] sm:$0xff] }
 0xb87   :  { %v4095_v25 = vpop.permute.xlu1 %4094  ;;  %v11607_v42 = vld [vmem:[#allocation33_spill] sm:$0xff] }
 0xb88   :  { %v4153_v23 = vrot.slane %v4146_v8, %v9840_v21  ;;  %11585 = vst [vmem:[#allocation56_spill] sm:$0xff] %v10365_v22  ;;  %v10367_v13 = vmul.f32 %v9144_v37, %v4095_v25  ;;  %v11590_v8 = vld [vmem:[#allocation19_spill] sm:$0xff]  ;;  %v11593_v25 = vld [vmem:[#allocation24_spill] sm:$0xff] }
 0xb8a   :  { %11586 = vst [vmem:[#allocation57_spill] sm:$0xff] %v10367_v13  ;;  %v4160_v49 = vrot.slane %v4153_v23, %v9840_v21  ;;  %v4164_v18 = vcombine.low %v10365_v22, %v10367_v13  ;;  %v11592_v23 = vld [vmem:[#allocation22_spill] sm:$0xff]  ;;  %v11608_v13 = vld [vmem:[#allocation35_spill] sm:$0xff]  ;;  %v11609_v22 = vld [vmem:[#allocation37_spill] sm:$0xff] }
 0xb8c   :  { %4161 = vrot.lane.b32.xlu0 %v4160_v49, %s9333_s16  ;;  %v4171_v31 = vrot.slane %v4164_v18, %v9840_v21  ;;  %v11594_v49 = vld [vmem:[#allocation26_spill] sm:$0xff]  ;;  %v11595_v18 = vld [vmem:[#allocation16_spill] sm:$0xff] }
 0xb8e   :  { %v4178_v12 = vrot.slane %v4171_v31, %v9840_v21  ;;  %v11596_v31 = vld [vmem:[#allocation27_spill] sm:$0xff] }
 0xb90   :  { %4179 = vrot.lane.b32.xlu1 %v4178_v12, %s9332_s2  ;;  %v11597_v12 = vld [vmem:[#allocation20_spill] sm:$0xff] }
 0xbfe   :  { %v4162_v52 = vpop.permute.xlu0 %4161 }
 0xc02   :  { %v4180_v47 = vpop.permute.xlu1 %4179 }
 0xc03   :  { %v4182_v61 = vsel %vm1524_vm1, %v4162_v52, %v4180_v47  ;;  %v11598_v52 = vld [vmem:[#allocation29_spill] sm:$0xff]  ;;  %v11599_v47 = vld [vmem:[#allocation23_spill] sm:$0xff] }
 0xc04   :  { %v4184_v37 = vsel %vm636_vm2, %v4182_v61, 0  ;;  %v11600_v61 = vld [vmem:[#allocation31_spill] sm:$0xff] }
 0xc05   :  { %v10378_v1 = vand.u32 4294901760, %v4184_v37 }
 0xc07   :  { %v4268_v40 = vsub.f32 %v4184_v37, %v10378_v1  ;;  %4424 = vmatmul.mubr.f32.vlgmr.msra.gmra.mxu1 %v10378_v1  ;;  %v11601_v37 = vld [vmem:[#allocation25_spill] sm:$0xff] }
 0xc08   :  { %4554 = vmatpush1.msra.mxu1 %v9456_v43  ;;  %4615 = vmatprep.mubr.f32.mxu1 %v11472_v41 }
 0xc09   :  { %v4269_v45 = vand.u32 4294901760, %v4268_v40  ;;  %4556 = vmatprep.subr.mxu1 %v9464_v46 }
 0xc0a   :  { %4558 = vmatpush1.msra.mxu1 %v9468_v48 }
 0xc0b   :  { %4560 = vmatprep.subr.mxu1 %v9479_v53  ;;  %v4270_v57 = vsub.f32 %v4268_v40, %v4269_v45 }
 0xc0c   :  { %4562 = vmatpush1.msra.mxu1 %v9483_v55 }
 0xc0d   :  { %4564 = vmatprep.subr.mxu1 %v9489_v58  ;;  %v4271_v30 = vand.u32 4294901760, %v4270_v57  ;;  %v11604_v57 = vld [vmem:[#allocation36_spill] sm:$0xff] }
 0xc0e   :  { %4566 = vmatpush1.msra.mxu1 %v9499_v62 }
 0xc0f   :  { %4568 = vmatprep.subr.mxu1 %v9509_v3  ;;  %4272 = vmatmul.mubr.f32.vlgmr.msra.gmra.mxu0 %v4271_v30  ;;  %v11605_v30 = vld [vmem:[#allocation30_spill] sm:$0xff] }
 0xc10   :  { %4451 = vmatpush1.msra.mxu0 %v9472_v50  ;;  %4570 = vmatpush1.msra.mxu1 %v9520_v11 }
 0xc11   :  { %4454 = vmatprep.subr.mxu0 %v9486_v56  ;;  %4572 = vmatprep.subr.mxu1 %v9531_v19 }
 0xc12   :  { %4457 = vmatpush1.msra.mxu0 %v9492_v59  ;;  %4574 = vmatpush1.msra.mxu1 %v9540_v16 }
 0xc13   :  { %4460 = vmatprep.subr.mxu0 %v9507_v2  ;;  %4576 = vmatprep.subr.mxu1 %v9553_v26 }
 0xc14   :  { %4463 = vmatpush1.msra.mxu0 %v9518_v9  ;;  %4578 = vmatpush1.msra.mxu1 %v9566_v29 }
 0xc15   :  { %4466 = vmatprep.subr.mxu0 %v9529_v15  ;;  %4580 = vmatprep.subr.mxu1 %v9585_v6 }
 0xc16   :  { %4469 = vmatpush1.msra.mxu0 %v9538_v4  ;;  %4582 = vmatpush1.msra.mxu1 %v9597_v10 }
 0xc17   :  { %4472 = vmatprep.subr.mxu0 %v9551_v5  ;;  %4619 = vmatmul.mubr.f32.vlgmr.msra.gmra.mxu1 %v4269_v45  ;;  %v11603_v45 = vld [vmem:[#allocation28_spill] sm:$0xff] }
 0xc18   :  { %4762 = vmatprep.subr.mxu1 %v9454_v38  ;;  %4475 = vmatpush1.msra.mxu0 %v9564_v28 }
 0xc19   :  { %4764 = vmatpush1.msra.mxu1 %v9456_v43  ;;  %4478 = vmatprep.subr.mxu0 %v9576_v32 }
 0xc1a   :  { %4766 = vmatprep.subr.mxu1 %v9464_v46  ;;  %4481 = vmatpush1.msra.mxu0 %v9588_v35 }
 0xc1b   :  { %4768 = vmatpush1.msra.mxu1 %v9468_v48  ;;  %4484 = vmatprep.subr.mxu0 %v9600_v39 }
 0xc1c   :  { %4770 = vmatprep.subr.mxu1 %v9479_v53  ;;  %4487 = vmatpush1.msra.mxu0 %v9612_v44 }
 0xc1d   :  { %4772 = vmatpush1.msra.mxu1 %v9483_v55  ;;  %4490 = vmatprep.subr.mxu0 %v9631_v60 }
 0xc1e   :  { %4774 = vmatprep.subr.mxu1 %v9489_v58  ;;  %4493 = vmatpush1.msra.mxu0 %v9643_v7 }
 0xc1f   :  { %4526 = vmatprep.mubr.f32.mxu0 %v11472_v41  ;;  %4776 = vmatpush1.msra.mxu1 %v9499_v62 }
 0xc20   :  { %4529 = vmatmul.mubr.f32.vlgmr.msra.gmra.mxu0 %v4268_v40  ;;  %4644 = vmatprep.subr.mxu0 %v11482_v27  ;;  %v11602_v40 = vld [vmem:[#allocation34_spill] sm:$0xff] }
 0xc21   :  { %4778 = vmatprep.subr.mxu1 %v9509_v3  ;;  %4648 = vmatpush1.msra.mxu0 %v11483_v51 }
 0xc22   :  { %4780 = vmatpush1.msra.mxu1 %v9520_v11  ;;  %4652 = vmatprep.subr.mxu0 %v11484_v33 }
 0xc23   :  { %4782 = vmatprep.subr.mxu1 %v9531_v19  ;;  %4656 = vmatpush1.msra.mxu0 %v11587_v63 }
 0xc24   :  { %4784 = vmatpush1.msra.mxu1 %v9540_v16  ;;  %4660 = vmatprep.subr.mxu0 %v11588_v34 }
 0xc25   :  { %4786 = vmatprep.subr.mxu1 %v9553_v26  ;;  %4664 = vmatpush1.msra.mxu0 %v11589_v14 }
 0xc26   :  { %4788 = vmatpush1.msra.mxu1 %v9566_v29  ;;  %4668 = vmatprep.subr.mxu0 %v11590_v8 }
 0xc27   :  { %4790 = vmatprep.subr.mxu1 %v9585_v6  ;;  %4672 = vmatpush1.msra.mxu0 %v11591_v54 }
 0xc28   :  { %4792 = vmatpush1.msra.mxu1 %v9597_v10  ;;  %4825 = vmatprep.mubr.f32.mxu1 %v11472_v41 }
 0xc29   :  { %4676 = vmatprep.subr.mxu0 %v11592_v23  ;;  %4827 = vmatmul.mubr.f32.vlgmr.msra.gmra.mxu1 %v10378_v1 }
 0xc2a   :  { %4680 = vmatpush1.msra.mxu0 %v11593_v25  ;;  %4737 = vmatprep.mubr.f32.mxu0 %v11472_v41 }
 0xc2b   :  { %4684 = vmatprep.subr.mxu0 %v11594_v49  ;;  %5182 = vmatprep.subr.mxu1 %v11595_v18 }
 0xc2c   :  { %4688 = vmatpush1.msra.mxu0 %v11596_v31  ;;  %5188 = vmatpush1.msra.mxu1 %v11597_v12 }
 0xc2d   :  { %4692 = vmatprep.subr.mxu0 %v11598_v52  ;;  %5194 = vmatprep.subr.mxu1 %v11599_v47 }
 0xc2e   :  { %4696 = vmatpush1.msra.mxu0 %v11600_v61  ;;  %5200 = vmatpush1.msra.mxu1 %v11601_v37 }
 0xc2f   :  { %4700 = vmatprep.subr.mxu0 %v11602_v40  ;;  %5206 = vmatprep.subr.mxu1 %v11603_v45  ;;  %v11610_v45 = vld [vmem:[#allocation38_spill] sm:$0xff] }
 0xc30   :  { %4704 = vmatpush1.msra.mxu0 %v11604_v57  ;;  %5212 = vmatpush1.msra.mxu1 %v11605_v30  ;;  %v11611_v30 = vld [vmem:[#allocation39_spill] sm:$0xff] }
 0xc31   :  { %4739 = vmatmul.mubr.f32.vlgmr.msra.gmra.mxu0 %v10378_v1  ;;  %5218 = vmatprep.subr.mxu1 %v11606_v24  ;;  %v11612_v1 = vld [vmem:[#allocation40_spill] sm:$0xff] }
 0xc32   :  { %5224 = vmatpush1.msra.mxu1 %v11607_v42  ;;  %5086 = vmatprep.subr.mxu0 %v9454_v38  ;;  %v11613_v42 = vld [vmem:[#allocation41_spill] sm:$0xff] }
 0xc33   :  { %5230 = vmatprep.subr.mxu1 %v11608_v13  ;;  %5088 = vmatpush1.msra.mxu0 %v9456_v43  ;;  %v11614_v13 = vld [vmem:[#allocation42_spill] sm:$0xff] }
 0xc34   :  { %5236 = vmatpush1.msra.mxu1 %v11609_v22  ;;  %5090 = vmatprep.subr.mxu0 %v9464_v46  ;;  %v11615_v22 = vld [vmem:[#allocation43_spill] sm:$0xff] }
 0xc35   :  { %5242 = vmatprep.subr.mxu1 %v11610_v45  ;;  %5092 = vmatpush1.msra.mxu0 %v9468_v48 }
 0xc36   :  { %5248 = vmatpush1.msra.mxu1 %v11611_v30  ;;  %5094 = vmatprep.subr.mxu0 %v9479_v53 }
 0xc37   :  { %5254 = vmatprep.subr.mxu1 %v11612_v1  ;;  %5096 = vmatpush1.msra.mxu0 %v9483_v55 }
 0xc38   :  { %5260 = vmatpush1.msra.mxu1 %v11613_v42  ;;  %5098 = vmatprep.subr.mxu0 %v9489_v58 }
 0xc39   :  { %5266 = vmatprep.subr.mxu1 %v11614_v13  ;;  %5100 = vmatpush1.msra.mxu0 %v9499_v62 }
 0xc3a   :  { %5272 = vmatpush1.msra.mxu1 %v11615_v22  ;;  %5102 = vmatprep.subr.mxu0 %v9509_v3  ;;  %v11616_v22 = vld [vmem:[#allocation11_spill] sm:$0xff] }
 0xc3b   :  { %5305 = vmatprep.mubr.f32.mxu1 %v11472_v41  ;;  %5435 = vmatprep.subr.mxu1 %v9454_v38 }
 0xc3c   :  { %5104 = vmatpush1.msra.mxu0 %v9520_v11  ;;  %5149 = vmatprep.mubr.f32.mxu0 %v11472_v41 }
 0xc3d   :  { %5106 = vmatprep.subr.mxu0 %v9531_v19 }
 0xc3e   :  { %5108 = vmatpush1.msra.mxu0 %v9540_v16 }
 0xc3f   :  { %5110 = vmatprep.subr.mxu0 %v9553_v26 }
 0xc40   :  { %5112 = vmatpush1.msra.mxu0 %v9566_v29 }
 0xc41   :  { %5114 = vmatprep.subr.mxu0 %v9585_v6 }
 0xc42   :  { %5116 = vmatpush1.msra.mxu0 %v9597_v10 }
 0xc43   :  { %5331 = vmatprep.subr.mxu0 %v11616_v22 }
 0xcc7   :  { %v4425_v42 = vpop.f32.mrf.mxu1 }
 0xcc9   :  { %v4427_v45 = vpop.f32.mrf.mxu1 }
 0xccf   :  { %v4273_v13 = vpop.f32.mrf.mxu0 }
 0xcd0   :  { %v4426_v24 = vadd.f32 %v4425_v42, %v4273_v13 }
 0xcd1   :  { %v4275_v1 = vpop.f32.mrf.mxu0 }
 0xcd2   :  { %v4428_v37 = vadd.f32 %v4427_v45, %v4275_v1 }
 0xcd7   :  { %v4620_v57 = vpop.f32.mrf.mxu1 }
 0xcd9   :  { %v4622_v52 = vpop.f32.mrf.mxu1 }
 0xce0   :  { %v4530_v30 = vpop.f32.mrf.mxu0 }
 0xce1   :  { %v4531_v61 = vadd.f32 %v4530_v30, %v4426_v24  ;;  %v4136_v24 = vld [vmem:[#allocation2 + $0x4] ss:$8 sm:$0x3] }
 0xce2   :  { %v4532_v40 = vpop.f32.mrf.mxu0 }
 0xce3   :  { %v4533_v47 = vadd.f32 %v4532_v40, %v4428_v37  ;;  %v4621_v12 = vadd.f32 %v4620_v57, %v4531_v61  ;;  %v4138_v40 = vld [vmem:[#allocation2 + $0x3] ss:$8 sm:$0x3] }
 0xce5   :  { %v4623_v25 = vadd.f32 %v4622_v52, %v4533_v47 }
 0xce9   :  { %v4828_v31 = vpop.f32.mrf.mxu1 }
 0xceb   :  { %v4830_v8 = vpop.f32.mrf.mxu1 }
 0xcf1   :  { %v4740_v18 = vpop.f32.mrf.mxu0 }
 0xcf2   :  { %v4741_v49 = vadd.f32 %v4740_v18, %v4621_v12  ;;  %v4137_v18 = vld [vmem:[#allocation2 + $0x14] ss:$8 sm:$0x3]  ;;  %v4139_v12 = vld [vmem:[#allocation2 + $0x13] ss:$8 sm:$0x3] }
 0xcf3   :  { %v4742_v23 = vpop.f32.mrf.mxu0 }
 0xcf4   :  { %v4829_v54 = vadd.f32 %v4828_v31, %v4741_v49  ;;  %v4743_v22 = vadd.f32 %v4742_v23, %v4623_v25 }
 0xcf6   :  { %v4840_v14 = vrot.slane %v4829_v54, %v9840_v21  ;;  %v4831_v34 = vadd.f32 %v4830_v8, %v4743_v22  ;;  %v4142_v22 = vrot.slane %v4138_v40, 1  ;;  %v4143_v8 = vrot.slane %v4139_v12, 1 }
 0xcf8   :  { %v4841_v63 = vcombine.high %v4840_v14, %v4840_v14  ;;  %v4848_v42 = vrot.slane %v4840_v14, %v9840_v21  ;;  %v4867_v13 = vrot.slane %v4831_v34, %v9840_v21 }
 0xcfa   :  { %v4855_v37 = vrot.slane %v4841_v63, %v9840_v21  ;;  %v4858_v61 = vadd.f32 %v4848_v42, %v4136_v24  ;;  %v4868_v45 = vcombine.high %v4867_v13, %v4867_v13  ;;  %v4875_v49 = vrot.slane %v4867_v13, %v9840_v21 }
 0xcfc   :  { %v4859_v23 = vadd.f32 %v4855_v37, %v4137_v18  ;;  %9153 = vtanh.f32 %v4858_v61  ;;  %v4882_v54 = vrot.slane %v4868_v45, %v9840_v21  ;;  %v4885_v14 = vadd.f32 %v4875_v49, %v4142_v22 }
 0xcfd   :  { %v8794_v47 = vmul.f32 -1.442695, %v4858_v61 }
 0xcfe   :  { %9155 = vtanh.f32 %v4859_v23  ;;  %v4886_v25 = vadd.f32 %v4882_v54, %v4143_v8  ;;  %v8795_v57 = vmul.f32 -1.442695, %v4859_v23  ;;  %v8796_v30 = vmul.f32 -1.442695, %v4885_v14 }
 0xcff   :  { %9157 = vtanh.f32 %v4885_v14 }
 0xd00   :  { %9159 = vtanh.f32 %v4886_v25  ;;  %v8797_v1 = vmul.f32 -1.442695, %v4886_v25 }
 0xd01   :  { %9161 = vpow2.f32 %v8794_v47 }
 0xd02   :  { %9163 = vpow2.f32 %v8795_v57 }
 0xd03   :  { %9165 = vpow2.f32 %v8796_v30 }
 0xd04   :  { %9167 = vpow2.f32 %v8797_v1 }
 0xd09   :  { %v9154_v34 = vpop.eup %9153 }
 0xd0a   :  { %4919 = vrot.lane.b32.xlu0 %v9154_v34, %s9332_s2 }
 0xd0b   :  { %v9156_v63 = vpop.eup %9155 }
 0xd0c   :  { %4921 = vrot.lane.b32.xlu1 %v9156_v63, %s9332_s2  ;;  %v9158_v31 = vpop.eup %9157 }
 0xd0d   :  { %v9160_v52 = vpop.eup %9159 }
 0xd0e   :  { %4953 = vrot.lane.b32.xlu0 %v9158_v31, %s9332_s2  ;;  %v9162_v42 = vpop.eup %9161 }
 0xd0f   :  { %v9164_v13 = vpop.eup %9163  ;;  %v4893_v24 = vadd.f32 1.0, %v9162_v42 }
 0xd10   :  { %4955 = vrot.lane.b32.xlu1 %v9160_v52, %s9332_s2  ;;  %v4894_v37 = vadd.f32 1.0, %v9164_v13  ;;  %v9166_v40 = vpop.eup %9165 }
 0xd11   :  { %9169 = vrcp.f32 %v4893_v24  ;;  %v9168_v45 = vpop.eup %9167  ;;  %v4907_v18 = vadd.f32 1.0, %v9166_v40 }
 0xd12   :  { %9171 = vrcp.f32 %v4894_v37  ;;  %v4908_v12 = vadd.f32 1.0, %v9168_v45 }
 0xd13   :  { %9173 = vrcp.f32 %v4907_v18 }
 0xd14   :  { %9175 = vrcp.f32 %v4908_v12 }
 0xd1e   :  { %v9170_v61 = vpop.eup %9169 }
 0xd1f   :  { %v9172_v54 = vpop.eup %9171  ;;  %v4915_v47 = vmul.f32 %v9170_v61, %v10339_v0 }
 0xd20   :  { %v9174_v14 = vpop.eup %9173  ;;  %v4916_v1 = vmul.f32 %v9172_v54, %v10343_v20 }
 0xd21   :  { %v9176_v34 = vpop.eup %9175  ;;  %v4949_v24 = vmul.f32 %v9174_v14, %v10348_v17 }
 0xd22   :  { %v4950_v40 = vmul.f32 %v9176_v34, %v10350_v36 }
 0xd7c   :  { %v4920_v49 = vpop.permute.xlu0 %4919 }
 0xd7d   :  { %v4925_v23 = vmul.f32 %v9170_v61, %v4920_v49 }
 0xd7e   :  { %v4922_v22 = vpop.permute.xlu1 %4921 }
 0xd7f   :  { %4929 = vrot.lane.b32.xlu0 %v4925_v23, %s9333_s16  ;;  %v4926_v8 = vmul.f32 %v9172_v54, %v4922_v22 }
 0xd80   :  { %v4954_v25 = vpop.permute.xlu0 %4953 }
 0xd81   :  { %4931 = vrot.lane.b32.xlu1 %v4926_v8, %s9333_s16  ;;  %v4959_v63 = vmul.f32 %v9174_v14, %v4954_v25 }
 0xd82   :  { %v4956_v31 = vpop.permute.xlu1 %4955 }
 0xd83   :  { %v4960_v52 = vmul.f32 %v9176_v34, %v4956_v31  ;;  %4963 = vrot.lane.b32.xlu0 %v4959_v63, %s9333_s16 }
 0xd85   :  { %4965 = vrot.lane.b32.xlu1 %v4960_v52, %s9333_s16 }
 0xdf1   :  { %v4930_v57 = vpop.permute.xlu0 %4929 }
 0xdf2   :  { %v10501_v30 = vadd.f32 %v4930_v57, %v4915_v47 }
 0xdf3   :  { %v4932_v42 = vpop.permute.xlu1 %4931 }
 0xdf4   :  { %9177 = vtanh.f32 %v10501_v30  ;;  %v10505_v13 = vadd.f32 %v4932_v42, %v4916_v1 }
 0xdf5   :  { %v4964_v37 = vpop.permute.xlu0 %4963 }
 0xdf6   :  { %9179 = vtanh.f32 %v10505_v13  ;;  %v10510_v45 = vadd.f32 %v4964_v37, %v4949_v24 }
 0xdf7   :  { %v4966_v0 = vpop.permute.xlu1 %4965 }
 0xdf8   :  { %v10512_v18 = vadd.f32 %v4966_v0, %v4950_v40  ;;  %9181 = vtanh.f32 %v10510_v45 }
 0xdfa   :  { %9183 = vtanh.f32 %v10512_v18 }
 0xe01   :  { %v9178_v20 = vpop.eup %9177 }
 0xe02   :  { %4941 = vrot.lane.b32.xlu0 %v9178_v20, %s9332_s2 }
 0xe03   :  { %v9180_v12 = vpop.eup %9179 }
 0xe04   :  { %4943 = vrot.lane.b32.xlu1 %v9180_v12, %s9332_s2 }
 0xe05   :  { %v9182_v49 = vpop.eup %9181 }
 0xe06   :  { %4975 = vrot.lane.b32.xlu0 %v9182_v49, %s9332_s2 }
 0xe07   :  { %v9184_v17 = vpop.eup %9183 }
 0xe08   :  { %4977 = vrot.lane.b32.xlu1 %v9184_v17, %s9332_s2  ;;  %v11621_v17 = vld [vmem:[#allocation15_spill] sm:$0xff] }
 0xe74   :  { %v4942_v36 = vpop.permute.xlu0 %4941 }
 0xe75   :  { %v10520_v22 = vmul.f32 %v9170_v61, %v4942_v36  ;;  %v11622_v36 = vld [vmem:[#allocation17_spill] sm:$0xff] }
 0xe76   :  { %v4944_v23 = vpop.permute.xlu1 %4943 }
 0xe77   :  { %11617 = vst [vmem:[#allocation58_spill] sm:$0xff] %v10520_v22  ;;  %v10522_v8 = vmul.f32 %v9172_v54, %v4944_v23  ;;  %v11623_v23 = vld [vmem:[#allocation18_spill] sm:$0xff] }
 0xe78   :  { %v4976_v63 = vpop.permute.xlu0 %4975 }
 0xe79   :  { %11618 = vst [vmem:[#allocation59_spill] sm:$0xff] %v10522_v8  ;;  %v5029_v25 = vcombine.low %v10520_v22, %v10522_v8  ;;  %v10527_v47 = vmul.f32 %v9174_v14, %v4976_v63  ;;  %v11625_v63 = vld [vmem:[#allocation21_spill] sm:$0xff]  ;;  %v11640_v8 = vld [vmem:[#allocation32_spill] sm:$0xff] }
 0xe7a   :  { %v4978_v52 = vpop.permute.xlu1 %4977  ;;  %v11641_v22 = vld [vmem:[#allocation33_spill] sm:$0xff] }
 0xe7b   :  { %v5036_v31 = vrot.slane %v5029_v25, %v9840_v21  ;;  %11619 = vst [vmem:[#allocation60_spill] sm:$0xff] %v10527_v47  ;;  %v10529_v57 = vmul.f32 %v9176_v34, %v4978_v52  ;;  %v11624_v25 = vld [vmem:[#allocation19_spill] sm:$0xff]  ;;  %v11627_v52 = vld [vmem:[#allocation24_spill] sm:$0xff] }
 0xe7d   :  { %11620 = vst [vmem:[#allocation61_spill] sm:$0xff] %v10529_v57  ;;  %v5043_v1 = vrot.slane %v5036_v31, %v9840_v21  ;;  %v5047_v42 = vcombine.low %v10527_v47, %v10529_v57  ;;  %v11626_v31 = vld [vmem:[#allocation22_spill] sm:$0xff]  ;;  %v11642_v57 = vld [vmem:[#allocation35_spill] sm:$0xff]  ;;  %v11643_v47 = vld [vmem:[#allocation37_spill] sm:$0xff] }
 0xe7f   :  { %5044 = vrot.lane.b32.xlu0 %v5043_v1, %s9333_s16  ;;  %v5054_v61 = vrot.slane %v5047_v42, %v9840_v21  ;;  %v11628_v1 = vld [vmem:[#allocation26_spill] sm:$0xff]  ;;  %v11629_v42 = vld [vmem:[#allocation16_spill] sm:$0xff] }
 0xe81   :  { %v5061_v54 = vrot.slane %v5054_v61, %v9840_v21  ;;  %v11630_v61 = vld [vmem:[#allocation27_spill] sm:$0xff] }
 0xe83   :  { %5062 = vrot.lane.b32.xlu1 %v5061_v54, %s9332_s2  ;;  %v11631_v54 = vld [vmem:[#allocation20_spill] sm:$0xff] }
 0xef1   :  { %v5045_v24 = vpop.permute.xlu0 %5044 }
 0xef5   :  { %v5063_v37 = vpop.permute.xlu1 %5062 }
 0xef6   :  { %v5065_v14 = vsel %vm1524_vm1, %v5045_v24, %v5063_v37  ;;  %v11632_v24 = vld [vmem:[#allocation29_spill] sm:$0xff]  ;;  %v11633_v37 = vld [vmem:[#allocation23_spill] sm:$0xff] }
 0xef7   :  { %v5067_v34 = vsel %vm636_vm2, %v5065_v14, 0  ;;  %v11634_v14 = vld [vmem:[#allocation31_spill] sm:$0xff] }
 0xef8   :  { %v10540_v40 = vand.u32 4294901760, %v5067_v34 }
 0xefa   :  { %v5151_v0 = vsub.f32 %v5067_v34, %v10540_v40  ;;  %5307 = vmatmul.mubr.f32.vlgmr.msra.gmra.mxu1 %v10540_v40  ;;  %v11635_v34 = vld [vmem:[#allocation25_spill] sm:$0xff] }
 0xefb   :  { %5437 = vmatpush1.msra.mxu1 %v9456_v43  ;;  %5498 = vmatprep.mubr.f32.mxu1 %v11472_v41 }
 0xefc   :  { %v5152_v20 = vand.u32 4294901760, %v5151_v0  ;;  %5439 = vmatprep.subr.mxu1 %v9464_v46 }
 0xefd   :  { %5441 = vmatpush1.msra.mxu1 %v9468_v48 }
 0xefe   :  { %5443 = vmatprep.subr.mxu1 %v9479_v53  ;;  %v5153_v12 = vsub.f32 %v5151_v0, %v5152_v20 }
 0xeff   :  { %5445 = vmatpush1.msra.mxu1 %v9483_v55 }
 0xf00   :  { %5447 = vmatprep.subr.mxu1 %v9489_v58  ;;  %v5154_v49 = vand.u32 4294901760, %v5153_v12  ;;  %v11638_v12 = vld [vmem:[#allocation36_spill] sm:$0xff] }
 0xf01   :  { %5449 = vmatpush1.msra.mxu1 %v9499_v62 }
 0xf02   :  { %5451 = vmatprep.subr.mxu1 %v9509_v3  ;;  %5155 = vmatmul.mubr.f32.vlgmr.msra.gmra.mxu0 %v5154_v49  ;;  %v11639_v49 = vld [vmem:[#allocation30_spill] sm:$0xff] }
 0xf03   :  { %5334 = vmatpush1.msra.mxu0 %v9472_v50  ;;  %5453 = vmatpush1.msra.mxu1 %v9520_v11 }
 0xf04   :  { %5337 = vmatprep.subr.mxu0 %v9486_v56  ;;  %5455 = vmatprep.subr.mxu1 %v9531_v19 }
 0xf05   :  { %5340 = vmatpush1.msra.mxu0 %v9492_v59  ;;  %5457 = vmatpush1.msra.mxu1 %v9540_v16 }
 0xf06   :  { %5343 = vmatprep.subr.mxu0 %v9507_v2  ;;  %5459 = vmatprep.subr.mxu1 %v9553_v26 }
 0xf07   :  { %5346 = vmatpush1.msra.mxu0 %v9518_v9  ;;  %5461 = vmatpush1.msra.mxu1 %v9566_v29 }
 0xf08   :  { %5349 = vmatprep.subr.mxu0 %v9529_v15  ;;  %5463 = vmatprep.subr.mxu1 %v9585_v6 }
 0xf09   :  { %5352 = vmatpush1.msra.mxu0 %v9538_v4  ;;  %5465 = vmatpush1.msra.mxu1 %v9597_v10 }
 0xf0a   :  { %5355 = vmatprep.subr.mxu0 %v9551_v5  ;;  %5502 = vmatmul.mubr.f32.vlgmr.msra.gmra.mxu1 %v5152_v20  ;;  %v11637_v20 = vld [vmem:[#allocation28_spill] sm:$0xff] }
 0xf0b   :  { %5645 = vmatprep.subr.mxu1 %v9454_v38  ;;  %5358 = vmatpush1.msra.mxu0 %v9564_v28 }
 0xf0c   :  { %5647 = vmatpush1.msra.mxu1 %v9456_v43  ;;  %5361 = vmatprep.subr.mxu0 %v9576_v32 }
 0xf0d   :  { %5649 = vmatprep.subr.mxu1 %v9464_v46  ;;  %5364 = vmatpush1.msra.mxu0 %v9588_v35 }
 0xf0e   :  { %5651 = vmatpush1.msra.mxu1 %v9468_v48  ;;  %5367 = vmatprep.subr.mxu0 %v9600_v39 }
 0xf0f   :  { %5653 = vmatprep.subr.mxu1 %v9479_v53  ;;  %5370 = vmatpush1.msra.mxu0 %v9612_v44 }
 0xf10   :  { %5655 = vmatpush1.msra.mxu1 %v9483_v55  ;;  %5373 = vmatprep.subr.mxu0 %v9631_v60 }
 0xf11   :  { %5657 = vmatprep.subr.mxu1 %v9489_v58  ;;  %5376 = vmatpush1.msra.mxu0 %v9643_v7 }
 0xf12   :  { %5409 = vmatprep.mubr.f32.mxu0 %v11472_v41  ;;  %5659 = vmatpush1.msra.mxu1 %v9499_v62 }
 0xf13   :  { %5412 = vmatmul.mubr.f32.vlgmr.msra.gmra.mxu0 %v5151_v0  ;;  %5527 = vmatprep.subr.mxu0 %v11482_v27  ;;  %v11636_v0 = vld [vmem:[#allocation34_spill] sm:$0xff] }
 0xf14   :  { %5661 = vmatprep.subr.mxu1 %v9509_v3  ;;  %5531 = vmatpush1.msra.mxu0 %v11483_v51 }
 0xf15   :  { %5663 = vmatpush1.msra.mxu1 %v9520_v11  ;;  %5535 = vmatprep.subr.mxu0 %v11484_v33 }
 0xf16   :  { %5665 = vmatprep.subr.mxu1 %v9531_v19  ;;  %5539 = vmatpush1.msra.mxu0 %v11621_v17 }
 0xf17   :  { %5667 = vmatpush1.msra.mxu1 %v9540_v16  ;;  %5543 = vmatprep.subr.mxu0 %v11622_v36 }
 0xf18   :  { %5669 = vmatprep.subr.mxu1 %v9553_v26  ;;  %5547 = vmatpush1.msra.mxu0 %v11623_v23 }
 0xf19   :  { %5671 = vmatpush1.msra.mxu1 %v9566_v29  ;;  %5551 = vmatprep.subr.mxu0 %v11624_v25 }
 0xf1a   :  { %5673 = vmatprep.subr.mxu1 %v9585_v6  ;;  %5555 = vmatpush1.msra.mxu0 %v11625_v63 }
 0xf1b   :  { %5675 = vmatpush1.msra.mxu1 %v9597_v10  ;;  %5708 = vmatprep.mubr.f32.mxu1 %v11472_v41 }
 0xf1c   :  { %5559 = vmatprep.subr.mxu0 %v11626_v31  ;;  %5710 = vmatmul.mubr.f32.vlgmr.msra.gmra.mxu1 %v10540_v40 }
 0xf1d   :  { %5563 = vmatpush1.msra.mxu0 %v11627_v52  ;;  %5620 = vmatprep.mubr.f32.mxu0 %v11472_v41 }
 0xf1e   :  { %5567 = vmatprep.subr.mxu0 %v11628_v1  ;;  %6065 = vmatprep.subr.mxu1 %v11629_v42 }
 0xf1f   :  { %5571 = vmatpush1.msra.mxu0 %v11630_v61  ;;  %6071 = vmatpush1.msra.mxu1 %v11631_v54 }
 0xf20   :  { %5575 = vmatprep.subr.mxu0 %v11632_v24  ;;  %6077 = vmatprep.subr.mxu1 %v11633_v37 }
 0xf21   :  { %5579 = vmatpush1.msra.mxu0 %v11634_v14  ;;  %6083 = vmatpush1.msra.mxu1 %v11635_v34 }
 0xf22   :  { %5583 = vmatprep.subr.mxu0 %v11636_v0  ;;  %6089 = vmatprep.subr.mxu1 %v11637_v20  ;;  %v11644_v20 = vld [vmem:[#allocation38_spill] sm:$0xff] }
 0xf23   :  { %5587 = vmatpush1.msra.mxu0 %v11638_v12  ;;  %6095 = vmatpush1.msra.mxu1 %v11639_v49  ;;  %v11645_v49 = vld [vmem:[#allocation39_spill] sm:$0xff] }
 0xf24   :  { %5622 = vmatmul.mubr.f32.vlgmr.msra.gmra.mxu0 %v10540_v40  ;;  %6101 = vmatprep.subr.mxu1 %v11640_v8  ;;  %v11646_v40 = vld [vmem:[#allocation40_spill] sm:$0xff] }
 0xf25   :  { %6107 = vmatpush1.msra.mxu1 %v11641_v22  ;;  %5969 = vmatprep.subr.mxu0 %v9454_v38  ;;  %v11647_v22 = vld [vmem:[#allocation41_spill] sm:$0xff] }
 0xf26   :  { %6113 = vmatprep.subr.mxu1 %v11642_v57  ;;  %5971 = vmatpush1.msra.mxu0 %v9456_v43  ;;  %v11648_v57 = vld [vmem:[#allocation42_spill] sm:$0xff] }
 0xf27   :  { %6119 = vmatpush1.msra.mxu1 %v11643_v47  ;;  %5973 = vmatprep.subr.mxu0 %v9464_v46  ;;  %v11649_v47 = vld [vmem:[#allocation43_spill] sm:$0xff] }
 0xf28   :  { %6125 = vmatprep.subr.mxu1 %v11644_v20  ;;  %5975 = vmatpush1.msra.mxu0 %v9468_v48 }
 0xf29   :  { %6131 = vmatpush1.msra.mxu1 %v11645_v49  ;;  %5977 = vmatprep.subr.mxu0 %v9479_v53 }
 0xf2a   :  { %6137 = vmatprep.subr.mxu1 %v11646_v40  ;;  %5979 = vmatpush1.msra.mxu0 %v9483_v55 }
 0xf2b   :  { %6143 = vmatpush1.msra.mxu1 %v11647_v22  ;;  %5981 = vmatprep.subr.mxu0 %v9489_v58 }
 0xf2c   :  { %6149 = vmatprep.subr.mxu1 %v11648_v57  ;;  %5983 = vmatpush1.msra.mxu0 %v9499_v62 }
 0xf2d   :  { %6155 = vmatpush1.msra.mxu1 %v11649_v47  ;;  %5985 = vmatprep.subr.mxu0 %v9509_v3  ;;  %v11650_v47 = vld [vmem:[#allocation11_spill] sm:$0xff] }
 0xf2e   :  { %6188 = vmatprep.mubr.f32.mxu1 %v11472_v41  ;;  %6318 = vmatprep.subr.mxu1 %v9454_v38 }
 0xf2f   :  { %5987 = vmatpush1.msra.mxu0 %v9520_v11  ;;  %6032 = vmatprep.mubr.f32.mxu0 %v11472_v41 }
 0xf30   :  { %5989 = vmatprep.subr.mxu0 %v9531_v19 }
 0xf31   :  { %5991 = vmatpush1.msra.mxu0 %v9540_v16 }
 0xf32   :  { %5993 = vmatprep.subr.mxu0 %v9553_v26 }
 0xf33   :  { %5995 = vmatpush1.msra.mxu0 %v9566_v29 }
 0xf34   :  { %5997 = vmatprep.subr.mxu0 %v9585_v6 }
 0xf35   :  { %5999 = vmatpush1.msra.mxu0 %v9597_v10 }
 0xf36   :  { %6214 = vmatprep.subr.mxu0 %v11650_v47 }
 0xfba   :  { %v5308_v22 = vpop.f32.mrf.mxu1 }
 0xfbc   :  { %v5310_v20 = vpop.f32.mrf.mxu1 }
 0xfc2   :  { %v5156_v57 = vpop.f32.mrf.mxu0 }
 0xfc3   :  { %v5309_v8 = vadd.f32 %v5308_v22, %v5156_v57 }
 0xfc4   :  { %v5158_v40 = vpop.f32.mrf.mxu0 }
 0xfc5   :  { %v5311_v34 = vadd.f32 %v5310_v20, %v5158_v40 }
 0xfca   :  { %v5503_v12 = vpop.f32.mrf.mxu1 }
 0xfcc   :  { %v5505_v24 = vpop.f32.mrf.mxu1 }
 0xfd3   :  { %v5413_v49 = vpop.f32.mrf.mxu0 }
 0xfd4   :  { %v5414_v14 = vadd.f32 %v5413_v49, %v5309_v8  ;;  %v5019_v8 = vld [vmem:[#allocation2 + $0x5] ss:$8 sm:$0x3] }
 0xfd5   :  { %v5415_v0 = vpop.f32.mrf.mxu0 }
 0xfd6   :  { %v5416_v37 = vadd.f32 %v5415_v0, %v5311_v34  ;;  %v5504_v54 = vadd.f32 %v5503_v12, %v5414_v14  ;;  %v5021_v0 = vld [vmem:[#allocation2 + $0x2] ss:$8 sm:$0x3] }
 0xfd8   :  { %v5506_v52 = vadd.f32 %v5505_v24, %v5416_v37 }
 0xfdc   :  { %v5711_v61 = vpop.f32.mrf.mxu1 }
 0xfde   :  { %v5713_v25 = vpop.f32.mrf.mxu1 }
 0xfe4   :  { %v5623_v42 = vpop.f32.mrf.mxu0 }
 0xfe5   :  { %v5624_v1 = vadd.f32 %v5623_v42, %v5504_v54  ;;  %v5020_v42 = vld [vmem:[#allocation2 + $0x15] ss:$8 sm:$0x3]  ;;  %v5022_v54 = vld [vmem:[#allocation2 + $0x12] ss:$8 sm:$0x3] }
 0xfe6   :  { %v5625_v31 = vpop.f32.mrf.mxu0 }
 0xfe7   :  { %v5712_v63 = vadd.f32 %v5711_v61, %v5624_v1  ;;  %v5626_v47 = vadd.f32 %v5625_v31, %v5506_v52 }
 0xfe9   :  { %v5723_v23 = vrot.slane %v5712_v63, %v9840_v21  ;;  %v5714_v36 = vadd.f32 %v5713_v25, %v5626_v47  ;;  %v5025_v47 = vrot.slane %v5021_v0, 1  ;;  %v5026_v25 = vrot.slane %v5022_v54, 1 }
 0xfeb   :  { %v5724_v17 = vcombine.high %v5723_v23, %v5723_v23  ;;  %v5731_v22 = vrot.slane %v5723_v23, %v9840_v21  ;;  %v5750_v57 = vrot.slane %v5714_v36, %v9840_v21 }
 0xfed   :  { %v5738_v34 = vrot.slane %v5724_v17, %v9840_v21  ;;  %v5741_v14 = vadd.f32 %v5731_v22, %v5019_v8  ;;  %v5751_v20 = vcombine.high %v5750_v57, %v5750_v57  ;;  %v5758_v1 = vrot.slane %v5750_v57, %v9840_v21 }
 0xfef   :  { %v5742_v31 = vadd.f32 %v5738_v34, %v5020_v42  ;;  %9185 = vtanh.f32 %v5741_v14  ;;  %v5765_v63 = vrot.slane %v5751_v20, %v9840_v21  ;;  %v5768_v23 = vadd.f32 %v5758_v1, %v5025_v47 }
 0xff0   :  { %v8798_v37 = vmul.f32 -1.442695, %v5741_v14 }
 0xff1   :  { %9187 = vtanh.f32 %v5742_v31  ;;  %v5769_v52 = vadd.f32 %v5765_v63, %v5026_v25  ;;  %v8799_v12 = vmul.f32 -1.442695, %v5742_v31  ;;  %v8800_v49 = vmul.f32 -1.442695, %v5768_v23 }
 0xff2   :  { %9189 = vtanh.f32 %v5768_v23 }
 0xff3   :  { %9191 = vtanh.f32 %v5769_v52  ;;  %v8801_v40 = vmul.f32 -1.442695, %v5769_v52 }
 0xff4   :  { %9193 = vpow2.f32 %v8798_v37 }
 0xff5   :  { %9195 = vpow2.f32 %v8799_v12 }
 0xff6   :  { %9197 = vpow2.f32 %v8800_v49 }
 0xff7   :  { %9199 = vpow2.f32 %v8801_v40 }
 0xffc   :  { %v9186_v36 = vpop.eup %9185 }
 0xffd   :  { %5802 = vrot.lane.b32.xlu0 %v9186_v36, %s9332_s2 }
 0xffe   :  { %v9188_v17 = vpop.eup %9187 }
 0xfff   :  { %5804 = vrot.lane.b32.xlu1 %v9188_v17, %s9332_s2  ;;  %v9190_v61 = vpop.eup %9189 }
0x1000   :  { %v9192_v24 = vpop.eup %9191 }
0x1001   :  { %5836 = vrot.lane.b32.xlu0 %v9190_v61, %s9332_s2  ;;  %v9194_v22 = vpop.eup %9193 }
0x1002   :  { %v9196_v57 = vpop.eup %9195  ;;  %v5776_v8 = vadd.f32 1.0, %v9194_v22 }
0x1003   :  { %5838 = vrot.lane.b32.xlu1 %v9192_v24, %s9332_s2  ;;  %v5777_v34 = vadd.f32 1.0, %v9196_v57  ;;  %v9198_v0 = vpop.eup %9197 }
0x1004   :  { %9201 = vrcp.f32 %v5776_v8  ;;  %v9200_v20 = vpop.eup %9199  ;;  %v5790_v42 = vadd.f32 1.0, %v9198_v0 }
0x1005   :  { %9203 = vrcp.f32 %v5777_v34  ;;  %v5791_v54 = vadd.f32 1.0, %v9200_v20 }
0x1006   :  { %9205 = vrcp.f32 %v5790_v42 }
0x1007   :  { %9207 = vrcp.f32 %v5791_v54 }
0x1011   :  { %v9202_v14 = vpop.eup %9201 }
0x1012   :  { %v9204_v63 = vpop.eup %9203  ;;  %v5798_v37 = vmul.f32 %v9202_v14, %v10501_v30 }
0x1013   :  { %v9206_v23 = vpop.eup %9205  ;;  %v5799_v40 = vmul.f32 %v9204_v63, %v10505_v13 }
0x1014   :  { %v9208_v36 = vpop.eup %9207  ;;  %v5832_v8 = vmul.f32 %v9206_v23, %v10510_v45 }
0x1015   :  { %v5833_v0 = vmul.f32 %v9208_v36, %v10512_v18 }
0x106f   :  { %v5803_v1 = vpop.permute.xlu0 %5802 }
0x1070   :  { %v5808_v31 = vmul.f32 %v9202_v14, %v5803_v1 }
0x1071   :  { %v5805_v47 = vpop.permute.xlu1 %5804 }
0x1072   :  { %5812 = vrot.lane.b32.xlu0 %v5808_v31, %s9333_s16  ;;  %v5809_v25 = vmul.f32 %v9204_v63, %v5805_v47 }
0x1073   :  { %v5837_v52 = vpop.permute.xlu0 %5836 }
0x1074   :  { %5814 = vrot.lane.b32.xlu1 %v5809_v25, %s9333_s16  ;;  %v5842_v17 = vmul.f32 %v9206_v23, %v5837_v52 }
0x1075   :  { %v5839_v61 = vpop.permute.xlu1 %5838 }
0x1076   :  { %v5843_v24 = vmul.f32 %v9208_v36, %v5839_v61  ;;  %5846 = vrot.lane.b32.xlu0 %v5842_v17, %s9333_s16 }
0x1078   :  { %5848 = vrot.lane.b32.xlu1 %v5843_v24, %s9333_s16 }
0x10e4   :  { %v5813_v12 = vpop.permute.xlu0 %5812 }
0x10e5   :  { %v10663_v49 = vadd.f32 %v5813_v12, %v5798_v37 }
0x10e6   :  { %v5815_v22 = vpop.permute.xlu1 %5814 }
0x10e7   :  { %9209 = vtanh.f32 %v10663_v49  ;;  %v10667_v57 = vadd.f32 %v5815_v22, %v5799_v40 }
0x10e8   :  { %v5847_v34 = vpop.permute.xlu0 %5846 }
0x10e9   :  { %9211 = vtanh.f32 %v10667_v57  ;;  %v10672_v20 = vadd.f32 %v5847_v34, %v5832_v8 }
0x10ea   :  { %v5849_v30 = vpop.permute.xlu1 %5848 }
0x10eb   :  { %v10674_v42 = vadd.f32 %v5849_v30, %v5833_v0  ;;  %9213 = vtanh.f32 %v10672_v20 }
0x10ed   :  { %9215 = vtanh.f32 %v10674_v42 }
0x10f4   :  { %v9210_v13 = vpop.eup %9209 }
0x10f5   :  { %5824 = vrot.lane.b32.xlu0 %v9210_v13, %s9332_s2 }
0x10f6   :  { %v9212_v54 = vpop.eup %9211 }
0x10f7   :  { %5826 = vrot.lane.b32.xlu1 %v9212_v54, %s9332_s2 }
0x10f8   :  { %v9214_v1 = vpop.eup %9213 }
0x10f9   :  { %5858 = vrot.lane.b32.xlu0 %v9214_v1, %s9332_s2 }
0x10fa   :  { %v9216_v45 = vpop.eup %9215 }
0x10fb   :  { %5860 = vrot.lane.b32.xlu1 %v9216_v45, %s9332_s2  ;;  %v11655_v45 = vld [vmem:[#allocation15_spill] sm:$0xff] }
0x1167   :  { %v5825_v18 = vpop.permute.xlu0 %5824 }
0x1168   :  { %v10682_v47 = vmul.f32 %v9202_v14, %v5825_v18  ;;  %v11656_v18 = vld [vmem:[#allocation17_spill] sm:$0xff] }
0x1169   :  { %v5827_v31 = vpop.permute.xlu1 %5826 }
0x116a   :  { %11651 = vst [vmem:[#allocation62_spill] sm:$0xff] %v10682_v47  ;;  %v10684_v25 = vmul.f32 %v9204_v63, %v5827_v31  ;;  %v11657_v31 = vld [vmem:[#allocation18_spill] sm:$0xff] }
0x116b   :  { %v5859_v17 = vpop.permute.xlu0 %5858 }
0x116c   :  { %11652 = vst [vmem:[#allocation63_spill] sm:$0xff] %v10684_v25  ;;  %v5912_v52 = vcombine.low %v10682_v47, %v10684_v25  ;;  %v10689_v37 = vmul.f32 %v9206_v23, %v5859_v17  ;;  %v11659_v17 = vld [vmem:[#allocation21_spill] sm:$0xff] }
0x116d   :  { %v5861_v24 = vpop.permute.xlu1 %5860 }
0x116e   :  { %v5919_v61 = vrot.slane %v5912_v52, %v9840_v21  ;;  %11653 = vst [vmem:[#allocation64_spill] sm:$0xff] %v10689_v37  ;;  %v10691_v12 = vmul.f32 %v9208_v36, %v5861_v24  ;;  %v11658_v52 = vld [vmem:[#allocation19_spill] sm:$0xff]  ;;  %v11661_v24 = vld [vmem:[#allocation24_spill] sm:$0xff] }
0x1170   :  { %11654 = vst [vmem:[#allocation65_spill] sm:$0xff] %v10691_v12  ;;  %v5926_v40 = vrot.slane %v5919_v61, %v9840_v21  ;;  %v5930_v22 = vcombine.low %v10689_v37, %v10691_v12  ;;  %v11660_v61 = vld [vmem:[#allocation22_spill] sm:$0xff] }
0x1172   :  { %5927 = vrot.lane.b32.xlu0 %v5926_v40, %s9333_s16  ;;  %v5937_v14 = vrot.slane %v5930_v22, %v9840_v21  ;;  %v11662_v40 = vld [vmem:[#allocation26_spill] sm:$0xff]  ;;  %v11663_v22 = vld [vmem:[#allocation16_spill] sm:$0xff] }
0x1174   :  { %v5944_v63 = vrot.slane %v5937_v14, %v9840_v21  ;;  %v11664_v14 = vld [vmem:[#allocation27_spill] sm:$0xff] }
0x1176   :  { %5945 = vrot.lane.b32.xlu1 %v5944_v63, %s9332_s2  ;;  %v11665_v63 = vld [vmem:[#allocation20_spill] sm:$0xff] }
0x11e4   :  { %v5928_v8 = vpop.permute.xlu0 %5927 }
0x11e8   :  { %v5946_v34 = vpop.permute.xlu1 %5945 }
0x11e9   :  { %v5948_v23 = vsel %vm1524_vm1, %v5928_v8, %v5946_v34  ;;  %v11666_v8 = vld [vmem:[#allocation29_spill] sm:$0xff]  ;;  %v11667_v34 = vld [vmem:[#allocation23_spill] sm:$0xff] }
0x11ea   :  { %v5950_v36 = vsel %vm636_vm2, %v5948_v23, 0  ;;  %v11668_v23 = vld [vmem:[#allocation31_spill] sm:$0xff] }
0x11eb   :  { %v10702_v0 = vand.u32 4294901760, %v5950_v36 }
0x11ed   :  { %v6034_v30 = vsub.f32 %v5950_v36, %v10702_v0  ;;  %6190 = vmatmul.mubr.f32.vlgmr.msra.gmra.mxu1 %v10702_v0  ;;  %v11669_v36 = vld [vmem:[#allocation25_spill] sm:$0xff] }
0x11ee   :  { %6320 = vmatpush1.msra.mxu1 %v9456_v43  ;;  %6381 = vmatprep.mubr.f32.mxu1 %v11472_v41 }
0x11ef   :  { %v6035_v13 = vand.u32 4294901760, %v6034_v30  ;;  %6322 = vmatprep.subr.mxu1 %v9464_v46 }
0x11f0   :  { %6324 = vmatpush1.msra.mxu1 %v9468_v48 }
0x11f1   :  { %6326 = vmatprep.subr.mxu1 %v9479_v53  ;;  %v6036_v54 = vsub.f32 %v6034_v30, %v6035_v13 }
0x11f2   :  { %6328 = vmatpush1.msra.mxu1 %v9483_v55 }
0x11f3   :  { %6330 = vmatprep.subr.mxu1 %v9489_v58  ;;  %v6037_v1 = vand.u32 4294901760, %v6036_v54  ;;  %v11672_v54 = vld [vmem:[#allocation36_spill] sm:$0xff] }
0x11f4   :  { %6332 = vmatpush1.msra.mxu1 %v9499_v62 }
0x11f5   :  { %6334 = vmatprep.subr.mxu1 %v9509_v3  ;;  %6038 = vmatmul.mubr.f32.vlgmr.msra.gmra.mxu0 %v6037_v1  ;;  %v11673_v1 = vld [vmem:[#allocation30_spill] sm:$0xff] }
0x11f6   :  { %6217 = vmatpush1.msra.mxu0 %v9472_v50  ;;  %6336 = vmatpush1.msra.mxu1 %v9520_v11 }
0x11f7   :  { %6220 = vmatprep.subr.mxu0 %v9486_v56  ;;  %6338 = vmatprep.subr.mxu1 %v9531_v19 }
0x11f8   :  { %6223 = vmatpush1.msra.mxu0 %v9492_v59  ;;  %6340 = vmatpush1.msra.mxu1 %v9540_v16 }
0x11f9   :  { %6226 = vmatprep.subr.mxu0 %v9507_v2  ;;  %6342 = vmatprep.subr.mxu1 %v9553_v26 }
0x11fa   :  { %6229 = vmatpush1.msra.mxu0 %v9518_v9  ;;  %6344 = vmatpush1.msra.mxu1 %v9566_v29 }
0x11fb   :  { %6232 = vmatprep.subr.mxu0 %v9529_v15  ;;  %6346 = vmatprep.subr.mxu1 %v9585_v6 }
0x11fc   :  { %6235 = vmatpush1.msra.mxu0 %v9538_v4  ;;  %6348 = vmatpush1.msra.mxu1 %v9597_v10 }
0x11fd   :  { %6238 = vmatprep.subr.mxu0 %v9551_v5  ;;  %6385 = vmatmul.mubr.f32.vlgmr.msra.gmra.mxu1 %v6035_v13  ;;  %v11671_v13 = vld [vmem:[#allocation28_spill] sm:$0xff] }
0x11fe   :  { %6528 = vmatprep.subr.mxu1 %v9454_v38  ;;  %6241 = vmatpush1.msra.mxu0 %v9564_v28 }
0x11ff   :  { %6530 = vmatpush1.msra.mxu1 %v9456_v43  ;;  %6244 = vmatprep.subr.mxu0 %v9576_v32 }
0x1200   :  { %6532 = vmatprep.subr.mxu1 %v9464_v46  ;;  %6247 = vmatpush1.msra.mxu0 %v9588_v35 }
0x1201   :  { %6534 = vmatpush1.msra.mxu1 %v9468_v48  ;;  %6250 = vmatprep.subr.mxu0 %v9600_v39 }
0x1202   :  { %6536 = vmatprep.subr.mxu1 %v9479_v53  ;;  %6253 = vmatpush1.msra.mxu0 %v9612_v44 }
0x1203   :  { %6538 = vmatpush1.msra.mxu1 %v9483_v55  ;;  %6256 = vmatprep.subr.mxu0 %v9631_v60 }
0x1204   :  { %6540 = vmatprep.subr.mxu1 %v9489_v58  ;;  %6259 = vmatpush1.msra.mxu0 %v9643_v7 }
0x1205   :  { %6292 = vmatprep.mubr.f32.mxu0 %v11472_v41  ;;  %6542 = vmatpush1.msra.mxu1 %v9499_v62 }
0x1206   :  { %6295 = vmatmul.mubr.f32.vlgmr.msra.gmra.mxu0 %v6034_v30  ;;  %6410 = vmatprep.subr.mxu0 %v11482_v27  ;;  %v11670_v30 = vld [vmem:[#allocation34_spill] sm:$0xff] }
0x1207   :  { %6544 = vmatprep.subr.mxu1 %v9509_v3  ;;  %6414 = vmatpush1.msra.mxu0 %v11483_v51 }
0x1208   :  { %6546 = vmatpush1.msra.mxu1 %v9520_v11  ;;  %6418 = vmatprep.subr.mxu0 %v11484_v33 }
0x1209   :  { %6548 = vmatprep.subr.mxu1 %v9531_v19  ;;  %6422 = vmatpush1.msra.mxu0 %v11655_v45 }
0x120a   :  { %6550 = vmatpush1.msra.mxu1 %v9540_v16  ;;  %6426 = vmatprep.subr.mxu0 %v11656_v18 }
0x120b   :  { %6552 = vmatprep.subr.mxu1 %v9553_v26  ;;  %6430 = vmatpush1.msra.mxu0 %v11657_v31 }
0x120c   :  { %6554 = vmatpush1.msra.mxu1 %v9566_v29  ;;  %6434 = vmatprep.subr.mxu0 %v11658_v52 }
0x120d   :  { %6556 = vmatprep.subr.mxu1 %v9585_v6  ;;  %6438 = vmatpush1.msra.mxu0 %v11659_v17 }
0x120e   :  { %6558 = vmatpush1.msra.mxu1 %v9597_v10  ;;  %6591 = vmatprep.mubr.f32.mxu1 %v11472_v41 }
0x120f   :  { %6442 = vmatprep.subr.mxu0 %v11660_v61  ;;  %6593 = vmatmul.mubr.f32.vlgmr.msra.gmra.mxu1 %v10702_v0 }
0x1210   :  { %6446 = vmatpush1.msra.mxu0 %v11661_v24  ;;  %6503 = vmatprep.mubr.f32.mxu0 %v11472_v41 }
0x1211   :  { %6450 = vmatprep.subr.mxu0 %v11662_v40  ;;  %6948 = vmatprep.subr.mxu1 %v11663_v22  ;;  %v11674_v22 = vld [vmem:[#allocation32_spill] sm:$0xff] }
0x1212   :  { %6454 = vmatpush1.msra.mxu0 %v11664_v14  ;;  %6954 = vmatpush1.msra.mxu1 %v11665_v63  ;;  %v11675_v63 = vld [vmem:[#allocation33_spill] sm:$0xff] }
0x1213   :  { %6458 = vmatprep.subr.mxu0 %v11666_v8  ;;  %6960 = vmatprep.subr.mxu1 %v11667_v34  ;;  %v11676_v34 = vld [vmem:[#allocation35_spill] sm:$0xff] }
0x1214   :  { %6462 = vmatpush1.msra.mxu0 %v11668_v23  ;;  %6966 = vmatpush1.msra.mxu1 %v11669_v36  ;;  %v11677_v36 = vld [vmem:[#allocation37_spill] sm:$0xff] }
0x1215   :  { %6466 = vmatprep.subr.mxu0 %v11670_v30  ;;  %6972 = vmatprep.subr.mxu1 %v11671_v13  ;;  %v11678_v13 = vld [vmem:[#allocation38_spill] sm:$0xff] }
0x1216   :  { %6470 = vmatpush1.msra.mxu0 %v11672_v54  ;;  %6978 = vmatpush1.msra.mxu1 %v11673_v1  ;;  %v11679_v1 = vld [vmem:[#allocation39_spill] sm:$0xff] }
0x1217   :  { %6505 = vmatmul.mubr.f32.vlgmr.msra.gmra.mxu0 %v10702_v0  ;;  %6984 = vmatprep.subr.mxu1 %v11674_v22  ;;  %v11680_v0 = vld [vmem:[#allocation40_spill] sm:$0xff]  ;;  %v11681_v22 = vld [vmem:[#allocation41_spill] sm:$0xff] }
0x1218   :  { %6990 = vmatpush1.msra.mxu1 %v11675_v63  ;;  %6852 = vmatprep.subr.mxu0 %v9454_v38  ;;  %v11682_v63 = vld [vmem:[#allocation42_spill] sm:$0xff] }
0x1219   :  { %6996 = vmatprep.subr.mxu1 %v11676_v34  ;;  %6854 = vmatpush1.msra.mxu0 %v9456_v43  ;;  %v11683_v34 = vld [vmem:[#allocation43_spill] sm:$0xff] }
0x121a   :  { %7002 = vmatpush1.msra.mxu1 %v11677_v36  ;;  %6856 = vmatprep.subr.mxu0 %v9464_v46  ;;  %v11684_v36 = vld [vmem:[#allocation11_spill] sm:$0xff] }
0x121b   :  { %7008 = vmatprep.subr.mxu1 %v11678_v13  ;;  %6858 = vmatpush1.msra.mxu0 %v9468_v48 }
0x121c   :  { %7014 = vmatpush1.msra.mxu1 %v11679_v1  ;;  %6860 = vmatprep.subr.mxu0 %v9479_v53 }
0x121d   :  { %7020 = vmatprep.subr.mxu1 %v11680_v0  ;;  %6862 = vmatpush1.msra.mxu0 %v9483_v55 }
0x121e   :  { %7026 = vmatpush1.msra.mxu1 %v11681_v22  ;;  %6864 = vmatprep.subr.mxu0 %v9489_v58 }
0x121f   :  { %7032 = vmatprep.subr.mxu1 %v11682_v63  ;;  %6866 = vmatpush1.msra.mxu0 %v9499_v62 }
0x1220   :  { %7038 = vmatpush1.msra.mxu1 %v11683_v34  ;;  %6868 = vmatprep.subr.mxu0 %v9509_v3 }
0x1221   :  { %7071 = vmatprep.mubr.f32.mxu1 %v11472_v41  ;;  %7201 = vmatprep.subr.mxu1 %v9454_v38 }
0x1222   :  { %6870 = vmatpush1.msra.mxu0 %v9520_v11  ;;  %6915 = vmatprep.mubr.f32.mxu0 %v11472_v41 }
0x1223   :  { %6872 = vmatprep.subr.mxu0 %v9531_v19 }
0x1224   :  { %6874 = vmatpush1.msra.mxu0 %v9540_v16 }
0x1225   :  { %6876 = vmatprep.subr.mxu0 %v9553_v26 }
0x1226   :  { %6878 = vmatpush1.msra.mxu0 %v9566_v29 }
0x1227   :  { %6880 = vmatprep.subr.mxu0 %v9585_v6 }
0x1228   :  { %6882 = vmatpush1.msra.mxu0 %v9597_v10 }
0x1229   :  { %7097 = vmatprep.subr.mxu0 %v11684_v36 }
0x12ad   :  { %v6191_v1 = vpop.f32.mrf.mxu1 }
0x12af   :  { %v6193_v63 = vpop.f32.mrf.mxu1 }
0x12b5   :  { %v6039_v13 = vpop.f32.mrf.mxu0 }
0x12b6   :  { %v6192_v34 = vadd.f32 %v6191_v1, %v6039_v13 }
0x12b7   :  { %v6041_v0 = vpop.f32.mrf.mxu0 }
0x12b8   :  { %v6194_v12 = vadd.f32 %v6193_v63, %v6041_v0  ;;  %v5902_v0 = vld [vmem:[#allocation2 + $0x6] ss:$8 sm:$0x3] }
0x12bd   :  { %v6386_v25 = vpop.f32.mrf.mxu1 }
0x12bf   :  { %v6388_v30 = vpop.f32.mrf.mxu1 }
0x12c6   :  { %v6296_v22 = vpop.f32.mrf.mxu0 }
0x12c7   :  { %v6297_v37 = vadd.f32 %v6296_v22, %v6192_v34 }
0x12c8   :  { %v6298_v47 = vpop.f32.mrf.mxu0 }
0x12c9   :  { %v6299_v54 = vadd.f32 %v6298_v47, %v6194_v12  ;;  %v6387_v23 = vadd.f32 %v6386_v25, %v6297_v37  ;;  %v5904_v37 = vld [vmem:[#allocation2 + $0x1] ss:$8 sm:$0x3] }
0x12cb   :  { %v6389_v24 = vadd.f32 %v6388_v30, %v6299_v54 }
0x12cf   :  { %v6594_v8 = vpop.f32.mrf.mxu1 }
0x12d1   :  { %v6596_v52 = vpop.f32.mrf.mxu1 }
0x12d7   :  { %v6506_v14 = vpop.f32.mrf.mxu0 }
0x12d8   :  { %v6507_v40 = vadd.f32 %v6506_v14, %v6387_v23  ;;  %v5903_v14 = vld [vmem:[#allocation2 + $0x16] ss:$8 sm:$0x3]  ;;  %v5905_v23 = vld [vmem:[#allocation2 + $0x11] ss:$8 sm:$0x3] }
0x12d9   :  { %v6508_v61 = vpop.f32.mrf.mxu0 }
0x12da   :  { %v6595_v17 = vadd.f32 %v6594_v8, %v6507_v40  ;;  %v6509_v36 = vadd.f32 %v6508_v61, %v6389_v24  ;;  %v5909_v24 = vrot.slane %v5905_v23, 1 }
0x12dc   :  { %v6606_v31 = vrot.slane %v6595_v17, %v9840_v21  ;;  %v6597_v18 = vadd.f32 %v6596_v52, %v6509_v36  ;;  %v5908_v52 = vrot.slane %v5904_v37, 1 }
0x12de   :  { %v6607_v45 = vcombine.high %v6606_v31, %v6606_v31  ;;  %v6614_v13 = vrot.slane %v6606_v31, %v9840_v21  ;;  %v6633_v1 = vrot.slane %v6597_v18, %v9840_v21 }
0x12e0   :  { %v6621_v47 = vrot.slane %v6607_v45, %v9840_v21  ;;  %v6624_v25 = vadd.f32 %v6614_v13, %v5902_v0  ;;  %v6634_v12 = vcombine.high %v6633_v1, %v6633_v1  ;;  %v6641_v40 = vrot.slane %v6633_v1, %v9840_v21 }
0x12e2   :  { %v6625_v61 = vadd.f32 %v6621_v47, %v5903_v14  ;;  %9217 = vtanh.f32 %v6624_v25  ;;  %v6648_v17 = vrot.slane %v6634_v12, %v9840_v21  ;;  %v6651_v31 = vadd.f32 %v6641_v40, %v5908_v52 }
0x12e3   :  { %v8802_v22 = vmul.f32 -1.442695, %v6624_v25 }
0x12e4   :  { %9219 = vtanh.f32 %v6625_v61  ;;  %v6652_v8 = vadd.f32 %v6648_v17, %v5909_v24  ;;  %v8803_v63 = vmul.f32 -1.442695, %v6625_v61  ;;  %v8804_v34 = vmul.f32 -1.442695, %v6651_v31 }
0x12e5   :  { %9221 = vtanh.f32 %v6651_v31 }
0x12e6   :  { %9223 = vtanh.f32 %v6652_v8  ;;  %v8805_v36 = vmul.f32 -1.442695, %v6652_v8 }
0x12e7   :  { %9225 = vpow2.f32 %v8802_v22 }
0x12e8   :  { %9227 = vpow2.f32 %v8803_v63 }
0x12e9   :  { %9229 = vpow2.f32 %v8804_v34 }
0x12ea   :  { %9231 = vpow2.f32 %v8805_v36 }
0x12ef   :  { %v9218_v18 = vpop.eup %9217 }
0x12f0   :  { %6685 = vrot.lane.b32.xlu0 %v9218_v18, %s9332_s2 }
0x12f1   :  { %v9220_v45 = vpop.eup %9219 }
0x12f2   :  { %6687 = vrot.lane.b32.xlu1 %v9220_v45, %s9332_s2  ;;  %v9222_v30 = vpop.eup %9221 }
0x12f3   :  { %v9224_v54 = vpop.eup %9223 }
0x12f4   :  { %6719 = vrot.lane.b32.xlu0 %v9222_v30, %s9332_s2  ;;  %v9226_v13 = vpop.eup %9225 }
0x12f5   :  { %v9228_v1 = vpop.eup %9227  ;;  %v6659_v0 = vadd.f32 1.0, %v9226_v13 }
0x12f6   :  { %6721 = vrot.lane.b32.xlu1 %v9224_v54, %s9332_s2  ;;  %v6660_v47 = vadd.f32 1.0, %v9228_v1  ;;  %v9230_v37 = vpop.eup %9229 }
0x12f7   :  { %9233 = vrcp.f32 %v6659_v0  ;;  %v9232_v12 = vpop.eup %9231  ;;  %v6673_v14 = vadd.f32 1.0, %v9230_v37 }
0x12f8   :  { %9235 = vrcp.f32 %v6660_v47  ;;  %v6674_v23 = vadd.f32 1.0, %v9232_v12 }
0x12f9   :  { %9237 = vrcp.f32 %v6673_v14 }
0x12fa   :  { %9239 = vrcp.f32 %v6674_v23 }
0x1304   :  { %v9234_v25 = vpop.eup %9233 }
0x1305   :  { %v9236_v17 = vpop.eup %9235  ;;  %v6681_v22 = vmul.f32 %v9234_v25, %v10663_v49 }
0x1306   :  { %v9238_v31 = vpop.eup %9237  ;;  %v6682_v36 = vmul.f32 %v9236_v17, %v10667_v57 }
0x1307   :  { %v9240_v18 = vpop.eup %9239  ;;  %v6715_v0 = vmul.f32 %v9238_v31, %v10672_v20 }
0x1308   :  { %v6716_v37 = vmul.f32 %v9240_v18, %v10674_v42 }
0x1362   :  { %v6686_v40 = vpop.permute.xlu0 %6685 }
0x1363   :  { %v6691_v61 = vmul.f32 %v9234_v25, %v6686_v40 }
0x1364   :  { %v6688_v52 = vpop.permute.xlu1 %6687 }
0x1365   :  { %6695 = vrot.lane.b32.xlu0 %v6691_v61, %s9333_s16  ;;  %v6692_v24 = vmul.f32 %v9236_v17, %v6688_v52 }
0x1366   :  { %v6720_v8 = vpop.permute.xlu0 %6719 }
0x1367   :  { %6697 = vrot.lane.b32.xlu1 %v6692_v24, %s9333_s16  ;;  %v6725_v45 = vmul.f32 %v9238_v31, %v6720_v8 }
0x1368   :  { %v6722_v30 = vpop.permute.xlu1 %6721 }
0x1369   :  { %v6726_v54 = vmul.f32 %v9240_v18, %v6722_v30  ;;  %6729 = vrot.lane.b32.xlu0 %v6725_v45, %s9333_s16 }
0x136b   :  { %6731 = vrot.lane.b32.xlu1 %v6726_v54, %s9333_s16 }
0x13d7   :  { %v6696_v63 = vpop.permute.xlu0 %6695 }
0x13d8   :  { %v10825_v34 = vadd.f32 %v6696_v63, %v6681_v22 }
0x13d9   :  { %v6698_v13 = vpop.permute.xlu1 %6697 }
0x13da   :  { %9241 = vtanh.f32 %v10825_v34  ;;  %v10829_v1 = vadd.f32 %v6698_v13, %v6682_v36 }
0x13db   :  { %v6730_v47 = vpop.permute.xlu0 %6729 }
0x13dc   :  { %9243 = vtanh.f32 %v10829_v1  ;;  %v10834_v12 = vadd.f32 %v6730_v47, %v6715_v0 }
0x13dd   :  { %v6732_v49 = vpop.permute.xlu1 %6731 }
0x13de   :  { %v10836_v14 = vadd.f32 %v6732_v49, %v6716_v37  ;;  %9245 = vtanh.f32 %v10834_v12 }
0x13e0   :  { %9247 = vtanh.f32 %v10836_v14 }
0x13e7   :  { %v9242_v57 = vpop.eup %9241 }
0x13e8   :  { %6707 = vrot.lane.b32.xlu0 %v9242_v57, %s9332_s2 }
0x13e9   :  { %v9244_v23 = vpop.eup %9243 }
0x13ea   :  { %6709 = vrot.lane.b32.xlu1 %v9244_v23, %s9332_s2 }
0x13eb   :  { %v9246_v40 = vpop.eup %9245 }
0x13ec   :  { %6741 = vrot.lane.b32.xlu0 %v9246_v40, %s9332_s2 }
0x13ed   :  { %v9248_v20 = vpop.eup %9247 }
0x13ee   :  { %6743 = vrot.lane.b32.xlu1 %v9248_v20, %s9332_s2 }
0x145a   :  { %v6708_v42 = vpop.permute.xlu0 %6707 }
0x145b   :  { %v10844_v52 = vmul.f32 %v9234_v25, %v6708_v42 }
0x145c   :  { %v6710_v61 = vpop.permute.xlu1 %6709 }
0x145d   :  { %v10846_v24 = vmul.f32 %v9236_v17, %v6710_v61  ;;  %v6787_v61 = vld [vmem:[#allocation2] ss:$8 sm:$0x3] }
0x145e   :  { %v6742_v45 = vpop.permute.xlu0 %6741 }
0x145f   :  { %v6795_v8 = vcombine.low %v10844_v52, %v10846_v24  ;;  %v10851_v22 = vmul.f32 %v9238_v31, %v6742_v45  ;;  %v6788_v45 = vld [vmem:[#allocation2 + $0x10] ss:$8 sm:$0x3] }
0x1460   :  { %v6744_v54 = vpop.permute.xlu1 %6743 }
0x1461   :  { %v6802_v30 = vrot.slane %v6795_v8, %v9840_v21  ;;  %v10853_v63 = vmul.f32 %v9240_v18, %v6744_v54 }
0x1463   :  { %v6809_v36 = vrot.slane %v6802_v30, %v9840_v21  ;;  %v6813_v13 = vcombine.low %v10851_v22, %v10853_v63 }
0x1465   :  { %6810 = vrot.lane.b32.xlu0 %v6809_v36, %s9333_s16  ;;  %v6820_v25 = vrot.slane %v6813_v13, %v9840_v21  ;;  %v6791_v13 = vrot.slane %v6787_v61, 1 }
0x1467   :  { %v6827_v17 = vrot.slane %v6820_v25, %v9840_v21  ;;  %v6792_v25 = vrot.slane %v6788_v45, 1  ;;  %v11699_v45 = vld [vmem:[#allocation47_spill] sm:$0xff] }
0x1469   :  { %6828 = vrot.lane.b32.xlu1 %v6827_v17, %s9332_s2 }
0x14d7   :  { %v6811_v0 = vpop.permute.xlu0 %6810 }
0x14db   :  { %v6829_v47 = vpop.permute.xlu1 %6828 }
0x14dc   :  { %v6831_v31 = vsel %vm1524_vm1, %v6811_v0, %v6829_v47 }
0x14dd   :  { %v6833_v18 = vsel %vm636_vm2, %v6831_v31, 0 }
0x14de   :  { %v10864_v37 = vand.u32 4294901760, %v6833_v18 }
0x14e0   :  { %v6917_v49 = vsub.f32 %v6833_v18, %v10864_v37  ;;  %7073 = vmatmul.mubr.f32.vlgmr.msra.gmra.mxu1 %v10864_v37  ;;  %v6785_v18 = vld [vmem:[#allocation2 + $0x7] ss:$8 sm:$0x3] }
0x14e1   :  { %7203 = vmatpush1.msra.mxu1 %v9456_v43  ;;  %7264 = vmatprep.mubr.f32.mxu1 %v11472_v41 }
0x14e2   :  { %v6918_v57 = vand.u32 4294901760, %v6917_v49  ;;  %7205 = vmatprep.subr.mxu1 %v9464_v46 }
0x14e3   :  { %7207 = vmatpush1.msra.mxu1 %v9468_v48 }
0x14e4   :  { %7209 = vmatprep.subr.mxu1 %v9479_v53  ;;  %v6919_v23 = vsub.f32 %v6917_v49, %v6918_v57 }
0x14e5   :  { %7211 = vmatpush1.msra.mxu1 %v9483_v55 }
0x14e6   :  { %7213 = vmatprep.subr.mxu1 %v9489_v58  ;;  %v6920_v40 = vand.u32 4294901760, %v6919_v23 }
0x14e7   :  { %7215 = vmatpush1.msra.mxu1 %v9499_v62 }
0x14e8   :  { %7217 = vmatprep.subr.mxu1 %v9509_v3  ;;  %6921 = vmatmul.mubr.f32.vlgmr.msra.gmra.mxu0 %v6920_v40 }
0x14e9   :  { %7100 = vmatpush1.msra.mxu0 %v9472_v50  ;;  %7219 = vmatpush1.msra.mxu1 %v9520_v11  ;;  %v11689_v50 = vld [vmem:[#allocation21_spill] sm:$0xff] }
0x14ea   :  { %7103 = vmatprep.subr.mxu0 %v9486_v56  ;;  %7221 = vmatprep.subr.mxu1 %v9531_v19  ;;  %v11692_v56 = vld [vmem:[#allocation26_spill] sm:$0xff] }
0x14eb   :  { %7106 = vmatpush1.msra.mxu0 %v9492_v59  ;;  %7223 = vmatpush1.msra.mxu1 %v9540_v16  ;;  %v11694_v59 = vld [vmem:[#allocation29_spill] sm:$0xff] }
0x14ec   :  { %7109 = vmatprep.subr.mxu0 %v9507_v2  ;;  %7225 = vmatprep.subr.mxu1 %v9553_v26  ;;  %v11696_v2 = vld [vmem:[#allocation34_spill] sm:$0xff] }
0x14ed   :  { %7112 = vmatpush1.msra.mxu0 %v9518_v9  ;;  %7227 = vmatpush1.msra.mxu1 %v9566_v29 }
0x14ee   :  { %7115 = vmatprep.subr.mxu0 %v9529_v15  ;;  %7229 = vmatprep.subr.mxu1 %v9585_v6 }
0x14ef   :  { %7118 = vmatpush1.msra.mxu0 %v9538_v4  ;;  %7231 = vmatpush1.msra.mxu1 %v9597_v10 }
0x14f0   :  { %7121 = vmatprep.subr.mxu0 %v9551_v5  ;;  %7268 = vmatmul.mubr.f32.vlgmr.msra.gmra.mxu1 %v6918_v57 }
0x14f1   :  { %7411 = vmatprep.subr.mxu1 %v9454_v38  ;;  %7124 = vmatpush1.msra.mxu0 %v9564_v28  ;;  %v11685_v38 = vld [vmem:[#allocation15_spill] sm:$0xff] }
0x14f2   :  { %7413 = vmatpush1.msra.mxu1 %v9456_v43  ;;  %7127 = vmatprep.subr.mxu0 %v9576_v32  ;;  %v11686_v43 = vld [vmem:[#allocation17_spill] sm:$0xff] }
0x14f3   :  { %7415 = vmatprep.subr.mxu1 %v9464_v46  ;;  %7130 = vmatpush1.msra.mxu0 %v9588_v35  ;;  %v11687_v46 = vld [vmem:[#allocation18_spill] sm:$0xff] }
0x14f4   :  { %7417 = vmatpush1.msra.mxu1 %v9468_v48  ;;  %7133 = vmatprep.subr.mxu0 %v9600_v39  ;;  %v11688_v48 = vld [vmem:[#allocation19_spill] sm:$0xff] }
0x14f5   :  { %7419 = vmatprep.subr.mxu1 %v9479_v53  ;;  %7136 = vmatpush1.msra.mxu0 %v9612_v44  ;;  %v11690_v53 = vld [vmem:[#allocation22_spill] sm:$0xff] }
0x14f6   :  { %7421 = vmatpush1.msra.mxu1 %v9483_v55  ;;  %7139 = vmatprep.subr.mxu0 %v9631_v60  ;;  %v11691_v55 = vld [vmem:[#allocation24_spill] sm:$0xff] }
0x14f7   :  { %7423 = vmatprep.subr.mxu1 %v9489_v58  ;;  %7142 = vmatpush1.msra.mxu0 %v9643_v7  ;;  %v11693_v58 = vld [vmem:[#allocation27_spill] sm:$0xff] }
0x14f8   :  { %7175 = vmatprep.mubr.f32.mxu0 %v11472_v41  ;;  %7425 = vmatpush1.msra.mxu1 %v9499_v62  ;;  %v11695_v62 = vld [vmem:[#allocation31_spill] sm:$0xff] }
0x14f9   :  { %7178 = vmatmul.mubr.f32.vlgmr.msra.gmra.mxu0 %v6917_v49  ;;  %7293 = vmatprep.subr.mxu0 %v11482_v27 }
0x14fa   :  { %7427 = vmatprep.subr.mxu1 %v9509_v3  ;;  %7297 = vmatpush1.msra.mxu0 %v11483_v51  ;;  %v11697_v3 = vld [vmem:[#allocation36_spill] sm:$0xff] }
0x14fb   :  { %7429 = vmatpush1.msra.mxu1 %v9520_v11  ;;  %7301 = vmatprep.subr.mxu0 %v11484_v33 }
0x14fc   :  { %7431 = vmatprep.subr.mxu1 %v9531_v19  ;;  %7305 = vmatpush1.msra.mxu0 %v11685_v38 }
0x14fd   :  { %7433 = vmatpush1.msra.mxu1 %v9540_v16  ;;  %7309 = vmatprep.subr.mxu0 %v11686_v43 }
0x14fe   :  { %7435 = vmatprep.subr.mxu1 %v9553_v26  ;;  %7313 = vmatpush1.msra.mxu0 %v11687_v46 }
0x14ff   :  { %7437 = vmatpush1.msra.mxu1 %v9566_v29  ;;  %7317 = vmatprep.subr.mxu0 %v11688_v48 }
0x1500   :  { %7439 = vmatprep.subr.mxu1 %v9585_v6  ;;  %7321 = vmatpush1.msra.mxu0 %v11689_v50 }
0x1501   :  { %7441 = vmatpush1.msra.mxu1 %v9597_v10  ;;  %7474 = vmatprep.mubr.f32.mxu1 %v11472_v41 }
0x1502   :  { %7325 = vmatprep.subr.mxu0 %v11690_v53  ;;  %7476 = vmatmul.mubr.f32.vlgmr.msra.gmra.mxu1 %v10864_v37 }
0x1503   :  { %7329 = vmatpush1.msra.mxu0 %v11691_v55  ;;  %7386 = vmatprep.mubr.f32.mxu0 %v11472_v41 }
0x1504   :  { %7333 = vmatprep.subr.mxu0 %v11692_v56 }
0x1505   :  { %7337 = vmatpush1.msra.mxu0 %v11693_v58 }
0x1506   :  { %7341 = vmatprep.subr.mxu0 %v11694_v59 }
0x1507   :  { %7345 = vmatpush1.msra.mxu0 %v11695_v62 }
0x1508   :  { %7349 = vmatprep.subr.mxu0 %v11696_v2 }
0x1509   :  { %7353 = vmatpush1.msra.mxu0 %v11697_v3 }
0x150a   :  { %7388 = vmatmul.mubr.f32.vlgmr.msra.gmra.mxu0 %v10864_v37  ;;  %v6786_v37 = vld [vmem:[#allocation2 + $0x17] ss:$8 sm:$0x3] }
0x15a0   :  { %v7074_v11 = vpop.f32.mrf.mxu1 }
0x15a2   :  { %v7076_v4 = vpop.f32.mrf.mxu1 }
0x15a8   :  { %v6922_v9 = vpop.f32.mrf.mxu0 }
0x15a9   :  { %v7075_v16 = vadd.f32 %v7074_v11, %v6922_v9 }
0x15aa   :  { %v6924_v15 = vpop.f32.mrf.mxu0 }
0x15ab   :  { %v7077_v28 = vadd.f32 %v7076_v4, %v6924_v15 }
0x15b0   :  { %v7269_v5 = vpop.f32.mrf.mxu1 }
0x15b2   :  { %v7271_v6 = vpop.f32.mrf.mxu1 }
0x15b9   :  { %v7179_v19 = vpop.f32.mrf.mxu0 }
0x15ba   :  { %v7180_v29 = vadd.f32 %v7179_v19, %v7075_v16 }
0x15bb   :  { %v7181_v26 = vpop.f32.mrf.mxu0 }
0x15bc   :  { %v7182_v32 = vadd.f32 %v7181_v26, %v7077_v28  ;;  %v7270_v35 = vadd.f32 %v7269_v5, %v7180_v29 }
0x15be   :  { %v7272_v60 = vadd.f32 %v7271_v6, %v7182_v32 }
0x15c2   :  { %v7477_v10 = vpop.f32.mrf.mxu1 }
0x15c4   :  { %v7479_v51 = vpop.f32.mrf.mxu1 }
0x15ca   :  { %v7389_v39 = vpop.f32.mrf.mxu0 }
0x15cb   :  { %v7390_v44 = vadd.f32 %v7389_v39, %v7270_v35 }
0x15cc   :  { %v7391_v7 = vpop.f32.mrf.mxu0 }
0x15cd   :  { %v7478_v41 = vadd.f32 %v7477_v10, %v7390_v44  ;;  %v7392_v27 = vadd.f32 %v7391_v7, %v7272_v60 }
0x15cf   :  { %v7480_v33 = vadd.f32 %v7479_v51, %v7392_v27  ;;  %v7489_v20 = vrot.slane %v7478_v41, %v9840_v21 }
0x15d1   :  { %v7516_v42 = vrot.slane %v7480_v33, %v9840_v21  ;;  %v7490_v54 = vcombine.high %v7489_v20, %v7489_v20  ;;  %v7497_v17 = vrot.slane %v7489_v20, %v9840_v21 }
0x15d3   :  { %v7517_v8 = vcombine.high %v7516_v42, %v7516_v42  ;;  %v7524_v30 = vrot.slane %v7516_v42, %v9840_v21  ;;  %v7504_v47 = vrot.slane %v7490_v54, %v9840_v21  ;;  %v7507_v49 = vadd.f32 %v7497_v17, %v6785_v18 }
0x15d5   :  { %v7531_v36 = vrot.slane %v7517_v8, %v9840_v21  ;;  %v7534_v0 = vadd.f32 %v7524_v30, %v6791_v13  ;;  %v7508_v57 = vadd.f32 %v7504_v47, %v6786_v37  ;;  %v8806_v48 = vmul.f32 -1.442695, %v7507_v49  ;;  %v11700_v30 = vld [vmem:[#allocation14_spill] sm:$0xff] }
0x15d7   :  { %v7535_v31 = vadd.f32 %v7531_v36, %v6792_v25  ;;  %9249 = vtanh.f32 %v7534_v0  ;;  %v8808_v21 = vmul.f32 -1.442695, %v7534_v0  ;;  %v8807_v50 = vmul.f32 -1.442695, %v7508_v57  ;;  %v11701_v36 = vld [vmem:[#allocation52_spill] sm:$0xff] }
0x15d8   :  { %v11702_v25 = vld [vmem:[#allocation56_spill] sm:$0xff] }
0x15d9   :  { %9251 = vtanh.f32 %v7535_v31  ;;  %v8809_v46 = vmul.f32 -1.442695, %v7535_v31  ;;  %v11703_v0 = vld [vmem:[#allocation60_spill] sm:$0xff] }
0x15da   :  { %9253 = vtanh.f32 %v7507_v49  ;;  %v11704_v31 = vld [vmem:[#allocation64_spill] sm:$0xff]  ;;  %v11705_v49 = vld [vmem:[#allocation49_spill] sm:$0xff] }
0x15db   :  { %9255 = vtanh.f32 %v7508_v57 }
0x15dc   :  { %9257 = vpow2.f32 %v8808_v21  ;;  %v11708_v21 = vld [vmem:[#allocation53_spill] sm:$0xff] }
0x15dd   :  { %9259 = vpow2.f32 %v8809_v46  ;;  %v11709_v46 = vld [vmem:[#allocation65_spill] sm:$0xff] }
0x15de   :  { %9261 = vpow2.f32 %v8806_v48 }
0x15df   :  { %9263 = vpow2.f32 %v8807_v50  ;;  %v11710_v50 = vld [vmem:[#allocation61_spill] sm:$0xff] }
0x15e4   :  { %v9250_v23 = vpop.eup %9249 }
0x15e5   :  { %7602 = vrot.lane.b32.xlu0 %v9250_v23, %s9332_s2  ;;  %v11706_v23 = vld [vmem:[#allocation48_spill] sm:$0xff] }
0x15e6   :  { %v9252_v40 = vpop.eup %9251 }
0x15e7   :  { %7604 = vrot.lane.b32.xlu1 %v9252_v40, %s9332_s2  ;;  %v9254_v38 = vpop.eup %9253 }
0x15e8   :  { %v9256_v43 = vpop.eup %9255 }
0x15e9   :  { %7568 = vrot.lane.b32.xlu0 %v9254_v38, %s9332_s2  ;;  %v9258_v53 = vpop.eup %9257  ;;  %v11707_v38 = vld [vmem:[#allocation57_spill] sm:$0xff] }
0x15ea   :  { %v9260_v55 = vpop.eup %9259  ;;  %v7556_v56 = vadd.f32 1.0, %v9258_v53 }
0x15eb   :  { %7570 = vrot.lane.b32.xlu1 %v9256_v43, %s9332_s2  ;;  %v9262_v58 = vpop.eup %9261  ;;  %v7557_v59 = vadd.f32 1.0, %v9260_v55  ;;  %v11711_v55 = vld [vmem:[#allocation12_spill] sm:$0xff] }
0x15ec   :  { %v9264_v62 = vpop.eup %9263  ;;  %v7542_v2 = vadd.f32 1.0, %v9262_v58  ;;  %9265 = vrcp.f32 %v7556_v56 }
0x15ed   :  { %v7543_v3 = vadd.f32 1.0, %v9264_v62  ;;  %9267 = vrcp.f32 %v7557_v59  ;;  %v11712_v59 = vld [vmem:[#allocation54_spill] sm:$0xff] }
0x15ee   :  { %9269 = vrcp.f32 %v7542_v2  ;;  %v11713_v2 = vld [vmem:[#allocation45_spill] sm:$0xff] }
0x15ef   :  { %9271 = vrcp.f32 %v7543_v3 }
0x15f9   :  { %v10946_v9 = vpop.eup %9265 }
0x15fa   :  { %v10948_v15 = vpop.eup %9267  ;;  %v7598_v35 = vmul.f32 %v10946_v9, %v10834_v12 }
0x15fb   :  { %v10953_v5 = vpop.eup %9269  ;;  %v7599_v39 = vmul.f32 %v10948_v15, %v10836_v14 }
0x15fc   :  { %v10956_v28 = vpop.eup %9271  ;;  %v7564_v41 = vmul.f32 %v10953_v5, %v10825_v34  ;;  %v11698_v34 = vld [vmem:[#allocation44_spill] sm:$0xff] }
0x15fd   :  { %v7565_v51 = vmul.f32 %v10956_v28, %v10829_v1  ;;  %v1461_v1 = vrot.slane %v11699_v45, %v11698_v34  ;;  %v2349_v54 = vrot.slane %v11700_v30, %v11698_v34  ;;  %v3236_v13 = vrot.slane %v11701_v36, %v11698_v34 }
0x15fe   :  { %v4123_v17 = vrot.slane %v11702_v25, %v11698_v34  ;;  %v5006_v47 = vrot.slane %v11703_v0, %v11698_v34  ;;  %v5889_v18 = vrot.slane %v11704_v31, %v11698_v34  ;;  %v6772_v37 = vrot.slane %v10851_v22, %v11698_v34 }
0x15ff   :  { %v2353_v57 = vrot.slane %v11705_v49, %v11698_v34  ;;  %v1465_v40 = vrot.slane %v11706_v23, %v11698_v34  ;;  %v4127_v43 = vrot.slane %v11707_v38, %v11698_v34  ;;  %v3240_v22 = vrot.slane %v11708_v21, %v11698_v34 }
0x1600   :  { %v5893_v48 = vrot.slane %v11709_v46, %v11698_v34  ;;  %v5010_v53 = vrot.slane %v11710_v50, %v11698_v34  ;;  %v2331_v56 = vrot.slane %v11711_v55, %v11698_v34  ;;  %v6776_v58 = vrot.slane %v10853_v63, %v11698_v34 }
0x1601   :  { %v4105_v62 = vrot.slane %v11712_v59, %v11698_v34  ;;  %v1442_v3 = vrot.slane %v11713_v2, %v11698_v34  ;;  %v11721_v59 = vld [vmem:[#allocation55_spill] sm:$0xff] }
0x1657   :  { %v7603_v11 = vpop.permute.xlu0 %7602 }
0x1658   :  { %v7608_v19 = vmul.f32 %v10946_v9, %v7603_v11  ;;  %v11714_v11 = vld [vmem:[#allocation50_spill] sm:$0xff] }
0x1659   :  { %v7605_v4 = vpop.permute.xlu1 %7604 }
0x165a   :  { %v7609_v16 = vmul.f32 %v10948_v15, %v7605_v4  ;;  %7612 = vrot.lane.b32.xlu0 %v7608_v19, %s9333_s16  ;;  %v3218_v19 = vrot.slane %v11714_v11, %v11698_v34  ;;  %v11715_v4 = vld [vmem:[#allocation58_spill] sm:$0xff]  ;;  %v11722_v11 = vld [vmem:[#allocation63_spill] sm:$0xff] }
0x165b   :  { %v7569_v26 = vpop.permute.xlu0 %7568  ;;  %v4988_v63 = vrot.slane %v11715_v4, %v11698_v34 }
0x165c   :  { %7614 = vrot.lane.b32.xlu1 %v7609_v16, %s9333_s16  ;;  %v7574_v29 = vmul.f32 %v10953_v5, %v7569_v26  ;;  %v6754_v16 = vrot.slane %v10844_v52, %v11698_v34  ;;  %v11716_v26 = vld [vmem:[#allocation46_spill] sm:$0xff]  ;;  %v6758_v52 = vrot.slane %v10846_v24, %v11698_v34 }
0x165d   :  { %v7571_v32 = vpop.permute.xlu1 %7570  ;;  %v7677_v24 = vld [vmem:[%s11342_s4 + $0x28] sm:$0xff] }
0x165e   :  { %v7575_v6 = vmul.f32 %v10956_v28, %v7571_v32  ;;  %7578 = vrot.lane.b32.xlu0 %v7574_v29, %s9333_s16  ;;  %v1446_v29 = vrot.slane %v11716_v26, %v11698_v34  ;;  %v11717_v32 = vld [vmem:[#allocation51_spill] sm:$0xff] }
0x1660   :  { %7580 = vrot.lane.b32.xlu1 %v7575_v6, %s9333_s16  ;;  %v3222_v6 = vrot.slane %v11717_v32, %v11698_v34 }
0x16cc   :  { %v7613_v10 = vpop.permute.xlu0 %7612 }
0x16cd   :  { %v7618_v44 = vadd.f32 %v7613_v10, %v7598_v35  ;;  %v11718_v35 = vld [vmem:[#allocation59_spill] sm:$0xff] }
0x16ce   :  { %v7615_v60 = vpop.permute.xlu1 %7614  ;;  %v4992_v10 = vrot.slane %v11718_v35, %v11698_v34 }
0x16cf   :  { %v7619_v7 = vadd.f32 %v7615_v60, %v7599_v39  ;;  %9273 = vtanh.f32 %v7618_v44  ;;  %v7679_v39 = vld [vmem:[%s11342_s4 + $0x38] sm:$0xff]  ;;  %v7678_v60 = vld [vmem:[%s11342_s4 + $0x30] sm:$0xff] }
0x16d0   :  { %v7579_v27 = vpop.permute.xlu0 %7578  ;;  %v11049_v44 = vand.u32 4294901760, %v7679_v39 }
0x16d1   :  { %9275 = vtanh.f32 %v7619_v7  ;;  %v7584_v33 = vadd.f32 %v7579_v27, %v7564_v41  ;;  %v11057_v41 = vand.u32 4294901760, %v7678_v60 }
0x16d2   :  { %v7581_v20 = vpop.permute.xlu1 %7580  ;;  %v11055_v7 = vsub.f32 %v7679_v39, %v11049_v44  ;;  %8883 = vmatprep.subr.mxu0 %v11049_v44 }
0x16d3   :  { %v7585_v42 = vadd.f32 %v7581_v20, %v7565_v51  ;;  %9277 = vtanh.f32 %v7584_v33  ;;  %8884 = vmatpush3.msra.mxu0 %v11049_v44  ;;  %v11068_v51 = vsub.f32 %v7678_v60, %v11057_v41  ;;  %v11070_v33 = vand.u32 4294901760, %v7677_v24  ;;  %v7676_v20 = vld [vmem:[%s11342_s4 + $0x20] sm:$0xff] }
0x16d4   :  { %v11065_v27 = vand.u32 4294901760, %v11055_v7  ;;  %8885 = vmatprep.subr.mxu0 %v11057_v41 }
0x16d5   :  { %9279 = vtanh.f32 %v7585_v42  ;;  %8886 = vmatpush3.msra.mxu0 %v11057_v41 }
0x16d6   :  { %v7803_v42 = vsub.f32 %v11055_v7, %v11065_v27  ;;  %8887 = vmatprep.subr.mxu0 %v11070_v33 }
0x16d7   :  { %8888 = vmatpush3.msra.mxu0 %v11070_v33 }
0x16dc   :  { %v9274_v12 = vpop.eup %9273 }
0x16dd   :  { %7624 = vrot.lane.b32.xlu0 %v9274_v12, %s9332_s2  ;;  %v11080_v12 = vand.u32 4294901760, %v11068_v51 }
0x16de   :  { %v9276_v61 = vpop.eup %9275 }
0x16df   :  { %7626 = vrot.lane.b32.xlu1 %v9276_v61, %s9332_s2  ;;  %v11083_v61 = vsub.f32 %v7677_v24, %v11070_v33  ;;  %v7810_v45 = vsub.f32 %v11068_v51, %v11080_v12 }
0x16e0   :  { %v9278_v14 = vpop.eup %9277 }
0x16e1   :  { %7590 = vrot.lane.b32.xlu0 %v9278_v14, %s9332_s2  ;;  %v11085_v14 = vand.u32 4294901760, %v7676_v20 }
0x16e2   :  { %v9280_v8 = vpop.eup %9279 }
0x16e3   :  { %7592 = vrot.lane.b32.xlu1 %v9280_v8, %s9332_s2  ;;  %v7804_v8 = vand.u32 4294901760, %v7803_v42  ;;  %v11095_v30 = vsub.f32 %v7676_v20, %v11085_v14  ;;  %8889 = vmatprep.subr.mxu0 %v11085_v14 }
0x16e4   :  { %8890 = vmatpush3.msra.mxu0 %v11085_v14 }
0x16e5   :  { %1466 = vrot.lane.b32.xlu0 %v1461_v1, %s9333_s16  ;;  %v11092_v1 = vand.u32 4294901760, %v11083_v61  ;;  %8894 = vmatprep.subr.mxu1 %v7804_v8 }
0x16e6   :  { %8905 = vmatprep.subr.mxu0 %v11055_v7  ;;  %8895 = vmatpush3.msra.mxu1 %v7804_v8 }
0x16e7   :  { %2354 = vrot.lane.b32.xlu1 %v2349_v54, %s9333_s16  ;;  %v7811_v54 = vand.u32 4294901760, %v7810_v45  ;;  %v7817_v36 = vsub.f32 %v11083_v61, %v11092_v1 }
0x16e9   :  { %3241 = vrot.lane.b32.xlu0 %v3236_v13, %s9333_s16  ;;  %v11102_v13 = vand.u32 4294901760, %v11095_v30  ;;  %8896 = vmatprep.subr.mxu1 %v7811_v54 }
0x16ea   :  { %8897 = vmatpush3.msra.mxu1 %v7811_v54 }
0x16eb   :  { %4128 = vrot.lane.b32.xlu1 %v4123_v17, %s9333_s16  ;;  %v7818_v17 = vand.u32 4294901760, %v7817_v36  ;;  %v7824_v0 = vsub.f32 %v11095_v30, %v11102_v13 }
0x16ed   :  { %5011 = vrot.lane.b32.xlu0 %v5006_v47, %s9333_s16  ;;  %8898 = vmatprep.subr.mxu1 %v7818_v17 }
0x16ee   :  { %8899 = vmatpush3.msra.mxu1 %v7818_v17 }
0x16ef   :  { %5894 = vrot.lane.b32.xlu1 %v5889_v18, %s9333_s16  ;;  %v7825_v18 = vand.u32 4294901760, %v7824_v0 }
0x16f1   :  { %6777 = vrot.lane.b32.xlu0 %v6772_v37, %s9333_s16  ;;  %8900 = vmatprep.subr.mxu1 %v7825_v18 }
0x16f2   :  { %8901 = vmatpush3.msra.mxu1 %v7825_v18 }
0x16f3   :  { %2356 = vrot.lane.b32.xlu1 %v2353_v57, %s9333_s16  ;;  %8916 = vmatprep.subr.mxu1 %v11049_v44 }
0x16f5   :  { %1468 = vrot.lane.b32.xlu0 %v1465_v40, %s9333_s16 }
0x16f7   :  { %4130 = vrot.lane.b32.xlu1 %v4127_v43, %s9333_s16 }
0x16f9   :  { %3243 = vrot.lane.b32.xlu0 %v3240_v22, %s9333_s16 }
0x16fb   :  { %5896 = vrot.lane.b32.xlu1 %v5893_v48, %s9333_s16 }
0x16fd   :  { %5013 = vrot.lane.b32.xlu0 %v5010_v53, %s9333_s16 }
0x16ff   :  { %2336 = vrot.lane.b32.xlu1 %v2331_v56, %s9333_s16 }
0x1701   :  { %6779 = vrot.lane.b32.xlu0 %v6776_v58, %s9333_s16 }
0x1703   :  { %4110 = vrot.lane.b32.xlu1 %v4105_v62, %s9333_s16  ;;  %v4109_v62 = vrot.slane %v11721_v59, %v11698_v34 }
0x1705   :  { %1447 = vrot.lane.b32.xlu0 %v1442_v3, %s9333_s16 }
0x1709   :  { %3223 = vrot.lane.b32.xlu0 %v3218_v19, %s9333_s16  ;;  %v5875_v19 = vrot.slane %v11722_v11, %v11698_v34 }
0x170d   :  { %4993 = vrot.lane.b32.xlu0 %v4988_v63, %s9333_s16 }
0x1711   :  { %6759 = vrot.lane.b32.xlu0 %v6754_v16, %s9333_s16 }
0x1715   :  { %1449 = vrot.lane.b32.xlu0 %v1446_v29, %s9333_s16 }
0x1719   :  { %3225 = vrot.lane.b32.xlu0 %v3222_v6, %s9333_s16 }
0x171d   :  { %4995 = vrot.lane.b32.xlu0 %v4992_v10, %s9333_s16 }
0x1721   :  { %6761 = vrot.lane.b32.xlu0 %v6758_v52, %s9333_s16 }
0x174f   :  { %v7625_v25 = vpop.permute.xlu0 %7624 }
0x1750   :  { %v7630_v47 = vmul.f32 %v10946_v9, %v7625_v25 }
0x1751   :  { %v7627_v31 = vpop.permute.xlu1 %7626 }
0x1752   :  { %v7655_v37 = vrot.slane %v7630_v47, %v11698_v34  ;;  %v7631_v49 = vmul.f32 %v10948_v15, %v7627_v31  ;;  %v11719_v15 = vld [vmem:[#allocation62_spill] sm:$0xff]  ;;  %v7675_v31 = vld [vmem:[%s11342_s4 + $0x18] sm:$0xff] }
0x1753   :  { %v7591_v57 = vpop.permute.xlu0 %7590  ;;  %v5871_v43 = vrot.slane %v11719_v15, %v11698_v34  ;;  %v7673_v15 = vld [vmem:[%s11342_s4 + $0x8] sm:$0xff] }
0x1754   :  { %7660 = vrot.lane.b32.xlu1 %v7655_v37, %s9333_s16  ;;  %v7659_v9 = vrot.slane %v7631_v49, %v11698_v34  ;;  %v7596_v21 = vmul.f32 %v10953_v5, %v7591_v57  ;;  %v11720_v5 = vld [vmem:[#allocation13_spill] sm:$0xff]  ;;  %v11171_v57 = vand.u32 4294901760, %v7675_v31 }
0x1755   :  { %v7593_v23 = vpop.permute.xlu1 %7592  ;;  %v2335_v55 = vrot.slane %v11720_v5, %v11698_v34  ;;  %v11198_v5 = vand.u32 4294901760, %v7673_v15 }
0x1756   :  { %v7637_v48 = vrot.slane %v7596_v21, %v11698_v34  ;;  %v7597_v4 = vmul.f32 %v10956_v28, %v7593_v23  ;;  %v7674_v23 = vld [vmem:[%s11342_s4 + $0x10] sm:$0xff] }
0x1757   :  { %v1467_v40 = vpop.permute.xlu0 %1466  ;;  %v11215_v11 = vsub.f32 %v7673_v15, %v11198_v5 }
0x1758   :  { %1472 = vst.msk [vmem:[#allocation4 + $0x7] sm:$0x1] %vm1453_vm3, %v1467_v40  ;;  %7662 = vrot.lane.b32.xlu1 %v7659_v9, %s9333_s16  ;;  %v7641_v26 = vrot.slane %v7597_v4, %v11698_v34 }
0x1759   :  { %v2355_v38 = vpop.permute.xlu1 %2354 }
0x175a   :  { %2360 = vst.msk [vmem:[#allocation4 + $0x6] sm:$0x1] %vm1453_vm3, %v2355_v38 }
0x175b   :  { %v3242_v22 = vpop.permute.xlu0 %3241 }
0x175c   :  { %3247 = vst.msk [vmem:[#allocation4 + $0x5] sm:$0x1] %vm1453_vm3, %v3242_v22  ;;  %5876 = vrot.lane.b32.xlu1 %v5871_v43, %s9333_s16  ;;  %v11187_v22 = vand.u32 4294901760, %v7674_v23 }
0x175d   :  { %v4129_v46 = vpop.permute.xlu1 %4128 }
0x175e   :  { %4134 = vst.msk [vmem:[#allocation4 + $0x4] sm:$0x1] %vm1453_vm3, %v4129_v46  ;;  %v11191_v46 = vsub.f32 %v7675_v31, %v11171_v57 }
0x175f   :  { %v5012_v50 = vpop.permute.xlu0 %5011 }
0x1760   :  { %5017 = vst.msk [vmem:[#allocation4 + $0x3] sm:$0x1] %vm1453_vm3, %v5012_v50  ;;  %7642 = vrot.lane.b32.xlu1 %v7637_v48, %s9333_s16  ;;  %v7672_v48 = vld [vmem:[%s11342_s4] sm:$0xff] }
0x1761   :  { %v5895_v53 = vpop.permute.xlu1 %5894  ;;  %v11206_v59 = vand.u32 4294901760, %v7672_v48 }
0x1762   :  { %5900 = vst.msk [vmem:[#allocation4 + $0x2] sm:$0x1] %vm1453_vm3, %v5895_v53 }
0x1763   :  { %v6778_v56 = vpop.permute.xlu0 %6777  ;;  %v11225_v4 = vsub.f32 %v7672_v48, %v11206_v59 }
0x1764   :  { %6783 = vst.msk [vmem:[#allocation4 + $0x1] sm:$0x1] %vm1453_vm3, %v6778_v56  ;;  %2338 = vrot.lane.b32.xlu1 %v2335_v55, %s9333_s16 }
0x1765   :  { %v2357_v58 = vpop.permute.xlu1 %2356 }
0x1766   :  { %2361 = vst.msk [vmem:[#allocation4 + $0xe] sm:$0x1] %vm1453_vm3, %v2357_v58  ;;  %v11204_v58 = vsub.f32 %v7674_v23, %v11187_v22 }
0x1767   :  { %v1469_v2 = vpop.permute.xlu0 %1468 }
0x1768   :  { %1473 = vst.msk [vmem:[#allocation4 + $0xf] sm:$0x1] %vm1453_vm3, %v1469_v2  ;;  %4112 = vrot.lane.b32.xlu1 %v4109_v62, %s9333_s16  ;;  %v11210_v62 = vand.u32 4294901760, %v11191_v46 }
0x1769   :  { %v4131_v3 = vpop.permute.xlu1 %4130 }
0x176a   :  { %4135 = vst.msk [vmem:[#allocation4 + $0xc] sm:$0x1] %vm1453_vm3, %v4131_v3 }
0x176b   :  { %v3244_v63 = vpop.permute.xlu0 %3243 }
0x176c   :  { %3248 = vst.msk [vmem:[#allocation4 + $0xd] sm:$0x1] %vm1453_vm3, %v3244_v63  ;;  %5878 = vrot.lane.b32.xlu1 %v5875_v19, %s9333_s16  ;;  %v11222_v19 = vand.u32 4294901760, %v11204_v58  ;;  %v8337_v63 = vsub.f32 %v11191_v46, %v11210_v62 }
0x176d   :  { %v5897_v16 = vpop.permute.xlu1 %5896 }
0x176e   :  { %5901 = vst.msk [vmem:[#allocation4 + $0xa] sm:$0x1] %vm1453_vm3, %v5897_v16 }
0x176f   :  { %v5014_v29 = vpop.permute.xlu0 %5013 }
0x1770   :  { %5018 = vst.msk [vmem:[#allocation4 + $0xb] sm:$0x1] %vm1453_vm3, %v5014_v29  ;;  %7644 = vrot.lane.b32.xlu1 %v7641_v26, %s9333_s16  ;;  %v8344_v26 = vsub.f32 %v11204_v58, %v11222_v19  ;;  %v11245_v29 = vand.u32 4294901760, %v11225_v4 }
0x1771   :  { %v2337_v32 = vpop.permute.xlu1 %2336 }
0x1772   :  { %2342 = vst.msk [vmem:[#allocation3 + $0x1] sm:$0x1] %vm1453_vm3, %v2337_v32  ;;  %v8358_v32 = vsub.f32 %v11225_v4, %v11245_v29 }
0x1773   :  { %v6780_v6 = vpop.permute.xlu0 %6779 }
0x1774   :  { %6784 = vst.msk [vmem:[#allocation4 + $0x9] sm:$0x1] %vm1453_vm3, %v6780_v6 }
0x1775   :  { %v4111_v28 = vpop.permute.xlu1 %4110 }
0x1776   :  { %4116 = vst.msk [vmem:[#allocation3 + $0x3] sm:$0x1] %vm1453_vm3, %v4111_v28 }
0x1777   :  { %v1448_v35 = vpop.permute.xlu0 %1447 }
0x1778   :  { %1454 = vst.msk [vmem:[#allocation3] sm:$0x1] %vm1453_vm3, %v1448_v35  ;;  %v8359_v35 = vand.u32 4294901760, %v8358_v32  ;;  %v9282_v32 = vld [vmem:[%s11338_s0] sm:$0xff] }
0x177b   :  { %v3224_v10 = vpop.permute.xlu0 %3223 }
0x177c   :  { %3229 = vst.msk [vmem:[#allocation3 + $0x2] sm:$0x1] %vm1453_vm3, %v3224_v10 }
0x177f   :  { %v4994_v34 = vpop.permute.xlu0 %4993 }
0x1780   :  { %4999 = vst.msk [vmem:[#allocation3 + $0x4] sm:$0x1] %vm1453_vm3, %v4994_v34 }
0x1783   :  { %v6760_v52 = vpop.permute.xlu0 %6759 }
0x1784   :  { %6765 = vst.msk [vmem:[#allocation3 + $0x6] sm:$0x1] %vm1453_vm3, %v6760_v52 }
0x1787   :  { %v1450_v39 = vpop.permute.xlu0 %1449 }
0x1788   :  { %1455 = vst.msk [vmem:[#allocation3 + $0x8] sm:$0x1] %vm1453_vm3, %v1450_v39 }
0x178b   :  { %v3226_v60 = vpop.permute.xlu0 %3225 }
0x178c   :  { %3230 = vst.msk [vmem:[#allocation3 + $0xa] sm:$0x1] %vm1453_vm3, %v3226_v60 }
0x178f   :  { %v4996_v24 = vpop.permute.xlu0 %4995 }
0x1790   :  { %5000 = vst.msk [vmem:[#allocation3 + $0xc] sm:$0x1] %vm1453_vm3, %v4996_v24 }
0x1793   :  { %v6762_v20 = vpop.permute.xlu0 %6761 }
0x1794   :  { %6766 = vst.msk [vmem:[#allocation3 + $0xe] sm:$0x1] %vm1453_vm3, %v6762_v20 }
0x17c6   :  { %v7661_v42 = vpop.permute.xlu1 %7660 }
0x17c7   :  { %7666 = vst.msk [vmem:[#allocation4] sm:$0x1] %vm1453_vm3, %v7661_v42 }
0x17ca   :  { %v7663_v8 = vpop.permute.xlu1 %7662 }
0x17cb   :  { %7667 = vst.msk [vmem:[#allocation4 + $0x8] sm:$0x1] %vm1453_vm3, %v7663_v8 }
0x17ce   :  { %v5877_v45 = vpop.permute.xlu1 %5876  ;;  %v7670_v54 = vld [vmem:[#allocation4] sm:$0xff] }
0x17cf   :  { %5882 = vst.msk [vmem:[#allocation3 + $0x5] sm:$0x1] %vm1453_vm3, %v5877_v45  ;;  %v7681_v36 = vsel %vm1524_vm1, %v7670_v54, 0 }
0x17d0   :  { %v11160_v25 = vand.u32 4294901760, %v7681_v36 }
0x17d2   :  { %8902 = vmatprep.mubr.f32.mxu1 %v11160_v25  ;;  %v7643_v17 = vpop.permute.xlu1 %7642  ;;  %v7671_v0 = vld [vmem:[#allocation4 + $0x8] sm:$0xff]  ;;  %v7756_v47 = vsub.f32 %v7681_v36, %v11160_v25 }
0x17d3   :  { %7648 = vst.msk [vmem:[#allocation3 + $0x7] sm:$0x1] %vm1453_vm3, %v7643_v17  ;;  %v7684_v18 = vsel %vm1524_vm1, %v7671_v0, 0 }
0x17d4   :  { %v11169_v37 = vand.u32 4294901760, %v7684_v18  ;;  %v7757_v49 = vand.u32 4294901760, %v7756_v47 }
0x17d6   :  { %v11177_v9 = vsub.f32 %v7684_v18, %v11169_v37  ;;  %8903 = vmatmul.mubr.f32.vlgmr.msra.gmra.mxu1 %v11169_v37  ;;  %v2339_v40 = vpop.permute.xlu1 %2338  ;;  %v7758_v38 = vsub.f32 %v7756_v47, %v7757_v49 }
0x17d7   :  { %8917 = vmatpush3.msra.mxu1 %v11049_v44  ;;  %2343 = vst.msk [vmem:[#allocation3 + $0x9] sm:$0x1] %vm1453_vm3, %v2339_v40  ;;  %8924 = vmatprep.mubr.f32.mxu1 %v7757_v49 }
0x17d8   :  { %8918 = vmatprep.subr.mxu1 %v11057_v41  ;;  %v7759_v43 = vand.u32 4294901760, %v7758_v38  ;;  %v7767_v21 = vand.u32 4294901760, %v11177_v9 }
0x17d9   :  { %8919 = vmatpush3.msra.mxu1 %v11057_v41 }
0x17da   :  { %8920 = vmatprep.subr.mxu1 %v11070_v33  ;;  %8891 = vmatprep.mubr.f32.mxu0 %v7759_v43  ;;  %v4113_v50 = vpop.permute.xlu1 %4112  ;;  %v7768_v53 = vsub.f32 %v11177_v9, %v7767_v21  ;;  %v7668_v55 = vld [vmem:[#allocation3] sm:$0xff] }
0x17db   :  { %8921 = vmatpush3.msra.mxu1 %v11070_v33  ;;  %4117 = vst.msk [vmem:[#allocation3 + $0xb] sm:$0x1] %vm1453_vm3, %v4113_v50  ;;  %v8215_v3 = vsel %vm1524_vm1, %v7668_v55, 0 }
0x17dc   :  { %8922 = vmatprep.subr.mxu1 %v11085_v14  ;;  %v7769_v56 = vand.u32 4294901760, %v7768_v53  ;;  %v11230_v16 = vand.u32 4294901760, %v8215_v3 }
0x17dd   :  { %8923 = vmatpush3.msra.mxu1 %v11085_v14 }
0x17de   :  { %8925 = vmatmul.mubr.f32.vlgmr.msra.gmra.mxu1 %v7767_v21  ;;  %8938 = vmatprep.subr.mxu1 %v11049_v44  ;;  %v5879_v2 = vpop.permute.xlu1 %5878 }
0x17df   :  { %8892 = vmatmul.mubr.f32.vlgmr.msra.gmra.mxu0 %v7769_v56  ;;  %8939 = vmatpush3.msra.mxu1 %v11049_v44  ;;  %5883 = vst.msk [vmem:[#allocation3 + $0xd] sm:$0x1] %vm1453_vm3, %v5879_v2 }
0x17e0   :  { %8906 = vmatpush3.msra.mxu0 %v11055_v7  ;;  %8946 = vmatprep.mubr.f32.mxu1 %v11160_v25  ;;  %v11235_v7 = vand.u32 4294901760, %v11215_v11 }
0x17e1   :  { %8907 = vmatprep.subr.mxu0 %v11068_v51  ;;  %8913 = vmatprep.mubr.f32.mxu0 %v7756_v47 }
0x17e2   :  { %8940 = vmatprep.subr.mxu1 %v11057_v41  ;;  %8908 = vmatpush3.msra.mxu0 %v11068_v51  ;;  %v7645_v44 = vpop.permute.xlu1 %7644  ;;  %v8338_v51 = vand.u32 4294901760, %v8337_v63  ;;  %v8810_v63 = vld [vmem:[%s11343_s5] ss:$0 sm:$0xff]  ;;  %s9303_s5 = scalar_lea.vmem %s8767_s10, 256 }
0x17e3   :  { %8941 = vmatpush3.msra.mxu1 %v11057_v41  ;;  %8909 = vmatprep.subr.mxu0 %v11083_v61  ;;  %7649 = vst.msk [vmem:[#allocation3 + $0xf] sm:$0x1] %vm1453_vm3, %v7645_v44  ;;  %v11250_v41 = vsub.f32 %v8215_v3, %v11230_v16  ;;  %p9304_p5 = scmp.ne.s32.totalorder %s8767_s10, %s9303_s5  ;;  %p9309_p7 = scmp.lt.s32.totalorder %s9303_s5, %s9303_s5 }
0x17e4   :  { %8942 = vmatprep.subr.mxu1 %v11070_v33  ;;  %8910 = vmatpush3.msra.mxu0 %v11083_v61  ;;  %v8351_v61 = vsub.f32 %v11215_v11, %v11235_v7 }
0x17e5   :  { %8943 = vmatpush3.msra.mxu1 %v11070_v33  ;;  %8911 = vmatprep.subr.mxu0 %v11095_v30  ;;  %v8345_v33 = vand.u32 4294901760, %v8344_v26  ;;  %p9310_p8 = por %p9309_p7, %p9308_p6 }
0x17e6   :  { %8944 = vmatprep.subr.mxu1 %v11085_v14  ;;  %8912 = vmatpush3.msra.mxu0 %v11095_v30  ;;  %v8291_v30 = vand.u32 4294901760, %v11250_v41  ;;  %v8352_v6 = vand.u32 4294901760, %v8351_v61 }
0x17e7   :  { %8945 = vmatpush3.msra.mxu1 %v11085_v14  ;;  %8914 = vmatmul.mubr.f32.vlgmr.msra.gmra.mxu0 %v11177_v9  ;;  %p9311_p9 = pnand %p9310_p8, %p9304_p5 }
0x17e8   :  { %8927 = vmatprep.subr.mxu0 %v11065_v27  ;;  %8947 = vmatmul.mubr.f32.vlgmr.msra.gmra.mxu1 %v11169_v37 }
0x17e9   :  { %8960 = vmatprep.subr.mxu1 %v8338_v51  ;;  %8928 = vmatpush3.msra.mxu0 %v11065_v27  ;;  %v8292_v27 = vsub.f32 %v11250_v41, %v8291_v30 }
0x17ea   :  { %8935 = vmatprep.mubr.f32.mxu0 %v11160_v25  ;;  %8961 = vmatpush3.msra.mxu1 %v8338_v51  ;;  %v7669_v14 = vld [vmem:[#allocation3 + $0x8] sm:$0xff] }
0x17eb   :  { %8968 = vmatprep.mubr.f32.mxu1 %v11230_v16  ;;  %8929 = vmatprep.subr.mxu0 %v11080_v12  ;;  %v8218_v28 = vsel %vm1524_vm1, %v7669_v14, 0 }
0x17ec   :  { %8962 = vmatprep.subr.mxu1 %v8345_v33  ;;  %8930 = vmatpush3.msra.mxu0 %v11080_v12  ;;  %v11269_v10 = vand.u32 4294901760, %v8218_v28  ;;  %v8293_v12 = vand.u32 4294901760, %v8292_v27 }
0x17ed   :  { %8963 = vmatpush3.msra.mxu1 %v8345_v33  ;;  %8931 = vmatprep.subr.mxu0 %v11092_v1 }
0x17ee   :  { %8964 = vmatprep.subr.mxu1 %v8352_v6  ;;  %8932 = vmatpush3.msra.mxu0 %v11092_v1  ;;  %v8300_v34 = vsub.f32 %v8218_v28, %v11269_v10 }
0x17ef   :  { %8965 = vmatpush3.msra.mxu1 %v8352_v6  ;;  %8933 = vmatprep.subr.mxu0 %v11102_v13 }
0x17f0   :  { %8966 = vmatprep.subr.mxu1 %v8359_v35  ;;  %8934 = vmatpush3.msra.mxu0 %v11102_v13  ;;  %v8301_v52 = vand.u32 4294901760, %v8300_v34 }
0x17f1   :  { %8967 = vmatpush3.msra.mxu1 %v8359_v35  ;;  %8936 = vmatmul.mubr.f32.vlgmr.msra.gmra.mxu0 %v11169_v37 }
0x17f2   :  { %8949 = vmatprep.subr.mxu0 %v11171_v57  ;;  %8982 = vmatprep.subr.mxu1 %v11171_v57  ;;  %v8302_v1 = vsub.f32 %v8300_v34, %v8301_v52 }
0x17f3   :  { %8950 = vmatpush3.msra.mxu0 %v11171_v57  ;;  %8957 = vmatprep.mubr.f32.mxu0 %v8293_v12 }
0x17f4   :  { %8969 = vmatmul.mubr.f32.vlgmr.msra.gmra.mxu1 %v11269_v10  ;;  %8951 = vmatprep.subr.mxu0 %v11187_v22  ;;  %v8303_v13 = vand.u32 4294901760, %v8302_v1 }
0x17f5   :  { %8983 = vmatpush3.msra.mxu1 %v11171_v57  ;;  %8990 = vmatprep.mubr.f32.mxu1 %v8291_v30 }
0x17f6   :  { %8984 = vmatprep.subr.mxu1 %v11187_v22  ;;  %8952 = vmatpush3.msra.mxu0 %v11187_v22 }
0x17f7   :  { %8985 = vmatpush3.msra.mxu1 %v11187_v22  ;;  %8953 = vmatprep.subr.mxu0 %v11198_v5 }
0x17f8   :  { %8986 = vmatprep.subr.mxu1 %v11198_v5  ;;  %8954 = vmatpush3.msra.mxu0 %v11198_v5 }
0x17f9   :  { %8987 = vmatpush3.msra.mxu1 %v11198_v5  ;;  %8955 = vmatprep.subr.mxu0 %v11206_v59 }
0x17fa   :  { %8988 = vmatprep.subr.mxu1 %v11206_v59  ;;  %8956 = vmatpush3.msra.mxu0 %v11206_v59 }
0x17fb   :  { %8989 = vmatpush3.msra.mxu1 %v11206_v59  ;;  %8971 = vmatprep.subr.mxu0 %v11191_v46 }
0x17fc   :  { %8991 = vmatmul.mubr.f32.vlgmr.msra.gmra.mxu1 %v8301_v52  ;;  %9004 = vmatprep.subr.mxu1 %v11171_v57 }
0x17fd   :  { %8958 = vmatmul.mubr.f32.vlgmr.msra.gmra.mxu0 %v8303_v13  ;;  %9005 = vmatpush3.msra.mxu1 %v11171_v57 }
0x17fe   :  { %8972 = vmatpush3.msra.mxu0 %v11191_v46  ;;  %9012 = vmatprep.mubr.f32.mxu1 %v11230_v16 }
0x17ff   :  { %8973 = vmatprep.subr.mxu0 %v11204_v58  ;;  %8979 = vmatprep.mubr.f32.mxu0 %v11250_v41  ;;  %v9281_v41 = vld [vmem:[%s11338_s0 + $0x8] sm:$0xff] }
0x1800   :  { %9006 = vmatprep.subr.mxu1 %v11187_v22  ;;  %8974 = vmatpush3.msra.mxu0 %v11204_v58 }
0x1801   :  { %9007 = vmatpush3.msra.mxu1 %v11187_v22  ;;  %8975 = vmatprep.subr.mxu0 %v11215_v11 }
0x1802   :  { %9008 = vmatprep.subr.mxu1 %v11198_v5  ;;  %8976 = vmatpush3.msra.mxu0 %v11215_v11 }
0x1803   :  { %9009 = vmatpush3.msra.mxu1 %v11198_v5  ;;  %8977 = vmatprep.subr.mxu0 %v11225_v4 }
0x1804   :  { %9010 = vmatprep.subr.mxu1 %v11206_v59  ;;  %8978 = vmatpush3.msra.mxu0 %v11225_v4 }
0x1805   :  { %9011 = vmatpush3.msra.mxu1 %v11206_v59  ;;  %8980 = vmatmul.mubr.f32.vlgmr.msra.gmra.mxu0 %v8300_v34 }
0x1806   :  { %8993 = vmatprep.subr.mxu0 %v11210_v62  ;;  %9013 = vmatmul.mubr.f32.vlgmr.msra.gmra.mxu1 %v11269_v10 }
0x1807   :  { %8994 = vmatpush3.msra.mxu0 %v11210_v62  ;;  %9001 = vmatprep.mubr.f32.mxu0 %v11230_v16 }
0x1808   :  { %8995 = vmatprep.subr.mxu0 %v11222_v19 }
0x1809   :  { %8996 = vmatpush3.msra.mxu0 %v11222_v19 }
0x180a   :  { %8997 = vmatprep.subr.mxu0 %v11235_v7 }
0x180b   :  { %8998 = vmatpush3.msra.mxu0 %v11235_v7 }
0x180c   :  { %8999 = vmatprep.subr.mxu0 %v11245_v29 }
0x180d   :  { %9000 = vmatpush3.msra.mxu0 %v11245_v29 }
0x180e   :  { %9002 = vmatmul.mubr.f32.vlgmr.msra.gmra.mxu0 %v11269_v10 }
0x1896   :  { %v8904_v60 = vpop.f32.mrf.mxu1 }
0x1898   :  { %v7862_v42 = vpop.f32.mrf.mxu1 }
0x189e   :  { %v8926_v45 = vpop.f32.mrf.mxu1 }
0x189f   :  { %v8893_v39 = vpop.f32.mrf.mxu0 }
0x18a0   :  { %v7869_v8 = vadd.f32 %v8904_v60, %v8893_v39  ;;  %v8032_v47 = vpop.f32.mrf.mxu1 }
0x18a1   :  { %v7761_v24 = vpop.f32.mrf.mxu0 }
0x18a2   :  { %v7863_v36 = vadd.f32 %v7862_v42, %v7761_v24 }
0x18a7   :  { %v8915_v20 = vpop.f32.mrf.mxu0 }
0x18a8   :  { %v7956_v25 = vadd.f32 %v8915_v20, %v7869_v8  ;;  %v8948_v18 = vpop.f32.mrf.mxu1 }
0x18a9   :  { %v7948_v54 = vpop.f32.mrf.mxu0 }
0x18aa   :  { %v7949_v0 = vadd.f32 %v7948_v54, %v7863_v36  ;;  %v8041_v31 = vadd.f32 %v8926_v45, %v7956_v25  ;;  %v8204_v40 = vpop.f32.mrf.mxu1 }
0x18ac   :  { %v8033_v57 = vadd.f32 %v8032_v47, %v7949_v0 }
0x18b1   :  { %v8937_v17 = vpop.f32.mrf.mxu0 }
0x18b2   :  { %v8130_v49 = vadd.f32 %v8937_v17, %v8041_v31 }
0x18b3   :  { %v8123_v37 = vpop.f32.mrf.mxu0 }
0x18b4   :  { %v8124_v9 = vadd.f32 %v8123_v37, %v8033_v57  ;;  %v8211_v38 = vadd.f32 %v8948_v18, %v8130_v49  ;;  %v8970_v15 = vpop.f32.mrf.mxu1 }
0x18b6   :  { %v8205_v22 = vadd.f32 %v8204_v40, %v8124_v9  ;;  %v8396_v50 = vpop.f32.mrf.mxu1 }
0x18bc   :  { %v8992_v5 = vpop.f32.mrf.mxu1 }
0x18bd   :  { %v8959_v23 = vpop.f32.mrf.mxu0 }
0x18be   :  { %v8306_v21 = vadd.f32 %v8959_v23, %v8211_v38  ;;  %v8566_v62 = vpop.f32.mrf.mxu1 }
0x18bf   :  { %v8295_v43 = vpop.f32.mrf.mxu0 }
0x18c0   :  { %v8296_v46 = vadd.f32 %v8295_v43, %v8205_v22  ;;  %v8403_v53 = vadd.f32 %v8970_v15, %v8306_v21 }
0x18c2   :  { %v8397_v58 = vadd.f32 %v8396_v50, %v8296_v46 }
0x18c5   :  { %v8981_v48 = vpop.f32.mrf.mxu0 }
0x18c6   :  { %v8490_v56 = vadd.f32 %v8981_v48, %v8403_v53  ;;  %v9014_v3 = vpop.f32.mrf.mxu1 }
0x18c7   :  { %v8482_v55 = vpop.f32.mrf.mxu0 }
0x18c8   :  { %v8483_v59 = vadd.f32 %v8482_v55, %v8397_v58  ;;  %v8575_v2 = vadd.f32 %v8992_v5, %v8490_v56  ;;  %v8738_v26 = vpop.f32.mrf.mxu1 }
0x18ca   :  { %v8567_v4 = vadd.f32 %v8566_v62, %v8483_v59 }
0x18ce   :  { %v9003_v11 = vpop.f32.mrf.mxu0 }
0x18cf   :  { %v8664_v19 = vadd.f32 %v9003_v11, %v8575_v2 }
0x18d0   :  { %v8657_v16 = vpop.f32.mrf.mxu0 }
0x18d1   :  { %v8745_v44 = vadd.f32 %v9014_v3, %v8664_v19  ;;  %v8658_v7 = vadd.f32 %v8657_v16, %v8567_v4 }
0x18d3   :  { %v8756_v29 = vadd.f32 %v8810_v63, %v8745_v44  ;;  %v8739_v51 = vadd.f32 %v8738_v26, %v8658_v7 }
0x18d5   :  { %v8758_v61 = vadd.f32 %v9281_v41, %v8756_v29  ;;  %v8755_v33 = vadd.f32 %v8810_v63, %v8739_v51 }
0x18d7   :  { %8760 = vst.msk [vmem:[#allocation8 + $0x8] sm:$0xff] %vm56_vm0, %v8758_v61  ;;  %v8757_v30 = vadd.f32 %v9282_v32, %v8755_v33 }
0x18d9   :  { %8759 = vst.msk [vmem:[#allocation8] sm:$0xff] %vm56_vm0, %v8757_v30 }
0x18da   :  { %9314 = shalt.err (!%p9311_p9)
}
0x18db   :  { %s9335_s1 = smov 128   ;;  %s9336_s15 = smov 8  }
0x18dc   :  { %8772 = dma.vmem_to_hbm [thread:$0]  %s8767_s10, 256, %s11344_s6, [#allocation7], %s9335_s1, %s9335_s1, %s9336_s15  }
0x18dd   :  { %9325 = dma.done.wait [#allocation7], 256  }
0x18de   :  { %9326 = vsyncadd [#allocation7], 4294967040 }
0x18df   :  { %8776 = vsyncpa [#allocation6], 1 }
0x18e0   :  { %8777 = vsyncpa [#allocation7], 1 }

</bundles_post_ra>
